<compile_context>
chip_gen: v6e
topology: v6e:2x2x1
jax: 0.10.0
libtpu: 0.0.40
codegen_flags: <defaults>
</compile_context>

<pallas_src>
import functools
import math

import jax
import jax.numpy as jnp
import numpy as np
from jax import lax
from jax.experimental import pallas as pl
from jax.experimental.pallas import tpu as pltpu


# ----------------------------- in-kernel helpers -----------------------------

def _layer_norm(x, gamma, beta, eps=1e-5):
    # PyTorch nn.LayerNorm: population variance, eps inside sqrt.
    mean = jnp.mean(x, axis=-1, keepdims=True)
    var = jnp.mean((x - mean) ** 2, axis=-1, keepdims=True)
    return (x - mean) * lax.rsqrt(var + eps) * gamma + beta


def _gelu_exact(x):
    # PyTorch F.gelu default: exact erf formulation.
    return x * 0.5 * (1.0 + lax.erf(x * (1.0 / math.sqrt(2.0))))


# ----------------------------- fused kernel -----------------------------------

def fused_block_kernel(x_ref,
                       n1g, n1b, wqkv1, wo1, bo1,
                       n2g, n2b, wqkv2, wo2, bo2,
                       n3g, n3b, w1, b1, w2, b2,
                       o_ref,
                       x_s, q_s, k_s, v_s,
                       *, heads, dim_head, ff_inner, tq, tk, tf, compute_dtype):
    cast = (lambda t: t) if compute_dtype is None else (lambda t: t.astype(compute_dtype))
    n = x_s.shape[0]
    hd = heads * dim_head
    nq = n // tq
    nk = n // tk
    nf = n // tf

    # Residual stream stays resident in VMEM through all three sublayers.
    x_s[...] = x_ref[...].astype(jnp.float32)

    def attn_sublayer(g_ref, b_ref, wqkv_ref, wo_ref, bo_ref):
        # --- projection pass (row-tiled): one lane-dense (tq, C) @ (C, 3*H*Dh) matmul ---
        @pl.loop(0, nq)
        def _(ri):
            rows = pl.ds(pl.multiple_of(ri * tq, tq), tq)
            xn = _layer_norm(x_s[rows, :], g_ref[...], b_ref[...])
            qkv = jnp.dot(cast(xn), cast(wqkv_ref[...]),
                          preferred_element_type=jnp.float32)            # (tq, 3*H*Dh)
            # Scatter into head-major scratch via static per-head lane slices
            # (no broadcast copies, no in-kernel transposes).
            for h in range(heads):
                q_s[h, rows, :] = qkv[:, h * dim_head:(h + 1) * dim_head].astype(q_s.dtype)
                k_s[h, rows, :] = qkv[:, hd + h * dim_head:
                                      hd + (h + 1) * dim_head].astype(k_s.dtype)
                v_s[h, rows, :] = qkv[:, 2 * hd + h * dim_head:
                                      2 * hd + (h + 1) * dim_head].astype(v_s.dtype)

        # --- flash attention: q-tile loop x kv-tile online-softmax loop ---
        @pl.loop(0, nq)
        def _(qi):
            rs = pl.multiple_of(qi * tq, tq)
            q_t = q_s[:, pl.ds(rs, tq), :]                               # (H, tq, Dh)

            def kv_step(ki, carry):
                m, l, acc = carry
                ks_ = pl.multiple_of(ki * tk, tk)
                k_t = k_s[:, pl.ds(ks_, tk), :]
                v_t = v_s[:, pl.ds(ks_, tk), :]
                # fp32 logits (matches _ATTN_PRECISION='fp32'); scale folded into Wq.
                s = jnp.einsum("hqd,hkd->hqk", q_t, k_t,
                               preferred_element_type=jnp.float32)       # (H, tq, tk)
                m_new = jnp.maximum(m, jnp.max(s, axis=-1, keepdims=True))
                alpha = jnp.exp(m - m_new)
                p = jnp.exp(s - m_new)
                l_new = alpha * l + jnp.sum(p, axis=-1, keepdims=True)
                acc_new = alpha * acc + jnp.einsum("hqk,hkd->hqd", cast(p), v_t,
                                                   preferred_element_type=jnp.float32)
                return m_new, l_new, acc_new

            m0 = jnp.full((heads, tq, 1), -jnp.inf, jnp.float32)
            l0 = jnp.zeros((heads, tq, 1), jnp.float32)
            a0 = jnp.zeros((heads, tq, dim_head), jnp.float32)
            m_f, l_f, acc_f = lax.fori_loop(0, nk, kv_step, (m0, l0, a0))

            inv = pl.reciprocal(l_f, approx=True)                        # EUP slot
            inv = inv * (2.0 - l_f * inv)                                # Newton -> ~exact
            o_t = acc_f * inv                                            # (H, tq, Dh)

            # (tq, H*Dh) head-major layout, then ONE K=H*Dh output projection matmul.
            o_flat = jnp.concatenate([o_t[h] for h in range(heads)], axis=-1)
            proj = jnp.dot(cast(o_flat), cast(wo_ref[...]),
                           preferred_element_type=jnp.float32) + bo_ref[...]
            rows = pl.ds(rs, tq)
            x_s[rows, :] = x_s[rows, :] + proj

    # x = attn1(norm1(x)) + x ; x = attn2(norm2(x)) + x   (context=None -> self-attention)
    attn_sublayer(n1g, n1b, wqkv1, wo1, bo1)
    attn_sublayer(n2g, n2b, wqkv2, wo2, bo2)

    # x = ff(norm3(x)) + x   (row-tiled GEGLU -> Linear)
    @pl.loop(0, nf)
    def _(fi):
        rows = pl.ds(pl.multiple_of(fi * tf, tf), tf)
        xt = x_s[rows, :]
        xn = _layer_norm(xt, n3g[...], n3b[...])
        pr = jnp.dot(cast(xn), cast(w1[...]),
                     preferred_element_type=jnp.float32) + b1[...]       # (tf, 2*ff_inner)
        a = pr[:, :ff_inner]              # lane offsets multiples of 128 at real shapes
        gate = pr[:, ff_inner:]
        hgl = a * _gelu_exact(gate)
        y = jnp.dot(cast(hgl), cast(w2[...]),
                    preferred_element_type=jnp.float32) + b2[...]
        x_s[rows, :] = xt + y

    o_ref[...] = x_s[...].astype(o_ref.dtype)


# ----------------------------- wrapper -----------------------------------------

def pack_params(p, *, heads, dim_head, compute_dtype=jnp.bfloat16):
    """One-time weight repacking (hoist out of the per-forward call):
       fold softmax scale into Wq, concatenate q/k/v into (C, 3*H*Dh), and cast
       matmul weights to the MXU compute dtype; LayerNorm params / biases stay f32."""
    scale = float(dim_head) ** -0.5
    wdt = jnp.float32 if compute_dtype is None else compute_dtype
    f32 = lambda t: t.astype(jnp.float32)

    def pack_qkv(wq, wk, wv):
        return jnp.concatenate([wq * scale, wk, wv], axis=1).astype(wdt)   # (C, 3*H*Dh)

    return {
        "n1_g": f32(p["n1_g"]), "n1_b": f32(p["n1_b"]),
        "n2_g": f32(p["n2_g"]), "n2_b": f32(p["n2_b"]),
        "n3_g": f32(p["n3_g"]), "n3_b": f32(p["n3_b"]),
        "wqkv1": pack_qkv(p["a1_wq"], p["a1_wk"], p["a1_wv"]),
        "wo1": p["a1_wo"].astype(wdt), "bo1": f32(p["a1_bo"]),
        "wqkv2": pack_qkv(p["a2_wq"], p["a2_wk"], p["a2_wv"]),
        "wo2": p["a2_wo"].astype(wdt), "bo2": f32(p["a2_bo"]),
        "w1": p["ff_w1"].astype(wdt), "b1": f32(p["ff_b1"]),
        "w2": p["ff_w2"].astype(wdt), "b2": f32(p["ff_b2"]),
    }


def _vmem_limit_bytes(N, C, heads, dim_head, ff_inner, tq, tk, tf, qkv_dtype):
    cb = jnp.dtype(qkv_dtype).itemsize
    hd = heads * dim_head
    scratch = N * C * 4 + 3 * heads * N * dim_head * cb
    io = 2 * 2 * N * C * 4                                             # in/out double-buffered
    weights = (2 * 3 * hd * C + 2 * hd * C + 3 * C * ff_inner) * cb + (9 * C + 2 * ff_inner) * 4
    live = heads * tq * tk * 4 + 2 * heads * tq * dim_head * 4 + tq * 3 * hd * 4 \
        + tf * 2 * ff_inner * 4
    est = scratch + io + 2 * weights + live
    return int(min(100 * 2 ** 20, max(32 * 2 ** 20, 2 * est)))


def basic_transformer_block(x, packed, *, heads, dim_head, ff_inner,
                            compute_dtype=jnp.bfloat16, tq=256, tk=256, tf=256):
    B, N, C = x.shape
    hd = heads * dim_head
    tq, tk, tf = min(tq, N), min(tk, N), min(tf, N)
    assert N % tq == 0 and N % tk == 0 and N % tf == 0
    # TODO(synk): ragged N (non-divisible tiles) would need masked tail tiles.

    qkv_dtype = jnp.float32 if compute_dtype is None else compute_dtype
    vmem_limit = _vmem_limit_bytes(N, C, heads, dim_head, ff_inner, tq, tk, tf, qkv_dtype)

    kernel = functools.partial(fused_block_kernel, heads=heads, dim_head=dim_head,
                               ff_inner=ff_inner, tq=tq, tk=tk, tf=tf,
                               compute_dtype=compute_dtype)

    io_spec = pl.BlockSpec((pl.Squeezed(), N, C), lambda b: (b, 0, 0))

    def build(single_buffer_weights):
        def wspec(shape):
            nd = len(shape)
            kw = {}
            if single_buffer_weights:
                # Constant index map -> double-buffering only doubles VMEM use.
                kw["pipeline_mode"] = pl.Buffered(1)
            return pl.BlockSpec(shape, lambda b, _nd=nd: (0,) * _nd, **kw)

        in_specs = [
            io_spec,
            wspec((1, C)), wspec((1, C)), wspec((C, 3 * hd)), wspec((hd, C)), wspec((1, C)),
            wspec((1, C)), wspec((1, C)), wspec((C, 3 * hd)), wspec((hd, C)), wspec((1, C)),
            wspec((1, C)), wspec((1, C)), wspec((C, 2 * ff_inner)), wspec((1, 2 * ff_inner)),
            wspec((ff_inner, C)), wspec((1, C)),
        ]
        return pl.pallas_call(
            kernel,
            out_shape=jax.ShapeDtypeStruct((B, N, C), x.dtype),
            grid=(B,),
            in_specs=in_specs,
            out_specs=io_spec,
            scratch_shapes=[
                pltpu.VMEM((N, C), jnp.float32),               # resident residual stream
                pltpu.VMEM((heads, N, dim_head), qkv_dtype),   # q (head-major)
                pltpu.VMEM((heads, N, dim_head), qkv_dtype),   # k
                pltpu.VMEM((heads, N, dim_head), qkv_dtype),   # v
            ],
            compiler_params=pltpu.CompilerParams(
                dimension_semantics=("parallel",),
                vmem_limit_bytes=vmem_limit),
        )

    args = (x,
            packed["n1_g"], packed["n1_b"], packed["wqkv1"], packed["wo1"], packed["bo1"],
            packed["n2_g"], packed["n2_b"], packed["wqkv2"], packed["wo2"], packed["bo2"],
            packed["n3_g"], packed["n3_b"], packed["w1"], packed["b1"],
            packed["w2"], packed["b2"])

    try:
        return jax.block_until_ready(build(True)(*args))
    except Exception:
        # pl.Buffered(1) not accepted by this jax/Mosaic version -> default buffering.
        return jax.block_until_ready(build(False)(*args))


# ----------------------------- pure-JAX reference -----------------------------

def _ref_attn(x, g, b, wq, wk, wv, wo, bo, heads, dim_head):
    B, N, C = x.shape
    xn = _layer_norm(x, g, b)
    q = xn @ wq; k = xn @ wk; v = xn @ wv
    q = q.reshape(B, N, heads, dim_head).transpose(0, 2, 1, 3)
    k = k.reshape(B, N, heads, dim_head).transpose(0, 2, 1, 3)
    v = v.reshape(B, N, heads, dim_head).transpose(0, 2, 1, 3)
    sim = jnp.einsum("bhid,bhjd->bhij", q, k) * (dim_head ** -0.5)
    p = jax.nn.softmax(sim, axis=-1)
    o = jnp.einsum("bhij,bhjd->bhid", p, v).transpose(0, 2, 1, 3).reshape(B, N, -1)
    return o @ wo + bo + x


def _ref_ff(x, g, b, w1, b1, w2, b2, inner):
    xn = _layer_norm(x, g, b)
    proj = xn @ w1 + b1
    a, gate = proj[..., :inner], proj[..., inner:]
    h = a * _gelu_exact(gate)
    return h @ w2 + b2 + x


def _ref_block(x, p, heads, dim_head, ff_inner):
    x = _ref_attn(x, p["n1_g"], p["n1_b"], p["a1_wq"], p["a1_wk"], p["a1_wv"],
                  p["a1_wo"], p["a1_bo"], heads, dim_head)
    x = _ref_attn(x, p["n2_g"], p["n2_b"], p["a2_wq"], p["a2_wk"], p["a2_wv"],
                  p["a2_wo"], p["a2_bo"], heads, dim_head)
    x = _ref_ff(x, p["n3_g"], p["n3_b"], p["ff_w1"], p["ff_b1"],
                p["ff_w2"], p["ff_b2"], ff_inner)
    return x


# ----------------------------- main -------------------------------------------

if __name__ == "__main__":
    B, N, DIM = 2, 16, 32
    HEADS, DHEAD = 4, 8          # inner_dim = 32
    INNER = HEADS * DHEAD
    FF_INNER = 4 * DIM           # FeedForward mult=4

    key = jax.random.PRNGKey(0)
    ks = jax.random.split(key, 16)

    def w(k, shape, scale=0.05):
        return jax.random.normal(k, shape, jnp.float32) * scale

    # Weights stored pre-transposed: Linear(out,in) in PyTorch -> (in,out) here, y = x @ W.
    params = {
        "n1_g": jnp.ones((1, DIM), jnp.float32), "n1_b": jnp.zeros((1, DIM), jnp.float32),
        "n2_g": jnp.ones((1, DIM), jnp.float32), "n2_b": jnp.zeros((1, DIM), jnp.float32),
        "n3_g": jnp.ones((1, DIM), jnp.float32), "n3_b": jnp.zeros((1, DIM), jnp.float32),
        "a1_wq": w(ks[0], (DIM, INNER)), "a1_wk": w(ks[1], (DIM, INNER)),
        "a1_wv": w(ks[2], (DIM, INNER)), "a1_wo": w(ks[3], (INNER, DIM)),
        "a1_bo": w(ks[4], (1, DIM)),
        "a2_wq": w(ks[5], (DIM, INNER)), "a2_wk": w(ks[6], (DIM, INNER)),
        "a2_wv": w(ks[7], (DIM, INNER)), "a2_wo": w(ks[8], (INNER, DIM)),
        "a2_bo": w(ks[9], (1, DIM)),
        "ff_w1": w(ks[10], (DIM, 2 * FF_INNER)), "ff_b1": w(ks[11], (1, 2 * FF_INNER)),
        "ff_w2": w(ks[12], (FF_INNER, DIM)), "ff_b2": w(ks[13], (1, DIM)),
    }

    x = jax.random.normal(ks[14], (B, N, DIM), jnp.float32)
    ref = _ref_block(x, params, HEADS, DHEAD, FF_INNER)

    # f32 path: strict correctness check against the pure-JAX reference.
    packed_f32 = pack_params(params, heads=HEADS, dim_head=DHEAD, compute_dtype=None)
    out_f32 = basic_transformer_block(x, packed_f32, heads=HEADS, dim_head=DHEAD,
                                      ff_inner=FF_INNER, compute_dtype=None)
    out_f32 = jax.block_until_ready(out_f32)
    np.testing.assert_allclose(np.asarray(out_f32), np.asarray(ref), rtol=1e-4, atol=1e-4)

    # bf16 production path (wrapper-cast weights, f32 accumulation/stats), loose tolerance.
    packed_bf16 = pack_params(params, heads=HEADS, dim_head=DHEAD, compute_dtype=jnp.bfloat16)
    out_bf16 = basic_transformer_block(x, packed_bf16, heads=HEADS, dim_head=DHEAD,
                                       ff_inner=FF_INNER, compute_dtype=jnp.bfloat16)
    out_bf16 = jax.block_until_ready(out_bf16)
    np.testing.assert_allclose(np.asarray(out_bf16), np.asarray(ref), rtol=5e-2, atol=5e-2)

    # TODO(synk): dropout (eval-mode identity), attention mask, cross-attention context,
    #             and the MultiHeadExternalAttention / RMTBlock / ff_EA variants of the
    #             module are not implemented (not exercised by the default forward).
    print("KERNEL_OK")
</pallas_src>

<mosaic_0001>
module attributes {stable_mosaic.version = 11 : i64} {
  func.func @fused_block_kernel(%arg0: i32, %arg1: memref<1x16x32xf32, #tpu.memory_space<vmem>>, %arg2: memref<1x32xf32, #tpu.memory_space<vmem>>, %arg3: memref<1x32xf32, #tpu.memory_space<vmem>>, %arg4: memref<32x96xf32, #tpu.memory_space<vmem>>, %arg5: memref<32x32xf32, #tpu.memory_space<vmem>>, %arg6: memref<1x32xf32, #tpu.memory_space<vmem>>, %arg7: memref<1x32xf32, #tpu.memory_space<vmem>>, %arg8: memref<1x32xf32, #tpu.memory_space<vmem>>, %arg9: memref<32x96xf32, #tpu.memory_space<vmem>>, %arg10: memref<32x32xf32, #tpu.memory_space<vmem>>, %arg11: memref<1x32xf32, #tpu.memory_space<vmem>>, %arg12: memref<1x32xf32, #tpu.memory_space<vmem>>, %arg13: memref<1x32xf32, #tpu.memory_space<vmem>>, %arg14: memref<32x256xf32, #tpu.memory_space<vmem>>, %arg15: memref<1x256xf32, #tpu.memory_space<vmem>>, %arg16: memref<128x32xf32, #tpu.memory_space<vmem>>, %arg17: memref<1x32xf32, #tpu.memory_space<vmem>>, %arg18: memref<1x16x32xf32, #tpu.memory_space<vmem>>, %arg19: memref<16x32xf32, #tpu.memory_space<vmem>>, %arg20: memref<4x16x8xf32, #tpu.memory_space<vmem>>, %arg21: memref<4x16x8xf32, #tpu.memory_space<vmem>>, %arg22: memref<4x16x8xf32, #tpu.memory_space<vmem>>) attributes {dimension_semantics = [#tpu.dimension_semantics<parallel>], iteration_bounds = array<i64: 2>, scalar_prefetch = 0 : i64, scratch_operands = 4 : i64, tpu.core_type = #tpu.core_type<tc>, window_params = [{transform_indices = @transform_0, window_bounds = array<i64: 1, 16, 32>}, {pipeline_mode = #tpu.pipeline_mode<synchronous>, transform_indices = @transform_1, window_bounds = array<i64: 1, 32>}, {pipeline_mode = #tpu.pipeline_mode<synchronous>, transform_indices = @transform_2, window_bounds = array<i64: 1, 32>}, {pipeline_mode = #tpu.pipeline_mode<synchronous>, transform_indices = @transform_3, window_bounds = array<i64: 32, 96>}, {pipeline_mode = #tpu.pipeline_mode<synchronous>, transform_indices = @transform_4, window_bounds = array<i64: 32, 32>}, {pipeline_mode = #tpu.pipeline_mode<synchronous>, transform_indices = @transform_5, window_bounds = array<i64: 1, 32>}, {pipeline_mode = #tpu.pipeline_mode<synchronous>, transform_indices = @transform_6, window_bounds = array<i64: 1, 32>}, {pipeline_mode = #tpu.pipeline_mode<synchronous>, transform_indices = @transform_7, window_bounds = array<i64: 1, 32>}, {pipeline_mode = #tpu.pipeline_mode<synchronous>, transform_indices = @transform_8, window_bounds = array<i64: 32, 96>}, {pipeline_mode = #tpu.pipeline_mode<synchronous>, transform_indices = @transform_9, window_bounds = array<i64: 32, 32>}, {pipeline_mode = #tpu.pipeline_mode<synchronous>, transform_indices = @transform_10, window_bounds = array<i64: 1, 32>}, {pipeline_mode = #tpu.pipeline_mode<synchronous>, transform_indices = @transform_11, window_bounds = array<i64: 1, 32>}, {pipeline_mode = #tpu.pipeline_mode<synchronous>, transform_indices = @transform_12, window_bounds = array<i64: 1, 32>}, {pipeline_mode = #tpu.pipeline_mode<synchronous>, transform_indices = @transform_13, window_bounds = array<i64: 32, 256>}, {pipeline_mode = #tpu.pipeline_mode<synchronous>, transform_indices = @transform_14, window_bounds = array<i64: 1, 256>}, {pipeline_mode = #tpu.pipeline_mode<synchronous>, transform_indices = @transform_15, window_bounds = array<i64: 128, 32>}, {pipeline_mode = #tpu.pipeline_mode<synchronous>, transform_indices = @transform_16, window_bounds = array<i64: 1, 32>}, {transform_indices = @transform_17, window_bounds = array<i64: 1, 16, 32>}]} {
    %c0 = arith.constant 0 : index
    %c0_0 = arith.constant 0 : index
    %c0_1 = arith.constant 0 : index
    %0 = vector.load %arg1[%c0, %c0_0, %c0_1] : memref<1x16x32xf32, #tpu.memory_space<vmem>>, vector<1x16x32xf32>
    %1 = vector.shape_cast %0 : vector<1x16x32xf32> to vector<16x32xf32>
    %c0_2 = arith.constant 0 : index
    %c0_3 = arith.constant 0 : index
    %2 = vector.load %arg19[%c0_2, %c0_3] : memref<16x32xf32, #tpu.memory_space<vmem>>, vector<16x32xf32>
    tpu.vector_store %arg19[%c0_2, %c0_3], %1 {strides = array<i32>} : memref<16x32xf32, #tpu.memory_space<vmem>>, vector<16x32xf32>,
    %c0_i32 = arith.constant 0 : i32
    %c1_i32 = arith.constant 1 : i32
    %3 = arith.muli %c0_i32, %c1_i32 : i32
    %c0_i32_4 = arith.constant 0 : i32
    %4 = arith.addi %c0_i32_4, %3 : i32
    %c16_i32 = arith.constant 16 : i32
    %5 = arith.muli %4, %c16_i32 : i32
    %6 = tpu.assume_multiple %5, 16 : i32
    %7 = arith.index_cast %6 : i32 to index
    %c0_5 = arith.constant 0 : index
    %8 = vector.load %arg19[%7, %c0_5] : memref<16x32xf32, #tpu.memory_space<vmem>>, vector<16x32xf32>
    %c0_6 = arith.constant 0 : index
    %c0_7 = arith.constant 0 : index
    %9 = vector.load %arg2[%c0_6, %c0_7] : memref<1x32xf32, #tpu.memory_space<vmem>>, vector<1x32xf32>
    %c0_8 = arith.constant 0 : index
    %c0_9 = arith.constant 0 : index
    %10 = vector.load %arg3[%c0_8, %c0_9] : memref<1x32xf32, #tpu.memory_space<vmem>>, vector<1x32xf32>
    %cst = arith.constant dense<0.000000e+00> : vector<16xf32>
    %11 = vector.multi_reduction <add>, %8, %cst [1] : vector<16x32xf32> to vector<16xf32>
    %12 = vector.shape_cast %11 : vector<16xf32> to vector<16x1xf32>
    %cst_10 = arith.constant 3.200000e+01 : f32
    %13 = vector.broadcast %cst_10 : f32 to vector<16x1xf32>
    %14 = arith.divf %12, %13 : vector<16x1xf32>
    %15 = vector.broadcast %14 : vector<16x1xf32> to vector<16x32xf32>
    %16 = arith.subf %8, %15 : vector<16x32xf32>
    %17 = arith.mulf %16, %16 : vector<16x32xf32>
    %cst_11 = arith.constant dense<0.000000e+00> : vector<16xf32>
    %18 = vector.multi_reduction <add>, %17, %cst_11 [1] : vector<16x32xf32> to vector<16xf32>
    %19 = vector.shape_cast %18 : vector<16xf32> to vector<16x1xf32>
    %cst_12 = arith.constant 3.200000e+01 : f32
    %20 = vector.broadcast %cst_12 : f32 to vector<16x1xf32>
    %21 = arith.divf %19, %20 : vector<16x1xf32>
    %22 = vector.broadcast %14 : vector<16x1xf32> to vector<16x32xf32>
    %23 = arith.subf %8, %22 : vector<16x32xf32>
    %cst_13 = arith.constant 9.99999974E-6 : f32
    %24 = vector.broadcast %cst_13 : f32 to vector<16x1xf32>
    %25 = arith.addf %21, %24 : vector<16x1xf32>
    %26 = math.rsqrt %25 : vector<16x1xf32>
    %27 = vector.broadcast %26 : vector<16x1xf32> to vector<16x32xf32>
    %28 = arith.mulf %23, %27 : vector<16x32xf32>
    %29 = vector.broadcast %9 : vector<1x32xf32> to vector<16x32xf32>
    %30 = arith.mulf %28, %29 : vector<16x32xf32>
    %31 = vector.broadcast %10 : vector<1x32xf32> to vector<16x32xf32>
    %32 = arith.addf %30, %31 : vector<16x32xf32>
    %c0_14 = arith.constant 0 : index
    %c0_15 = arith.constant 0 : index
    %33 = vector.load %arg4[%c0_14, %c0_15] : memref<32x96xf32, #tpu.memory_space<vmem>>, vector<32x96xf32>
    %cst_16 = arith.constant dense<0.000000e+00> : vector<16x96xf32>
    %34 = tpu.matmul %32, %33, %cst_16 {dimension_numbers = #tpu.dot_dimension_numbers<[1], [0], [0], [1], [0, 0, 1, 1], [], []>} : vector<16x32xf32>, vector<32x96xf32>, vector<16x96xf32> -> vector<16x96xf32>
    %35 = vector.extract_strided_slice %34 {offsets = [0, 0], sizes = [16, 8], strides = [1, 1]} : vector<16x96xf32> to vector<16x8xf32>
    %c0_17 = arith.constant 0 : index
    %36 = arith.index_cast %6 : i32 to index
    %c0_18 = arith.constant 0 : index
    %37 = vector.load %arg20[%c0_17, %36, %c0_18] : memref<4x16x8xf32, #tpu.memory_space<vmem>>, vector<1x16x8xf32>
    %38 = vector.shape_cast %37 : vector<1x16x8xf32> to vector<16x8xf32>
    %39 = vector.shape_cast %35 : vector<16x8xf32> to vector<1x16x8xf32>
    tpu.vector_store %arg20[%c0_17, %36, %c0_18], %39 {strides = array<i32>} : memref<4x16x8xf32, #tpu.memory_space<vmem>>, vector<1x16x8xf32>,
    %40 = vector.extract_strided_slice %34 {offsets = [0, 32], sizes = [16, 8], strides = [1, 1]} : vector<16x96xf32> to vector<16x8xf32>
    %c0_19 = arith.constant 0 : index
    %41 = arith.index_cast %6 : i32 to index
    %c0_20 = arith.constant 0 : index
    %42 = vector.load %arg21[%c0_19, %41, %c0_20] : memref<4x16x8xf32, #tpu.memory_space<vmem>>, vector<1x16x8xf32>
    %43 = vector.shape_cast %42 : vector<1x16x8xf32> to vector<16x8xf32>
    %44 = vector.shape_cast %40 : vector<16x8xf32> to vector<1x16x8xf32>
    tpu.vector_store %arg21[%c0_19, %41, %c0_20], %44 {strides = array<i32>} : memref<4x16x8xf32, #tpu.memory_space<vmem>>, vector<1x16x8xf32>,
    %45 = vector.extract_strided_slice %34 {offsets = [0, 64], sizes = [16, 8], strides = [1, 1]} : vector<16x96xf32> to vector<16x8xf32>
    %c0_21 = arith.constant 0 : index
    %46 = arith.index_cast %6 : i32 to index
    %c0_22 = arith.constant 0 : index
    %47 = vector.load %arg22[%c0_21, %46, %c0_22] : memref<4x16x8xf32, #tpu.memory_space<vmem>>, vector<1x16x8xf32>
    %48 = vector.shape_cast %47 : vector<1x16x8xf32> to vector<16x8xf32>
    %49 = vector.shape_cast %45 : vector<16x8xf32> to vector<1x16x8xf32>
    tpu.vector_store %arg22[%c0_21, %46, %c0_22], %49 {strides = array<i32>} : memref<4x16x8xf32, #tpu.memory_space<vmem>>, vector<1x16x8xf32>,
    %50 = vector.extract_strided_slice %34 {offsets = [0, 8], sizes = [16, 8], strides = [1, 1]} : vector<16x96xf32> to vector<16x8xf32>
    %c1 = arith.constant 1 : index
    %51 = arith.index_cast %6 : i32 to index
    %c0_23 = arith.constant 0 : index
    %52 = vector.load %arg20[%c1, %51, %c0_23] : memref<4x16x8xf32, #tpu.memory_space<vmem>>, vector<1x16x8xf32>
    %53 = vector.shape_cast %52 : vector<1x16x8xf32> to vector<16x8xf32>
    %54 = vector.shape_cast %50 : vector<16x8xf32> to vector<1x16x8xf32>
    tpu.vector_store %arg20[%c1, %51, %c0_23], %54 {strides = array<i32>} : memref<4x16x8xf32, #tpu.memory_space<vmem>>, vector<1x16x8xf32>,
    %55 = vector.extract_strided_slice %34 {offsets = [0, 40], sizes = [16, 8], strides = [1, 1]} : vector<16x96xf32> to vector<16x8xf32>
    %c1_24 = arith.constant 1 : index
    %56 = arith.index_cast %6 : i32 to index
    %c0_25 = arith.constant 0 : index
    %57 = vector.load %arg21[%c1_24, %56, %c0_25] : memref<4x16x8xf32, #tpu.memory_space<vmem>>, vector<1x16x8xf32>
    %58 = vector.shape_cast %57 : vector<1x16x8xf32> to vector<16x8xf32>
    %59 = vector.shape_cast %55 : vector<16x8xf32> to vector<1x16x8xf32>
    tpu.vector_store %arg21[%c1_24, %56, %c0_25], %59 {strides = array<i32>} : memref<4x16x8xf32, #tpu.memory_space<vmem>>, vector<1x16x8xf32>,
    %60 = vector.extract_strided_slice %34 {offsets = [0, 72], sizes = [16, 8], strides = [1, 1]} : vector<16x96xf32> to vector<16x8xf32>
    %c1_26 = arith.constant 1 : index
    %61 = arith.index_cast %6 : i32 to index
    %c0_27 = arith.constant 0 : index
    %62 = vector.load %arg22[%c1_26, %61, %c0_27] : memref<4x16x8xf32, #tpu.memory_space<vmem>>, vector<1x16x8xf32>
    %63 = vector.shape_cast %62 : vector<1x16x8xf32> to vector<16x8xf32>
    %64 = vector.shape_cast %60 : vector<16x8xf32> to vector<1x16x8xf32>
    tpu.vector_store %arg22[%c1_26, %61, %c0_27], %64 {strides = array<i32>} : memref<4x16x8xf32, #tpu.memory_space<vmem>>, vector<1x16x8xf32>,
    %65 = vector.extract_strided_slice %34 {offsets = [0, 16], sizes = [16, 8], strides = [1, 1]} : vector<16x96xf32> to vector<16x8xf32>
    %c2 = arith.constant 2 : index
    %66 = arith.index_cast %6 : i32 to index
    %c0_28 = arith.constant 0 : index
    %67 = vector.load %arg20[%c2, %66, %c0_28] : memref<4x16x8xf32, #tpu.memory_space<vmem>>, vector<1x16x8xf32>
    %68 = vector.shape_cast %67 : vector<1x16x8xf32> to vector<16x8xf32>
    %69 = vector.shape_cast %65 : vector<16x8xf32> to vector<1x16x8xf32>
    tpu.vector_store %arg20[%c2, %66, %c0_28], %69 {strides = array<i32>} : memref<4x16x8xf32, #tpu.memory_space<vmem>>, vector<1x16x8xf32>,
    %70 = vector.extract_strided_slice %34 {offsets = [0, 48], sizes = [16, 8], strides = [1, 1]} : vector<16x96xf32> to vector<16x8xf32>
    %c2_29 = arith.constant 2 : index
    %71 = arith.index_cast %6 : i32 to index
    %c0_30 = arith.constant 0 : index
    %72 = vector.load %arg21[%c2_29, %71, %c0_30] : memref<4x16x8xf32, #tpu.memory_space<vmem>>, vector<1x16x8xf32>
    %73 = vector.shape_cast %72 : vector<1x16x8xf32> to vector<16x8xf32>
    %74 = vector.shape_cast %70 : vector<16x8xf32> to vector<1x16x8xf32>
    tpu.vector_store %arg21[%c2_29, %71, %c0_30], %74 {strides = array<i32>} : memref<4x16x8xf32, #tpu.memory_space<vmem>>, vector<1x16x8xf32>,
    %75 = vector.extract_strided_slice %34 {offsets = [0, 80], sizes = [16, 8], strides = [1, 1]} : vector<16x96xf32> to vector<16x8xf32>
    %c2_31 = arith.constant 2 : index
    %76 = arith.index_cast %6 : i32 to index
    %c0_32 = arith.constant 0 : index
    %77 = vector.load %arg22[%c2_31, %76, %c0_32] : memref<4x16x8xf32, #tpu.memory_space<vmem>>, vector<1x16x8xf32>
    %78 = vector.shape_cast %77 : vector<1x16x8xf32> to vector<16x8xf32>
    %79 = vector.shape_cast %75 : vector<16x8xf32> to vector<1x16x8xf32>
    tpu.vector_store %arg22[%c2_31, %76, %c0_32], %79 {strides = array<i32>} : memref<4x16x8xf32, #tpu.memory_space<vmem>>, vector<1x16x8xf32>,
    %80 = vector.extract_strided_slice %34 {offsets = [0, 24], sizes = [16, 8], strides = [1, 1]} : vector<16x96xf32> to vector<16x8xf32>
    %c3 = arith.constant 3 : index
    %81 = arith.index_cast %6 : i32 to index
    %c0_33 = arith.constant 0 : index
    %82 = vector.load %arg20[%c3, %81, %c0_33] : memref<4x16x8xf32, #tpu.memory_space<vmem>>, vector<1x16x8xf32>
    %83 = vector.shape_cast %82 : vector<1x16x8xf32> to vector<16x8xf32>
    %84 = vector.shape_cast %80 : vector<16x8xf32> to vector<1x16x8xf32>
    tpu.vector_store %arg20[%c3, %81, %c0_33], %84 {strides = array<i32>} : memref<4x16x8xf32, #tpu.memory_space<vmem>>, vector<1x16x8xf32>,
    %85 = vector.extract_strided_slice %34 {offsets = [0, 56], sizes = [16, 8], strides = [1, 1]} : vector<16x96xf32> to vector<16x8xf32>
    %c3_34 = arith.constant 3 : index
    %86 = arith.index_cast %6 : i32 to index
    %c0_35 = arith.constant 0 : index
    %87 = vector.load %arg21[%c3_34, %86, %c0_35] : memref<4x16x8xf32, #tpu.memory_space<vmem>>, vector<1x16x8xf32>
    %88 = vector.shape_cast %87 : vector<1x16x8xf32> to vector<16x8xf32>
    %89 = vector.shape_cast %85 : vector<16x8xf32> to vector<1x16x8xf32>
    tpu.vector_store %arg21[%c3_34, %86, %c0_35], %89 {strides = array<i32>} : memref<4x16x8xf32, #tpu.memory_space<vmem>>, vector<1x16x8xf32>,
    %90 = vector.extract_strided_slice %34 {offsets = [0, 88], sizes = [16, 8], strides = [1, 1]} : vector<16x96xf32> to vector<16x8xf32>
    %c3_36 = arith.constant 3 : index
    %91 = arith.index_cast %6 : i32 to index
    %c0_37 = arith.constant 0 : index
    %92 = vector.load %arg22[%c3_36, %91, %c0_37] : memref<4x16x8xf32, #tpu.memory_space<vmem>>, vector<1x16x8xf32>
    %93 = vector.shape_cast %92 : vector<1x16x8xf32> to vector<16x8xf32>
    %94 = vector.shape_cast %90 : vector<16x8xf32> to vector<1x16x8xf32>
    tpu.vector_store %arg22[%c3_36, %91, %c0_37], %94 {strides = array<i32>} : memref<4x16x8xf32, #tpu.memory_space<vmem>>, vector<1x16x8xf32>,
    %c1_i32_38 = arith.constant 1 : i32
    %c0_i32_39 = arith.constant 0 : i32
    %c1_i32_40 = arith.constant 1 : i32
    %95 = arith.muli %c0_i32_39, %c1_i32_40 : i32
    %c0_i32_41 = arith.constant 0 : i32
    %96 = arith.addi %c0_i32_41, %95 : i32
    %c16_i32_42 = arith.constant 16 : i32
    %97 = arith.muli %96, %c16_i32_42 : i32
    %98 = tpu.assume_multiple %97, 16 : i32
    %c0_43 = arith.constant 0 : index
    %99 = arith.index_cast %98 : i32 to index
    %c0_44 = arith.constant 0 : index
    %100 = vector.load %arg20[%c0_43, %99, %c0_44] : memref<4x16x8xf32, #tpu.memory_space<vmem>>, vector<4x16x8xf32>
    %cst_45 = arith.constant 0xFF800000 : f32
    %101 = vector.broadcast %cst_45 : f32 to vector<4x16x1xf32>
    %cst_46 = arith.constant 0.000000e+00 : f32
    %102 = vector.broadcast %cst_46 : f32 to vector<4x16x1xf32>
    %cst_47 = arith.constant 0.000000e+00 : f32
    %103 = vector.broadcast %cst_47 : f32 to vector<4x16x8xf32>
    %c0_i32_48 = arith.constant 0 : i32
    %c16_i32_49 = arith.constant 16 : i32
    %104 = arith.muli %c0_i32_48, %c16_i32_49 : i32
    %105 = tpu.assume_multiple %104, 16 : i32
    %c0_50 = arith.constant 0 : index
    %106 = arith.index_cast %105 : i32 to index
    %c0_51 = arith.constant 0 : index
    %107 = vector.load %arg21[%c0_50, %106, %c0_51] : memref<4x16x8xf32, #tpu.memory_space<vmem>>, vector<4x16x8xf32>
    %c0_52 = arith.constant 0 : index
    %108 = arith.index_cast %105 : i32 to index
    %c0_53 = arith.constant 0 : index
    %109 = vector.load %arg22[%c0_52, %108, %c0_53] : memref<4x16x8xf32, #tpu.memory_space<vmem>>, vector<4x16x8xf32>
    "tpu.trace_start"() <{level = 10 : i32, message = "hqd,hkd->hqk"}> : () -> ()
    %cst_54 = arith.constant dense<0.000000e+00> : vector<4x16x16xf32>
    %110 = tpu.matmul %100, %107, %cst_54 {dimension_numbers = #tpu.dot_dimension_numbers<[2], [2], [1], [1], [0, 0, 0, 1, 1, 1], [0], [0]>} : vector<4x16x8xf32>, vector<4x16x8xf32>, vector<4x16x16xf32> -> vector<4x16x16xf32>
    "tpu.trace_stop"() : () -> ()
    %cst_55 = arith.constant dense<0xFF800000> : vector<4x16xf32>
    %111 = vector.multi_reduction <maximumf>, %110, %cst_55 [2] : vector<4x16x16xf32> to vector<4x16xf32>
    %112 = vector.shape_cast %111 : vector<4x16xf32> to vector<4x16x1xf32>
    %113 = arith.maximumf %101, %112 : vector<4x16x1xf32>
    %114 = arith.subf %101, %113 : vector<4x16x1xf32>
    %115 = math.exp %114 : vector<4x16x1xf32>
    %116 = vector.broadcast %113 : vector<4x16x1xf32> to vector<4x16x16xf32>
    %117 = arith.subf %110, %116 : vector<4x16x16xf32>
    %118 = math.exp %117 : vector<4x16x16xf32>
    %119 = arith.mulf %115, %102 : vector<4x16x1xf32>
    %cst_56 = arith.constant dense<0.000000e+00> : vector<4x16xf32>
    %120 = vector.multi_reduction <add>, %118, %cst_56 [2] : vector<4x16x16xf32> to vector<4x16xf32>
    %121 = vector.shape_cast %120 : vector<4x16xf32> to vector<4x16x1xf32>
    %122 = arith.addf %119, %121 : vector<4x16x1xf32>
    %123 = vector.broadcast %115 : vector<4x16x1xf32> to vector<4x16x8xf32>
    %124 = arith.mulf %123, %103 : vector<4x16x8xf32>
    "tpu.trace_start"() <{level = 10 : i32, message = "hqk,hkd->hqd"}> : () -> ()
    %cst_57 = arith.constant dense<0.000000e+00> : vector<4x16x8xf32>
    %125 = tpu.matmul %118, %109, %cst_57 {dimension_numbers = #tpu.dot_dimension_numbers<[2], [1], [1], [2], [0, 0, 0, 1, 1, 2], [0], [0]>} : vector<4x16x16xf32>, vector<4x16x8xf32>, vector<4x16x8xf32> -> vector<4x16x8xf32>
    "tpu.trace_stop"() : () -> ()
    %126 = arith.addf %124, %125 : vector<4x16x8xf32>
    %c1_i32_58 = arith.constant 1 : i32
    %127 = tpu.reciprocal %122 {approx = true} : vector<4x16x1xf32> -> vector<4x16x1xf32>
    %128 = arith.mulf %122, %127 : vector<4x16x1xf32>
    %cst_59 = arith.constant 2.000000e+00 : f32
    %129 = vector.broadcast %cst_59 : f32 to vector<4x16x1xf32>
    %130 = arith.subf %129, %128 : vector<4x16x1xf32>
    %131 = arith.mulf %127, %130 : vector<4x16x1xf32>
    %132 = vector.broadcast %131 : vector<4x16x1xf32> to vector<4x16x8xf32>
    %133 = arith.mulf %126, %132 : vector<4x16x8xf32>
    %134 = vector.extract_strided_slice %133 {offsets = [0, 0, 0], sizes = [1, 16, 8], strides = [1, 1, 1]} : vector<4x16x8xf32> to vector<1x16x8xf32>
    %135 = vector.shape_cast %134 : vector<1x16x8xf32> to vector<16x8xf32>
    %136 = vector.extract_strided_slice %133 {offsets = [1, 0, 0], sizes = [1, 16, 8], strides = [1, 1, 1]} : vector<4x16x8xf32> to vector<1x16x8xf32>
    %137 = vector.shape_cast %136 : vector<1x16x8xf32> to vector<16x8xf32>
    %138 = vector.extract_strided_slice %133 {offsets = [2, 0, 0], sizes = [1, 16, 8], strides = [1, 1, 1]} : vector<4x16x8xf32> to vector<1x16x8xf32>
    %139 = vector.shape_cast %138 : vector<1x16x8xf32> to vector<16x8xf32>
    %140 = vector.extract_strided_slice %133 {offsets = [3, 0, 0], sizes = [1, 16, 8], strides = [1, 1, 1]} : vector<4x16x8xf32> to vector<1x16x8xf32>
    %141 = vector.shape_cast %140 : vector<1x16x8xf32> to vector<16x8xf32>
    %142 = tpu.concatenate %135, %137, %139, %141 in 1 : vector<16x8xf32>, vector<16x8xf32>, vector<16x8xf32>, vector<16x8xf32> -> vector<16x32xf32>
    %c0_60 = arith.constant 0 : index
    %c0_61 = arith.constant 0 : index
    %143 = vector.load %arg5[%c0_60, %c0_61] : memref<32x32xf32, #tpu.memory_space<vmem>>, vector<32x32xf32>
    %cst_62 = arith.constant dense<0.000000e+00> : vector<16x32xf32>
    %144 = tpu.matmul %142, %143, %cst_62 {dimension_numbers = #tpu.dot_dimension_numbers<[1], [0], [0], [1], [0, 0, 1, 1], [], []>} : vector<16x32xf32>, vector<32x32xf32>, vector<16x32xf32> -> vector<16x32xf32>
    %c0_63 = arith.constant 0 : index
    %c0_64 = arith.constant 0 : index
    %145 = vector.load %arg6[%c0_63, %c0_64] : memref<1x32xf32, #tpu.memory_space<vmem>>, vector<1x32xf32>
    %146 = vector.broadcast %145 : vector<1x32xf32> to vector<16x32xf32>
    %147 = arith.addf %144, %146 : vector<16x32xf32>
    %148 = arith.index_cast %98 : i32 to index
    %c0_65 = arith.constant 0 : index
    %149 = vector.load %arg19[%148, %c0_65] : memref<16x32xf32, #tpu.memory_space<vmem>>, vector<16x32xf32>
    %150 = arith.addf %149, %147 : vector<16x32xf32>
    %151 = arith.index_cast %98 : i32 to index
    %c0_66 = arith.constant 0 : index
    %152 = vector.load %arg19[%151, %c0_66] : memref<16x32xf32, #tpu.memory_space<vmem>>, vector<16x32xf32>
    tpu.vector_store %arg19[%151, %c0_66], %150 {strides = array<i32>} : memref<16x32xf32, #tpu.memory_space<vmem>>, vector<16x32xf32>,
    %c1_i32_67 = arith.constant 1 : i32
    %c0_i32_68 = arith.constant 0 : i32
    %c1_i32_69 = arith.constant 1 : i32
    %153 = arith.muli %c0_i32_68, %c1_i32_69 : i32
    %c0_i32_70 = arith.constant 0 : i32
    %154 = arith.addi %c0_i32_70, %153 : i32
    %c16_i32_71 = arith.constant 16 : i32
    %155 = arith.muli %154, %c16_i32_71 : i32
    %156 = tpu.assume_multiple %155, 16 : i32
    %157 = arith.index_cast %156 : i32 to index
    %c0_72 = arith.constant 0 : index
    %158 = vector.load %arg19[%157, %c0_72] : memref<16x32xf32, #tpu.memory_space<vmem>>, vector<16x32xf32>
    %c0_73 = arith.constant 0 : index
    %c0_74 = arith.constant 0 : index
    %159 = vector.load %arg7[%c0_73, %c0_74] : memref<1x32xf32, #tpu.memory_space<vmem>>, vector<1x32xf32>
    %c0_75 = arith.constant 0 : index
    %c0_76 = arith.constant 0 : index
    %160 = vector.load %arg8[%c0_75, %c0_76] : memref<1x32xf32, #tpu.memory_space<vmem>>, vector<1x32xf32>
    %cst_77 = arith.constant dense<0.000000e+00> : vector<16xf32>
    %161 = vector.multi_reduction <add>, %158, %cst_77 [1] : vector<16x32xf32> to vector<16xf32>
    %162 = vector.shape_cast %161 : vector<16xf32> to vector<16x1xf32>
    %cst_78 = arith.constant 3.200000e+01 : f32
    %163 = vector.broadcast %cst_78 : f32 to vector<16x1xf32>
    %164 = arith.divf %162, %163 : vector<16x1xf32>
    %165 = vector.broadcast %164 : vector<16x1xf32> to vector<16x32xf32>
    %166 = arith.subf %158, %165 : vector<16x32xf32>
    %167 = arith.mulf %166, %166 : vector<16x32xf32>
    %cst_79 = arith.constant dense<0.000000e+00> : vector<16xf32>
    %168 = vector.multi_reduction <add>, %167, %cst_79 [1] : vector<16x32xf32> to vector<16xf32>
    %169 = vector.shape_cast %168 : vector<16xf32> to vector<16x1xf32>
    %cst_80 = arith.constant 3.200000e+01 : f32
    %170 = vector.broadcast %cst_80 : f32 to vector<16x1xf32>
    %171 = arith.divf %169, %170 : vector<16x1xf32>
    %172 = vector.broadcast %164 : vector<16x1xf32> to vector<16x32xf32>
    %173 = arith.subf %158, %172 : vector<16x32xf32>
    %cst_81 = arith.constant 9.99999974E-6 : f32
    %174 = vector.broadcast %cst_81 : f32 to vector<16x1xf32>
    %175 = arith.addf %171, %174 : vector<16x1xf32>
    %176 = math.rsqrt %175 : vector<16x1xf32>
    %177 = vector.broadcast %176 : vector<16x1xf32> to vector<16x32xf32>
    %178 = arith.mulf %173, %177 : vector<16x32xf32>
    %179 = vector.broadcast %159 : vector<1x32xf32> to vector<16x32xf32>
    %180 = arith.mulf %178, %179 : vector<16x32xf32>
    %181 = vector.broadcast %160 : vector<1x32xf32> to vector<16x32xf32>
    %182 = arith.addf %180, %181 : vector<16x32xf32>
    %c0_82 = arith.constant 0 : index
    %c0_83 = arith.constant 0 : index
    %183 = vector.load %arg9[%c0_82, %c0_83] : memref<32x96xf32, #tpu.memory_space<vmem>>, vector<32x96xf32>
    %cst_84 = arith.constant dense<0.000000e+00> : vector<16x96xf32>
    %184 = tpu.matmul %182, %183, %cst_84 {dimension_numbers = #tpu.dot_dimension_numbers<[1], [0], [0], [1], [0, 0, 1, 1], [], []>} : vector<16x32xf32>, vector<32x96xf32>, vector<16x96xf32> -> vector<16x96xf32>
    %185 = vector.extract_strided_slice %184 {offsets = [0, 0], sizes = [16, 8], strides = [1, 1]} : vector<16x96xf32> to vector<16x8xf32>
    %c0_85 = arith.constant 0 : index
    %186 = arith.index_cast %156 : i32 to index
    %c0_86 = arith.constant 0 : index
    %187 = vector.load %arg20[%c0_85, %186, %c0_86] : memref<4x16x8xf32, #tpu.memory_space<vmem>>, vector<1x16x8xf32>
    %188 = vector.shape_cast %187 : vector<1x16x8xf32> to vector<16x8xf32>
    %189 = vector.shape_cast %185 : vector<16x8xf32> to vector<1x16x8xf32>
    tpu.vector_store %arg20[%c0_85, %186, %c0_86], %189 {strides = array<i32>} : memref<4x16x8xf32, #tpu.memory_space<vmem>>, vector<1x16x8xf32>,
    %190 = vector.extract_strided_slice %184 {offsets = [0, 32], sizes = [16, 8], strides = [1, 1]} : vector<16x96xf32> to vector<16x8xf32>
    %c0_87 = arith.constant 0 : index
    %191 = arith.index_cast %156 : i32 to index
    %c0_88 = arith.constant 0 : index
    %192 = vector.load %arg21[%c0_87, %191, %c0_88] : memref<4x16x8xf32, #tpu.memory_space<vmem>>, vector<1x16x8xf32>
    %193 = vector.shape_cast %192 : vector<1x16x8xf32> to vector<16x8xf32>
    %194 = vector.shape_cast %190 : vector<16x8xf32> to vector<1x16x8xf32>
    tpu.vector_store %arg21[%c0_87, %191, %c0_88], %194 {strides = array<i32>} : memref<4x16x8xf32, #tpu.memory_space<vmem>>, vector<1x16x8xf32>,
    %195 = vector.extract_strided_slice %184 {offsets = [0, 64], sizes = [16, 8], strides = [1, 1]} : vector<16x96xf32> to vector<16x8xf32>
    %c0_89 = arith.constant 0 : index
    %196 = arith.index_cast %156 : i32 to index
    %c0_90 = arith.constant 0 : index
    %197 = vector.load %arg22[%c0_89, %196, %c0_90] : memref<4x16x8xf32, #tpu.memory_space<vmem>>, vector<1x16x8xf32>
    %198 = vector.shape_cast %197 : vector<1x16x8xf32> to vector<16x8xf32>
    %199 = vector.shape_cast %195 : vector<16x8xf32> to vector<1x16x8xf32>
    tpu.vector_store %arg22[%c0_89, %196, %c0_90], %199 {strides = array<i32>} : memref<4x16x8xf32, #tpu.memory_space<vmem>>, vector<1x16x8xf32>,
    %200 = vector.extract_strided_slice %184 {offsets = [0, 8], sizes = [16, 8], strides = [1, 1]} : vector<16x96xf32> to vector<16x8xf32>
    %c1_91 = arith.constant 1 : index
    %201 = arith.index_cast %156 : i32 to index
    %c0_92 = arith.constant 0 : index
    %202 = vector.load %arg20[%c1_91, %201, %c0_92] : memref<4x16x8xf32, #tpu.memory_space<vmem>>, vector<1x16x8xf32>
    %203 = vector.shape_cast %202 : vector<1x16x8xf32> to vector<16x8xf32>
    %204 = vector.shape_cast %200 : vector<16x8xf32> to vector<1x16x8xf32>
    tpu.vector_store %arg20[%c1_91, %201, %c0_92], %204 {strides = array<i32>} : memref<4x16x8xf32, #tpu.memory_space<vmem>>, vector<1x16x8xf32>,
    %205 = vector.extract_strided_slice %184 {offsets = [0, 40], sizes = [16, 8], strides = [1, 1]} : vector<16x96xf32> to vector<16x8xf32>
    %c1_93 = arith.constant 1 : index
    %206 = arith.index_cast %156 : i32 to index
    %c0_94 = arith.constant 0 : index
    %207 = vector.load %arg21[%c1_93, %206, %c0_94] : memref<4x16x8xf32, #tpu.memory_space<vmem>>, vector<1x16x8xf32>
    %208 = vector.shape_cast %207 : vector<1x16x8xf32> to vector<16x8xf32>
    %209 = vector.shape_cast %205 : vector<16x8xf32> to vector<1x16x8xf32>
    tpu.vector_store %arg21[%c1_93, %206, %c0_94], %209 {strides = array<i32>} : memref<4x16x8xf32, #tpu.memory_space<vmem>>, vector<1x16x8xf32>,
    %210 = vector.extract_strided_slice %184 {offsets = [0, 72], sizes = [16, 8], strides = [1, 1]} : vector<16x96xf32> to vector<16x8xf32>
    %c1_95 = arith.constant 1 : index
    %211 = arith.index_cast %156 : i32 to index
    %c0_96 = arith.constant 0 : index
    %212 = vector.load %arg22[%c1_95, %211, %c0_96] : memref<4x16x8xf32, #tpu.memory_space<vmem>>, vector<1x16x8xf32>
    %213 = vector.shape_cast %212 : vector<1x16x8xf32> to vector<16x8xf32>
    %214 = vector.shape_cast %210 : vector<16x8xf32> to vector<1x16x8xf32>
    tpu.vector_store %arg22[%c1_95, %211, %c0_96], %214 {strides = array<i32>} : memref<4x16x8xf32, #tpu.memory_space<vmem>>, vector<1x16x8xf32>,
    %215 = vector.extract_strided_slice %184 {offsets = [0, 16], sizes = [16, 8], strides = [1, 1]} : vector<16x96xf32> to vector<16x8xf32>
    %c2_97 = arith.constant 2 : index
    %216 = arith.index_cast %156 : i32 to index
    %c0_98 = arith.constant 0 : index
    %217 = vector.load %arg20[%c2_97, %216, %c0_98] : memref<4x16x8xf32, #tpu.memory_space<vmem>>, vector<1x16x8xf32>
    %218 = vector.shape_cast %217 : vector<1x16x8xf32> to vector<16x8xf32>
    %219 = vector.shape_cast %215 : vector<16x8xf32> to vector<1x16x8xf32>
    tpu.vector_store %arg20[%c2_97, %216, %c0_98], %219 {strides = array<i32>} : memref<4x16x8xf32, #tpu.memory_space<vmem>>, vector<1x16x8xf32>,
    %220 = vector.extract_strided_slice %184 {offsets = [0, 48], sizes = [16, 8], strides = [1, 1]} : vector<16x96xf32> to vector<16x8xf32>
    %c2_99 = arith.constant 2 : index
    %221 = arith.index_cast %156 : i32 to index
    %c0_100 = arith.constant 0 : index
    %222 = vector.load %arg21[%c2_99, %221, %c0_100] : memref<4x16x8xf32, #tpu.memory_space<vmem>>, vector<1x16x8xf32>
    %223 = vector.shape_cast %222 : vector<1x16x8xf32> to vector<16x8xf32>
    %224 = vector.shape_cast %220 : vector<16x8xf32> to vector<1x16x8xf32>
    tpu.vector_store %arg21[%c2_99, %221, %c0_100], %224 {strides = array<i32>} : memref<4x16x8xf32, #tpu.memory_space<vmem>>, vector<1x16x8xf32>,
    %225 = vector.extract_strided_slice %184 {offsets = [0, 80], sizes = [16, 8], strides = [1, 1]} : vector<16x96xf32> to vector<16x8xf32>
    %c2_101 = arith.constant 2 : index
    %226 = arith.index_cast %156 : i32 to index
    %c0_102 = arith.constant 0 : index
    %227 = vector.load %arg22[%c2_101, %226, %c0_102] : memref<4x16x8xf32, #tpu.memory_space<vmem>>, vector<1x16x8xf32>
    %228 = vector.shape_cast %227 : vector<1x16x8xf32> to vector<16x8xf32>
    %229 = vector.shape_cast %225 : vector<16x8xf32> to vector<1x16x8xf32>
    tpu.vector_store %arg22[%c2_101, %226, %c0_102], %229 {strides = array<i32>} : memref<4x16x8xf32, #tpu.memory_space<vmem>>, vector<1x16x8xf32>,
    %230 = vector.extract_strided_slice %184 {offsets = [0, 24], sizes = [16, 8], strides = [1, 1]} : vector<16x96xf32> to vector<16x8xf32>
    %c3_103 = arith.constant 3 : index
    %231 = arith.index_cast %156 : i32 to index
    %c0_104 = arith.constant 0 : index
    %232 = vector.load %arg20[%c3_103, %231, %c0_104] : memref<4x16x8xf32, #tpu.memory_space<vmem>>, vector<1x16x8xf32>
    %233 = vector.shape_cast %232 : vector<1x16x8xf32> to vector<16x8xf32>
    %234 = vector.shape_cast %230 : vector<16x8xf32> to vector<1x16x8xf32>
    tpu.vector_store %arg20[%c3_103, %231, %c0_104], %234 {strides = array<i32>} : memref<4x16x8xf32, #tpu.memory_space<vmem>>, vector<1x16x8xf32>,
    %235 = vector.extract_strided_slice %184 {offsets = [0, 56], sizes = [16, 8], strides = [1, 1]} : vector<16x96xf32> to vector<16x8xf32>
    %c3_105 = arith.constant 3 : index
    %236 = arith.index_cast %156 : i32 to index
    %c0_106 = arith.constant 0 : index
    %237 = vector.load %arg21[%c3_105, %236, %c0_106] : memref<4x16x8xf32, #tpu.memory_space<vmem>>, vector<1x16x8xf32>
    %238 = vector.shape_cast %237 : vector<1x16x8xf32> to vector<16x8xf32>
    %239 = vector.shape_cast %235 : vector<16x8xf32> to vector<1x16x8xf32>
    tpu.vector_store %arg21[%c3_105, %236, %c0_106], %239 {strides = array<i32>} : memref<4x16x8xf32, #tpu.memory_space<vmem>>, vector<1x16x8xf32>,
    %240 = vector.extract_strided_slice %184 {offsets = [0, 88], sizes = [16, 8], strides = [1, 1]} : vector<16x96xf32> to vector<16x8xf32>
    %c3_107 = arith.constant 3 : index
    %241 = arith.index_cast %156 : i32 to index
    %c0_108 = arith.constant 0 : index
    %242 = vector.load %arg22[%c3_107, %241, %c0_108] : memref<4x16x8xf32, #tpu.memory_space<vmem>>, vector<1x16x8xf32>
    %243 = vector.shape_cast %242 : vector<1x16x8xf32> to vector<16x8xf32>
    %244 = vector.shape_cast %240 : vector<16x8xf32> to vector<1x16x8xf32>
    tpu.vector_store %arg22[%c3_107, %241, %c0_108], %244 {strides = array<i32>} : memref<4x16x8xf32, #tpu.memory_space<vmem>>, vector<1x16x8xf32>,
    %c1_i32_109 = arith.constant 1 : i32
    %c0_i32_110 = arith.constant 0 : i32
    %c1_i32_111 = arith.constant 1 : i32
    %245 = arith.muli %c0_i32_110, %c1_i32_111 : i32
    %c0_i32_112 = arith.constant 0 : i32
    %246 = arith.addi %c0_i32_112, %245 : i32
    %c16_i32_113 = arith.constant 16 : i32
    %247 = arith.muli %246, %c16_i32_113 : i32
    %248 = tpu.assume_multiple %247, 16 : i32
    %c0_114 = arith.constant 0 : index
    %249 = arith.index_cast %248 : i32 to index
    %c0_115 = arith.constant 0 : index
    %250 = vector.load %arg20[%c0_114, %249, %c0_115] : memref<4x16x8xf32, #tpu.memory_space<vmem>>, vector<4x16x8xf32>
    %cst_116 = arith.constant 0xFF800000 : f32
    %251 = vector.broadcast %cst_116 : f32 to vector<4x16x1xf32>
    %cst_117 = arith.constant 0.000000e+00 : f32
    %252 = vector.broadcast %cst_117 : f32 to vector<4x16x1xf32>
    %cst_118 = arith.constant 0.000000e+00 : f32
    %253 = vector.broadcast %cst_118 : f32 to vector<4x16x8xf32>
    %c0_i32_119 = arith.constant 0 : i32
    %c16_i32_120 = arith.constant 16 : i32
    %254 = arith.muli %c0_i32_119, %c16_i32_120 : i32
    %255 = tpu.assume_multiple %254, 16 : i32
    %c0_121 = arith.constant 0 : index
    %256 = arith.index_cast %255 : i32 to index
    %c0_122 = arith.constant 0 : index
    %257 = vector.load %arg21[%c0_121, %256, %c0_122] : memref<4x16x8xf32, #tpu.memory_space<vmem>>, vector<4x16x8xf32>
    %c0_123 = arith.constant 0 : index
    %258 = arith.index_cast %255 : i32 to index
    %c0_124 = arith.constant 0 : index
    %259 = vector.load %arg22[%c0_123, %258, %c0_124] : memref<4x16x8xf32, #tpu.memory_space<vmem>>, vector<4x16x8xf32>
    "tpu.trace_start"() <{level = 10 : i32, message = "hqd,hkd->hqk"}> : () -> ()
    %cst_125 = arith.constant dense<0.000000e+00> : vector<4x16x16xf32>
    %260 = tpu.matmul %250, %257, %cst_125 {dimension_numbers = #tpu.dot_dimension_numbers<[2], [2], [1], [1], [0, 0, 0, 1, 1, 1], [0], [0]>} : vector<4x16x8xf32>, vector<4x16x8xf32>, vector<4x16x16xf32> -> vector<4x16x16xf32>
    "tpu.trace_stop"() : () -> ()
    %cst_126 = arith.constant dense<0xFF800000> : vector<4x16xf32>
    %261 = vector.multi_reduction <maximumf>, %260, %cst_126 [2] : vector<4x16x16xf32> to vector<4x16xf32>
    %262 = vector.shape_cast %261 : vector<4x16xf32> to vector<4x16x1xf32>
    %263 = arith.maximumf %251, %262 : vector<4x16x1xf32>
    %264 = arith.subf %251, %263 : vector<4x16x1xf32>
    %265 = math.exp %264 : vector<4x16x1xf32>
    %266 = vector.broadcast %263 : vector<4x16x1xf32> to vector<4x16x16xf32>
    %267 = arith.subf %260, %266 : vector<4x16x16xf32>
    %268 = math.exp %267 : vector<4x16x16xf32>
    %269 = arith.mulf %265, %252 : vector<4x16x1xf32>
    %cst_127 = arith.constant dense<0.000000e+00> : vector<4x16xf32>
    %270 = vector.multi_reduction <add>, %268, %cst_127 [2] : vector<4x16x16xf32> to vector<4x16xf32>
    %271 = vector.shape_cast %270 : vector<4x16xf32> to vector<4x16x1xf32>
    %272 = arith.addf %269, %271 : vector<4x16x1xf32>
    %273 = vector.broadcast %265 : vector<4x16x1xf32> to vector<4x16x8xf32>
    %274 = arith.mulf %273, %253 : vector<4x16x8xf32>
    "tpu.trace_start"() <{level = 10 : i32, message = "hqk,hkd->hqd"}> : () -> ()
    %cst_128 = arith.constant dense<0.000000e+00> : vector<4x16x8xf32>
    %275 = tpu.matmul %268, %259, %cst_128 {dimension_numbers = #tpu.dot_dimension_numbers<[2], [1], [1], [2], [0, 0, 0, 1, 1, 2], [0], [0]>} : vector<4x16x16xf32>, vector<4x16x8xf32>, vector<4x16x8xf32> -> vector<4x16x8xf32>
    "tpu.trace_stop"() : () -> ()
    %276 = arith.addf %274, %275 : vector<4x16x8xf32>
    %c1_i32_129 = arith.constant 1 : i32
    %277 = tpu.reciprocal %272 {approx = true} : vector<4x16x1xf32> -> vector<4x16x1xf32>
    %278 = arith.mulf %272, %277 : vector<4x16x1xf32>
    %cst_130 = arith.constant 2.000000e+00 : f32
    %279 = vector.broadcast %cst_130 : f32 to vector<4x16x1xf32>
    %280 = arith.subf %279, %278 : vector<4x16x1xf32>
    %281 = arith.mulf %277, %280 : vector<4x16x1xf32>
    %282 = vector.broadcast %281 : vector<4x16x1xf32> to vector<4x16x8xf32>
    %283 = arith.mulf %276, %282 : vector<4x16x8xf32>
    %284 = vector.extract_strided_slice %283 {offsets = [0, 0, 0], sizes = [1, 16, 8], strides = [1, 1, 1]} : vector<4x16x8xf32> to vector<1x16x8xf32>
    %285 = vector.shape_cast %284 : vector<1x16x8xf32> to vector<16x8xf32>
    %286 = vector.extract_strided_slice %283 {offsets = [1, 0, 0], sizes = [1, 16, 8], strides = [1, 1, 1]} : vector<4x16x8xf32> to vector<1x16x8xf32>
    %287 = vector.shape_cast %286 : vector<1x16x8xf32> to vector<16x8xf32>
    %288 = vector.extract_strided_slice %283 {offsets = [2, 0, 0], sizes = [1, 16, 8], strides = [1, 1, 1]} : vector<4x16x8xf32> to vector<1x16x8xf32>
    %289 = vector.shape_cast %288 : vector<1x16x8xf32> to vector<16x8xf32>
    %290 = vector.extract_strided_slice %283 {offsets = [3, 0, 0], sizes = [1, 16, 8], strides = [1, 1, 1]} : vector<4x16x8xf32> to vector<1x16x8xf32>
    %291 = vector.shape_cast %290 : vector<1x16x8xf32> to vector<16x8xf32>
    %292 = tpu.concatenate %285, %287, %289, %291 in 1 : vector<16x8xf32>, vector<16x8xf32>, vector<16x8xf32>, vector<16x8xf32> -> vector<16x32xf32>
    %c0_131 = arith.constant 0 : index
    %c0_132 = arith.constant 0 : index
    %293 = vector.load %arg10[%c0_131, %c0_132] : memref<32x32xf32, #tpu.memory_space<vmem>>, vector<32x32xf32>
    %cst_133 = arith.constant dense<0.000000e+00> : vector<16x32xf32>
    %294 = tpu.matmul %292, %293, %cst_133 {dimension_numbers = #tpu.dot_dimension_numbers<[1], [0], [0], [1], [0, 0, 1, 1], [], []>} : vector<16x32xf32>, vector<32x32xf32>, vector<16x32xf32> -> vector<16x32xf32>
    %c0_134 = arith.constant 0 : index
    %c0_135 = arith.constant 0 : index
    %295 = vector.load %arg11[%c0_134, %c0_135] : memref<1x32xf32, #tpu.memory_space<vmem>>, vector<1x32xf32>
    %296 = vector.broadcast %295 : vector<1x32xf32> to vector<16x32xf32>
    %297 = arith.addf %294, %296 : vector<16x32xf32>
    %298 = arith.index_cast %248 : i32 to index
    %c0_136 = arith.constant 0 : index
    %299 = vector.load %arg19[%298, %c0_136] : memref<16x32xf32, #tpu.memory_space<vmem>>, vector<16x32xf32>
    %300 = arith.addf %299, %297 : vector<16x32xf32>
    %301 = arith.index_cast %248 : i32 to index
    %c0_137 = arith.constant 0 : index
    %302 = vector.load %arg19[%301, %c0_137] : memref<16x32xf32, #tpu.memory_space<vmem>>, vector<16x32xf32>
    tpu.vector_store %arg19[%301, %c0_137], %300 {strides = array<i32>} : memref<16x32xf32, #tpu.memory_space<vmem>>, vector<16x32xf32>,
    %c1_i32_138 = arith.constant 1 : i32
    %c0_i32_139 = arith.constant 0 : i32
    %c1_i32_140 = arith.constant 1 : i32
    %303 = arith.muli %c0_i32_139, %c1_i32_140 : i32
    %c0_i32_141 = arith.constant 0 : i32
    %304 = arith.addi %c0_i32_141, %303 : i32
    %c16_i32_142 = arith.constant 16 : i32
    %305 = arith.muli %304, %c16_i32_142 : i32
    %306 = tpu.assume_multiple %305, 16 : i32
    %307 = arith.index_cast %306 : i32 to index
    %c0_143 = arith.constant 0 : index
    %308 = vector.load %arg19[%307, %c0_143] : memref<16x32xf32, #tpu.memory_space<vmem>>, vector<16x32xf32>
    %c0_144 = arith.constant 0 : index
    %c0_145 = arith.constant 0 : index
    %309 = vector.load %arg12[%c0_144, %c0_145] : memref<1x32xf32, #tpu.memory_space<vmem>>, vector<1x32xf32>
    %c0_146 = arith.constant 0 : index
    %c0_147 = arith.constant 0 : index
    %310 = vector.load %arg13[%c0_146, %c0_147] : memref<1x32xf32, #tpu.memory_space<vmem>>, vector<1x32xf32>
    %cst_148 = arith.constant dense<0.000000e+00> : vector<16xf32>
    %311 = vector.multi_reduction <add>, %308, %cst_148 [1] : vector<16x32xf32> to vector<16xf32>
    %312 = vector.shape_cast %311 : vector<16xf32> to vector<16x1xf32>
    %cst_149 = arith.constant 3.200000e+01 : f32
    %313 = vector.broadcast %cst_149 : f32 to vector<16x1xf32>
    %314 = arith.divf %312, %313 : vector<16x1xf32>
    %315 = vector.broadcast %314 : vector<16x1xf32> to vector<16x32xf32>
    %316 = arith.subf %308, %315 : vector<16x32xf32>
    %317 = arith.mulf %316, %316 : vector<16x32xf32>
    %cst_150 = arith.constant dense<0.000000e+00> : vector<16xf32>
    %318 = vector.multi_reduction <add>, %317, %cst_150 [1] : vector<16x32xf32> to vector<16xf32>
    %319 = vector.shape_cast %318 : vector<16xf32> to vector<16x1xf32>
    %cst_151 = arith.constant 3.200000e+01 : f32
    %320 = vector.broadcast %cst_151 : f32 to vector<16x1xf32>
    %321 = arith.divf %319, %320 : vector<16x1xf32>
    %322 = vector.broadcast %314 : vector<16x1xf32> to vector<16x32xf32>
    %323 = arith.subf %308, %322 : vector<16x32xf32>
    %cst_152 = arith.constant 9.99999974E-6 : f32
    %324 = vector.broadcast %cst_152 : f32 to vector<16x1xf32>
    %325 = arith.addf %321, %324 : vector<16x1xf32>
    %326 = math.rsqrt %325 : vector<16x1xf32>
    %327 = vector.broadcast %326 : vector<16x1xf32> to vector<16x32xf32>
    %328 = arith.mulf %323, %327 : vector<16x32xf32>
    %329 = vector.broadcast %309 : vector<1x32xf32> to vector<16x32xf32>
    %330 = arith.mulf %328, %329 : vector<16x32xf32>
    %331 = vector.broadcast %310 : vector<1x32xf32> to vector<16x32xf32>
    %332 = arith.addf %330, %331 : vector<16x32xf32>
    %c0_153 = arith.constant 0 : index
    %c0_154 = arith.constant 0 : index
    %333 = vector.load %arg14[%c0_153, %c0_154] : memref<32x256xf32, #tpu.memory_space<vmem>>, vector<32x256xf32>
    %cst_155 = arith.constant dense<0.000000e+00> : vector<16x256xf32>
    %334 = tpu.matmul %332, %333, %cst_155 {dimension_numbers = #tpu.dot_dimension_numbers<[1], [0], [0], [1], [0, 0, 1, 1], [], []>} : vector<16x32xf32>, vector<32x256xf32>, vector<16x256xf32> -> vector<16x256xf32>
    %c0_156 = arith.constant 0 : index
    %c0_157 = arith.constant 0 : index
    %335 = vector.load %arg15[%c0_156, %c0_157] : memref<1x256xf32, #tpu.memory_space<vmem>>, vector<1x256xf32>
    %336 = vector.broadcast %335 : vector<1x256xf32> to vector<16x256xf32>
    %337 = arith.addf %334, %336 : vector<16x256xf32>
    %338 = vector.extract_strided_slice %337 {offsets = [0, 0], sizes = [16, 128], strides = [1, 1]} : vector<16x256xf32> to vector<16x128xf32>
    %339 = vector.extract_strided_slice %337 {offsets = [0, 128], sizes = [16, 128], strides = [1, 1]} : vector<16x256xf32> to vector<16x128xf32>
    %cst_158 = arith.constant 5.000000e-01 : f32
    %340 = vector.broadcast %cst_158 : f32 to vector<16x128xf32>
    %341 = arith.mulf %339, %340 : vector<16x128xf32>
    %cst_159 = arith.constant 0.707106769 : f32
    %342 = vector.broadcast %cst_159 : f32 to vector<16x128xf32>
    %343 = arith.mulf %339, %342 : vector<16x128xf32>
    %344 = math.erf %343 : vector<16x128xf32>
    %cst_160 = arith.constant 1.000000e+00 : f32
    %345 = vector.broadcast %cst_160 : f32 to vector<16x128xf32>
    %346 = arith.addf %345, %344 : vector<16x128xf32>
    %347 = arith.mulf %341, %346 : vector<16x128xf32>
    %348 = arith.mulf %338, %347 : vector<16x128xf32>
    %c0_161 = arith.constant 0 : index
    %c0_162 = arith.constant 0 : index
    %349 = vector.load %arg16[%c0_161, %c0_162] : memref<128x32xf32, #tpu.memory_space<vmem>>, vector<128x32xf32>
    %cst_163 = arith.constant dense<0.000000e+00> : vector<16x32xf32>
    %350 = tpu.matmul %348, %349, %cst_163 {dimension_numbers = #tpu.dot_dimension_numbers<[1], [0], [0], [1], [0, 0, 1, 1], [], []>} : vector<16x128xf32>, vector<128x32xf32>, vector<16x32xf32> -> vector<16x32xf32>
    %c0_164 = arith.constant 0 : index
    %c0_165 = arith.constant 0 : index
    %351 = vector.load %arg17[%c0_164, %c0_165] : memref<1x32xf32, #tpu.memory_space<vmem>>, vector<1x32xf32>
    %352 = vector.broadcast %351 : vector<1x32xf32> to vector<16x32xf32>
    %353 = arith.addf %350, %352 : vector<16x32xf32>
    %354 = arith.addf %308, %353 : vector<16x32xf32>
    %355 = arith.index_cast %306 : i32 to index
    %c0_166 = arith.constant 0 : index
    %356 = vector.load %arg19[%355, %c0_166] : memref<16x32xf32, #tpu.memory_space<vmem>>, vector<16x32xf32>
    tpu.vector_store %arg19[%355, %c0_166], %354 {strides = array<i32>} : memref<16x32xf32, #tpu.memory_space<vmem>>, vector<16x32xf32>,
    %c1_i32_167 = arith.constant 1 : i32
    %c0_168 = arith.constant 0 : index
    %c0_169 = arith.constant 0 : index
    %357 = vector.load %arg19[%c0_168, %c0_169] : memref<16x32xf32, #tpu.memory_space<vmem>>, vector<16x32xf32>
    %c0_170 = arith.constant 0 : index
    %c0_171 = arith.constant 0 : index
    %c0_172 = arith.constant 0 : index
    %358 = vector.load %arg18[%c0_170, %c0_171, %c0_172] : memref<1x16x32xf32, #tpu.memory_space<vmem>>, vector<1x16x32xf32>
    %359 = vector.shape_cast %358 : vector<1x16x32xf32> to vector<16x32xf32>
    %360 = vector.shape_cast %357 : vector<16x32xf32> to vector<1x16x32xf32>
    tpu.vector_store %arg18[%c0_170, %c0_171, %c0_172], %360 {strides = array<i32>} : memref<1x16x32xf32, #tpu.memory_space<vmem>>, vector<1x16x32xf32>,
    return
  }
  func.func @transform_0(%arg0: i32) -> (i32, i32, i32) {
    %c0_i32 = arith.constant 0 : i32
    %c0_i32_0 = arith.constant 0 : i32
    %c0_i32_1 = arith.constant 0 : i32
    return %arg0, %c0_i32, %c0_i32_0 : i32, i32, i32
  }
  func.func @transform_1(%arg0: i32) -> (i32, i32) {
    %c0_i32 = arith.constant 0 : i32
    %c0_i32_0 = arith.constant 0 : i32
    %c0_i32_1 = arith.constant 0 : i32
    return %c0_i32, %c0_i32_0 : i32, i32
  }
  func.func @transform_2(%arg0: i32) -> (i32, i32) {
    %c0_i32 = arith.constant 0 : i32
    %c0_i32_0 = arith.constant 0 : i32
    %c0_i32_1 = arith.constant 0 : i32
    return %c0_i32, %c0_i32_0 : i32, i32
  }
  func.func @transform_3(%arg0: i32) -> (i32, i32) {
    %c0_i32 = arith.constant 0 : i32
    %c0_i32_0 = arith.constant 0 : i32
    %c0_i32_1 = arith.constant 0 : i32
    return %c0_i32, %c0_i32_0 : i32, i32
  }
  func.func @transform_4(%arg0: i32) -> (i32, i32) {
    %c0_i32 = arith.constant 0 : i32
    %c0_i32_0 = arith.constant 0 : i32
    %c0_i32_1 = arith.constant 0 : i32
    return %c0_i32, %c0_i32_0 : i32, i32
  }
  func.func @transform_5(%arg0: i32) -> (i32, i32) {
    %c0_i32 = arith.constant 0 : i32
    %c0_i32_0 = arith.constant 0 : i32
    %c0_i32_1 = arith.constant 0 : i32
    return %c0_i32, %c0_i32_0 : i32, i32
  }
  func.func @transform_6(%arg0: i32) -> (i32, i32) {
    %c0_i32 = arith.constant 0 : i32
    %c0_i32_0 = arith.constant 0 : i32
    %c0_i32_1 = arith.constant 0 : i32
    return %c0_i32, %c0_i32_0 : i32, i32
  }
  func.func @transform_7(%arg0: i32) -> (i32, i32) {
    %c0_i32 = arith.constant 0 : i32
    %c0_i32_0 = arith.constant 0 : i32
    %c0_i32_1 = arith.constant 0 : i32
    return %c0_i32, %c0_i32_0 : i32, i32
  }
  func.func @transform_8(%arg0: i32) -> (i32, i32) {
    %c0_i32 = arith.constant 0 : i32
    %c0_i32_0 = arith.constant 0 : i32
    %c0_i32_1 = arith.constant 0 : i32
    return %c0_i32, %c0_i32_0 : i32, i32
  }
  func.func @transform_9(%arg0: i32) -> (i32, i32) {
    %c0_i32 = arith.constant 0 : i32
    %c0_i32_0 = arith.constant 0 : i32
    %c0_i32_1 = arith.constant 0 : i32
    return %c0_i32, %c0_i32_0 : i32, i32
  }
  func.func @transform_10(%arg0: i32) -> (i32, i32) {
    %c0_i32 = arith.constant 0 : i32
    %c0_i32_0 = arith.constant 0 : i32
    %c0_i32_1 = arith.constant 0 : i32
    return %c0_i32, %c0_i32_0 : i32, i32
  }
  func.func @transform_11(%arg0: i32) -> (i32, i32) {
    %c0_i32 = arith.constant 0 : i32
    %c0_i32_0 = arith.constant 0 : i32
    %c0_i32_1 = arith.constant 0 : i32
    return %c0_i32, %c0_i32_0 : i32, i32
  }
  func.func @transform_12(%arg0: i32) -> (i32, i32) {
    %c0_i32 = arith.constant 0 : i32
    %c0_i32_0 = arith.constant 0 : i32
    %c0_i32_1 = arith.constant 0 : i32
    return %c0_i32, %c0_i32_0 : i32, i32
  }
  func.func @transform_13(%arg0: i32) -> (i32, i32) {
    %c0_i32 = arith.constant 0 : i32
    %c0_i32_0 = arith.constant 0 : i32
    %c0_i32_1 = arith.constant 0 : i32
    return %c0_i32, %c0_i32_0 : i32, i32
  }
  func.func @transform_14(%arg0: i32) -> (i32, i32) {
    %c0_i32 = arith.constant 0 : i32
    %c0_i32_0 = arith.constant 0 : i32
    %c0_i32_1 = arith.constant 0 : i32
    return %c0_i32, %c0_i32_0 : i32, i32
  }
  func.func @transform_15(%arg0: i32) -> (i32, i32) {
    %c0_i32 = arith.constant 0 : i32
    %c0_i32_0 = arith.constant 0 : i32
    %c0_i32_1 = arith.constant 0 : i32
    return %c0_i32, %c0_i32_0 : i32, i32
  }
  func.func @transform_16(%arg0: i32) -> (i32, i32) {
    %c0_i32 = arith.constant 0 : i32
    %c0_i32_0 = arith.constant 0 : i32
    %c0_i32_1 = arith.constant 0 : i32
    return %c0_i32, %c0_i32_0 : i32, i32
  }
  func.func @transform_17(%arg0: i32) -> (i32, i32, i32) {
    %c0_i32 = arith.constant 0 : i32
    %c0_i32_0 = arith.constant 0 : i32
    %c0_i32_1 = arith.constant 0 : i32
    return %arg0, %c0_i32, %c0_i32_0 : i32, i32, i32
  }
}

module attributes {stable_mosaic.version = 11 : i64} {
  func.func @fused_block_kernel(%arg0: i32, %arg1: memref<1x16x32xf32, #tpu.memory_space<vmem>>, %arg2: memref<1x32xf32, #tpu.memory_space<vmem>>, %arg3: memref<1x32xf32, #tpu.memory_space<vmem>>, %arg4: memref<32x96xf32, #tpu.memory_space<vmem>>, %arg5: memref<32x32xf32, #tpu.memory_space<vmem>>, %arg6: memref<1x32xf32, #tpu.memory_space<vmem>>, %arg7: memref<1x32xf32, #tpu.memory_space<vmem>>, %arg8: memref<1x32xf32, #tpu.memory_space<vmem>>, %arg9: memref<32x96xf32, #tpu.memory_space<vmem>>, %arg10: memref<32x32xf32, #tpu.memory_space<vmem>>, %arg11: memref<1x32xf32, #tpu.memory_space<vmem>>, %arg12: memref<1x32xf32, #tpu.memory_space<vmem>>, %arg13: memref<1x32xf32, #tpu.memory_space<vmem>>, %arg14: memref<32x256xf32, #tpu.memory_space<vmem>>, %arg15: memref<1x256xf32, #tpu.memory_space<vmem>>, %arg16: memref<128x32xf32, #tpu.memory_space<vmem>>, %arg17: memref<1x32xf32, #tpu.memory_space<vmem>>, %arg18: memref<1x16x32xf32, #tpu.memory_space<vmem>>, %arg19: memref<16x32xf32, #tpu.memory_space<vmem>>, %arg20: memref<4x16x8xf32, #tpu.memory_space<vmem>>, %arg21: memref<4x16x8xf32, #tpu.memory_space<vmem>>, %arg22: memref<4x16x8xf32, #tpu.memory_space<vmem>>) attributes {dimension_semantics = [#tpu.dimension_semantics<parallel>], iteration_bounds = array<i64: 2>, scalar_prefetch = 0 : i64, scratch_operands = 4 : i64, tpu.core_type = #tpu.core_type<tc>, window_params = [{transform_indices = @transform_0, window_bounds = array<i64: 1, 16, 32>}, {pipeline_mode = #tpu.pipeline_mode<synchronous>, transform_indices = @transform_1, window_bounds = array<i64: 1, 32>}, {pipeline_mode = #tpu.pipeline_mode<synchronous>, transform_indices = @transform_2, window_bounds = array<i64: 1, 32>}, {pipeline_mode = #tpu.pipeline_mode<synchronous>, transform_indices = @transform_3, window_bounds = array<i64: 32, 96>}, {pipeline_mode = #tpu.pipeline_mode<synchronous>, transform_indices = @transform_4, window_bounds = array<i64: 32, 32>}, {pipeline_mode = #tpu.pipeline_mode<synchronous>, transform_indices = @transform_5, window_bounds = array<i64: 1, 32>}, {pipeline_mode = #tpu.pipeline_mode<synchronous>, transform_indices = @transform_6, window_bounds = array<i64: 1, 32>}, {pipeline_mode = #tpu.pipeline_mode<synchronous>, transform_indices = @transform_7, window_bounds = array<i64: 1, 32>}, {pipeline_mode = #tpu.pipeline_mode<synchronous>, transform_indices = @transform_8, window_bounds = array<i64: 32, 96>}, {pipeline_mode = #tpu.pipeline_mode<synchronous>, transform_indices = @transform_9, window_bounds = array<i64: 32, 32>}, {pipeline_mode = #tpu.pipeline_mode<synchronous>, transform_indices = @transform_10, window_bounds = array<i64: 1, 32>}, {pipeline_mode = #tpu.pipeline_mode<synchronous>, transform_indices = @transform_11, window_bounds = array<i64: 1, 32>}, {pipeline_mode = #tpu.pipeline_mode<synchronous>, transform_indices = @transform_12, window_bounds = array<i64: 1, 32>}, {pipeline_mode = #tpu.pipeline_mode<synchronous>, transform_indices = @transform_13, window_bounds = array<i64: 32, 256>}, {pipeline_mode = #tpu.pipeline_mode<synchronous>, transform_indices = @transform_14, window_bounds = array<i64: 1, 256>}, {pipeline_mode = #tpu.pipeline_mode<synchronous>, transform_indices = @transform_15, window_bounds = array<i64: 128, 32>}, {pipeline_mode = #tpu.pipeline_mode<synchronous>, transform_indices = @transform_16, window_bounds = array<i64: 1, 32>}, {transform_indices = @transform_17, window_bounds = array<i64: 1, 16, 32>}]} {
    %c0 = arith.constant 0 : index
    %c0_0 = arith.constant 0 : index
    %c0_1 = arith.constant 0 : index
    %0 = vector.load %arg1[%c0, %c0_0, %c0_1] : memref<1x16x32xf32, #tpu.memory_space<vmem>>, vector<1x16x32xf32>
    %1 = vector.shape_cast %0 : vector<1x16x32xf32> to vector<16x32xf32>
    %c0_2 = arith.constant 0 : index
    %c0_3 = arith.constant 0 : index
    %2 = vector.load %arg19[%c0_2, %c0_3] : memref<16x32xf32, #tpu.memory_space<vmem>>, vector<16x32xf32>
    tpu.vector_store %arg19[%c0_2, %c0_3], %1 {strides = array<i32>} : memref<16x32xf32, #tpu.memory_space<vmem>>, vector<16x32xf32>,
    %c0_i32 = arith.constant 0 : i32
    %c1_i32 = arith.constant 1 : i32
    %3 = arith.muli %c0_i32, %c1_i32 : i32
    %c0_i32_4 = arith.constant 0 : i32
    %4 = arith.addi %c0_i32_4, %3 : i32
    %c16_i32 = arith.constant 16 : i32
    %5 = arith.muli %4, %c16_i32 : i32
    %6 = tpu.assume_multiple %5, 16 : i32
    %7 = arith.index_cast %6 : i32 to index
    %c0_5 = arith.constant 0 : index
    %8 = vector.load %arg19[%7, %c0_5] : memref<16x32xf32, #tpu.memory_space<vmem>>, vector<16x32xf32>
    %c0_6 = arith.constant 0 : index
    %c0_7 = arith.constant 0 : index
    %9 = vector.load %arg2[%c0_6, %c0_7] : memref<1x32xf32, #tpu.memory_space<vmem>>, vector<1x32xf32>
    %c0_8 = arith.constant 0 : index
    %c0_9 = arith.constant 0 : index
    %10 = vector.load %arg3[%c0_8, %c0_9] : memref<1x32xf32, #tpu.memory_space<vmem>>, vector<1x32xf32>
    %cst = arith.constant dense<0.000000e+00> : vector<16xf32>
    %11 = vector.multi_reduction <add>, %8, %cst [1] : vector<16x32xf32> to vector<16xf32>
    %12 = vector.shape_cast %11 : vector<16xf32> to vector<16x1xf32>
    %cst_10 = arith.constant 3.200000e+01 : f32
    %13 = vector.broadcast %cst_10 : f32 to vector<16x1xf32>
    %14 = arith.divf %12, %13 : vector<16x1xf32>
    %15 = vector.broadcast %14 : vector<16x1xf32> to vector<16x32xf32>
    %16 = arith.subf %8, %15 : vector<16x32xf32>
    %17 = arith.mulf %16, %16 : vector<16x32xf32>
    %cst_11 = arith.constant dense<0.000000e+00> : vector<16xf32>
    %18 = vector.multi_reduction <add>, %17, %cst_11 [1] : vector<16x32xf32> to vector<16xf32>
    %19 = vector.shape_cast %18 : vector<16xf32> to vector<16x1xf32>
    %cst_12 = arith.constant 3.200000e+01 : f32
    %20 = vector.broadcast %cst_12 : f32 to vector<16x1xf32>
    %21 = arith.divf %19, %20 : vector<16x1xf32>
    %22 = vector.broadcast %14 : vector<16x1xf32> to vector<16x32xf32>
    %23 = arith.subf %8, %22 : vector<16x32xf32>
    %cst_13 = arith.constant 9.99999974E-6 : f32
    %24 = vector.broadcast %cst_13 : f32 to vector<16x1xf32>
    %25 = arith.addf %21, %24 : vector<16x1xf32>
    %26 = math.rsqrt %25 : vector<16x1xf32>
    %27 = vector.broadcast %26 : vector<16x1xf32> to vector<16x32xf32>
    %28 = arith.mulf %23, %27 : vector<16x32xf32>
    %29 = vector.broadcast %9 : vector<1x32xf32> to vector<16x32xf32>
    %30 = arith.mulf %28, %29 : vector<16x32xf32>
    %31 = vector.broadcast %10 : vector<1x32xf32> to vector<16x32xf32>
    %32 = arith.addf %30, %31 : vector<16x32xf32>
    %c0_14 = arith.constant 0 : index
    %c0_15 = arith.constant 0 : index
    %33 = vector.load %arg4[%c0_14, %c0_15] : memref<32x96xf32, #tpu.memory_space<vmem>>, vector<32x96xf32>
    %cst_16 = arith.constant dense<0.000000e+00> : vector<16x96xf32>
    %34 = tpu.matmul %32, %33, %cst_16 {dimension_numbers = #tpu.dot_dimension_numbers<[1], [0], [0], [1], [0, 0, 1, 1], [], []>} : vector<16x32xf32>, vector<32x96xf32>, vector<16x96xf32> -> vector<16x96xf32>
    %35 = vector.extract_strided_slice %34 {offsets = [0, 0], sizes = [16, 8], strides = [1, 1]} : vector<16x96xf32> to vector<16x8xf32>
    %c0_17 = arith.constant 0 : index
    %36 = arith.index_cast %6 : i32 to index
    %c0_18 = arith.constant 0 : index
    %37 = vector.load %arg20[%c0_17, %36, %c0_18] : memref<4x16x8xf32, #tpu.memory_space<vmem>>, vector<1x16x8xf32>
    %38 = vector.shape_cast %37 : vector<1x16x8xf32> to vector<16x8xf32>
    %39 = vector.shape_cast %35 : vector<16x8xf32> to vector<1x16x8xf32>
    tpu.vector_store %arg20[%c0_17, %36, %c0_18], %39 {strides = array<i32>} : memref<4x16x8xf32, #tpu.memory_space<vmem>>, vector<1x16x8xf32>,
    %40 = vector.extract_strided_slice %34 {offsets = [0, 32], sizes = [16, 8], strides = [1, 1]} : vector<16x96xf32> to vector<16x8xf32>
    %c0_19 = arith.constant 0 : index
    %41 = arith.index_cast %6 : i32 to index
    %c0_20 = arith.constant 0 : index
    %42 = vector.load %arg21[%c0_19, %41, %c0_20] : memref<4x16x8xf32, #tpu.memory_space<vmem>>, vector<1x16x8xf32>
    %43 = vector.shape_cast %42 : vector<1x16x8xf32> to vector<16x8xf32>
    %44 = vector.shape_cast %40 : vector<16x8xf32> to vector<1x16x8xf32>
    tpu.vector_store %arg21[%c0_19, %41, %c0_20], %44 {strides = array<i32>} : memref<4x16x8xf32, #tpu.memory_space<vmem>>, vector<1x16x8xf32>,
    %45 = vector.extract_strided_slice %34 {offsets = [0, 64], sizes = [16, 8], strides = [1, 1]} : vector<16x96xf32> to vector<16x8xf32>
    %c0_21 = arith.constant 0 : index
    %46 = arith.index_cast %6 : i32 to index
    %c0_22 = arith.constant 0 : index
    %47 = vector.load %arg22[%c0_21, %46, %c0_22] : memref<4x16x8xf32, #tpu.memory_space<vmem>>, vector<1x16x8xf32>
    %48 = vector.shape_cast %47 : vector<1x16x8xf32> to vector<16x8xf32>
    %49 = vector.shape_cast %45 : vector<16x8xf32> to vector<1x16x8xf32>
    tpu.vector_store %arg22[%c0_21, %46, %c0_22], %49 {strides = array<i32>} : memref<4x16x8xf32, #tpu.memory_space<vmem>>, vector<1x16x8xf32>,
    %50 = vector.extract_strided_slice %34 {offsets = [0, 8], sizes = [16, 8], strides = [1, 1]} : vector<16x96xf32> to vector<16x8xf32>
    %c1 = arith.constant 1 : index
    %51 = arith.index_cast %6 : i32 to index
    %c0_23 = arith.constant 0 : index
    %52 = vector.load %arg20[%c1, %51, %c0_23] : memref<4x16x8xf32, #tpu.memory_space<vmem>>, vector<1x16x8xf32>
    %53 = vector.shape_cast %52 : vector<1x16x8xf32> to vector<16x8xf32>
    %54 = vector.shape_cast %50 : vector<16x8xf32> to vector<1x16x8xf32>
    tpu.vector_store %arg20[%c1, %51, %c0_23], %54 {strides = array<i32>} : memref<4x16x8xf32, #tpu.memory_space<vmem>>, vector<1x16x8xf32>,
    %55 = vector.extract_strided_slice %34 {offsets = [0, 40], sizes = [16, 8], strides = [1, 1]} : vector<16x96xf32> to vector<16x8xf32>
    %c1_24 = arith.constant 1 : index
    %56 = arith.index_cast %6 : i32 to index
    %c0_25 = arith.constant 0 : index
    %57 = vector.load %arg21[%c1_24, %56, %c0_25] : memref<4x16x8xf32, #tpu.memory_space<vmem>>, vector<1x16x8xf32>
    %58 = vector.shape_cast %57 : vector<1x16x8xf32> to vector<16x8xf32>
    %59 = vector.shape_cast %55 : vector<16x8xf32> to vector<1x16x8xf32>
    tpu.vector_store %arg21[%c1_24, %56, %c0_25], %59 {strides = array<i32>} : memref<4x16x8xf32, #tpu.memory_space<vmem>>, vector<1x16x8xf32>,
    %60 = vector.extract_strided_slice %34 {offsets = [0, 72], sizes = [16, 8], strides = [1, 1]} : vector<16x96xf32> to vector<16x8xf32>
    %c1_26 = arith.constant 1 : index
    %61 = arith.index_cast %6 : i32 to index
    %c0_27 = arith.constant 0 : index
    %62 = vector.load %arg22[%c1_26, %61, %c0_27] : memref<4x16x8xf32, #tpu.memory_space<vmem>>, vector<1x16x8xf32>
    %63 = vector.shape_cast %62 : vector<1x16x8xf32> to vector<16x8xf32>
    %64 = vector.shape_cast %60 : vector<16x8xf32> to vector<1x16x8xf32>
    tpu.vector_store %arg22[%c1_26, %61, %c0_27], %64 {strides = array<i32>} : memref<4x16x8xf32, #tpu.memory_space<vmem>>, vector<1x16x8xf32>,
    %65 = vector.extract_strided_slice %34 {offsets = [0, 16], sizes = [16, 8], strides = [1, 1]} : vector<16x96xf32> to vector<16x8xf32>
    %c2 = arith.constant 2 : index
    %66 = arith.index_cast %6 : i32 to index
    %c0_28 = arith.constant 0 : index
    %67 = vector.load %arg20[%c2, %66, %c0_28] : memref<4x16x8xf32, #tpu.memory_space<vmem>>, vector<1x16x8xf32>
    %68 = vector.shape_cast %67 : vector<1x16x8xf32> to vector<16x8xf32>
    %69 = vector.shape_cast %65 : vector<16x8xf32> to vector<1x16x8xf32>
    tpu.vector_store %arg20[%c2, %66, %c0_28], %69 {strides = array<i32>} : memref<4x16x8xf32, #tpu.memory_space<vmem>>, vector<1x16x8xf32>,
    %70 = vector.extract_strided_slice %34 {offsets = [0, 48], sizes = [16, 8], strides = [1, 1]} : vector<16x96xf32> to vector<16x8xf32>
    %c2_29 = arith.constant 2 : index
    %71 = arith.index_cast %6 : i32 to index
    %c0_30 = arith.constant 0 : index
    %72 = vector.load %arg21[%c2_29, %71, %c0_30] : memref<4x16x8xf32, #tpu.memory_space<vmem>>, vector<1x16x8xf32>
    %73 = vector.shape_cast %72 : vector<1x16x8xf32> to vector<16x8xf32>
    %74 = vector.shape_cast %70 : vector<16x8xf32> to vector<1x16x8xf32>
    tpu.vector_store %arg21[%c2_29, %71, %c0_30], %74 {strides = array<i32>} : memref<4x16x8xf32, #tpu.memory_space<vmem>>, vector<1x16x8xf32>,
    %75 = vector.extract_strided_slice %34 {offsets = [0, 80], sizes = [16, 8], strides = [1, 1]} : vector<16x96xf32> to vector<16x8xf32>
    %c2_31 = arith.constant 2 : index
    %76 = arith.index_cast %6 : i32 to index
    %c0_32 = arith.constant 0 : index
    %77 = vector.load %arg22[%c2_31, %76, %c0_32] : memref<4x16x8xf32, #tpu.memory_space<vmem>>, vector<1x16x8xf32>
    %78 = vector.shape_cast %77 : vector<1x16x8xf32> to vector<16x8xf32>
    %79 = vector.shape_cast %75 : vector<16x8xf32> to vector<1x16x8xf32>
    tpu.vector_store %arg22[%c2_31, %76, %c0_32], %79 {strides = array<i32>} : memref<4x16x8xf32, #tpu.memory_space<vmem>>, vector<1x16x8xf32>,
    %80 = vector.extract_strided_slice %34 {offsets = [0, 24], sizes = [16, 8], strides = [1, 1]} : vector<16x96xf32> to vector<16x8xf32>
    %c3 = arith.constant 3 : index
    %81 = arith.index_cast %6 : i32 to index
    %c0_33 = arith.constant 0 : index
    %82 = vector.load %arg20[%c3, %81, %c0_33] : memref<4x16x8xf32, #tpu.memory_space<vmem>>, vector<1x16x8xf32>
    %83 = vector.shape_cast %82 : vector<1x16x8xf32> to vector<16x8xf32>
    %84 = vector.shape_cast %80 : vector<16x8xf32> to vector<1x16x8xf32>
    tpu.vector_store %arg20[%c3, %81, %c0_33], %84 {strides = array<i32>} : memref<4x16x8xf32, #tpu.memory_space<vmem>>, vector<1x16x8xf32>,
    %85 = vector.extract_strided_slice %34 {offsets = [0, 56], sizes = [16, 8], strides = [1, 1]} : vector<16x96xf32> to vector<16x8xf32>
    %c3_34 = arith.constant 3 : index
    %86 = arith.index_cast %6 : i32 to index
    %c0_35 = arith.constant 0 : index
    %87 = vector.load %arg21[%c3_34, %86, %c0_35] : memref<4x16x8xf32, #tpu.memory_space<vmem>>, vector<1x16x8xf32>
    %88 = vector.shape_cast %87 : vector<1x16x8xf32> to vector<16x8xf32>
    %89 = vector.shape_cast %85 : vector<16x8xf32> to vector<1x16x8xf32>
    tpu.vector_store %arg21[%c3_34, %86, %c0_35], %89 {strides = array<i32>} : memref<4x16x8xf32, #tpu.memory_space<vmem>>, vector<1x16x8xf32>,
    %90 = vector.extract_strided_slice %34 {offsets = [0, 88], sizes = [16, 8], strides = [1, 1]} : vector<16x96xf32> to vector<16x8xf32>
    %c3_36 = arith.constant 3 : index
    %91 = arith.index_cast %6 : i32 to index
    %c0_37 = arith.constant 0 : index
    %92 = vector.load %arg22[%c3_36, %91, %c0_37] : memref<4x16x8xf32, #tpu.memory_space<vmem>>, vector<1x16x8xf32>
    %93 = vector.shape_cast %92 : vector<1x16x8xf32> to vector<16x8xf32>
    %94 = vector.shape_cast %90 : vector<16x8xf32> to vector<1x16x8xf32>
    tpu.vector_store %arg22[%c3_36, %91, %c0_37], %94 {strides = array<i32>} : memref<4x16x8xf32, #tpu.memory_space<vmem>>, vector<1x16x8xf32>,
    %c1_i32_38 = arith.constant 1 : i32
    %c0_i32_39 = arith.constant 0 : i32
    %c1_i32_40 = arith.constant 1 : i32
    %95 = arith.muli %c0_i32_39, %c1_i32_40 : i32
    %c0_i32_41 = arith.constant 0 : i32
    %96 = arith.addi %c0_i32_41, %95 : i32
    %c16_i32_42 = arith.constant 16 : i32
    %97 = arith.muli %96, %c16_i32_42 : i32
    %98 = tpu.assume_multiple %97, 16 : i32
    %c0_43 = arith.constant 0 : index
    %99 = arith.index_cast %98 : i32 to index
    %c0_44 = arith.constant 0 : index
    %100 = vector.load %arg20[%c0_43, %99, %c0_44] : memref<4x16x8xf32, #tpu.memory_space<vmem>>, vector<4x16x8xf32>
    %cst_45 = arith.constant 0xFF800000 : f32
    %101 = vector.broadcast %cst_45 : f32 to vector<4x16x1xf32>
    %cst_46 = arith.constant 0.000000e+00 : f32
    %102 = vector.broadcast %cst_46 : f32 to vector<4x16x1xf32>
    %cst_47 = arith.constant 0.000000e+00 : f32
    %103 = vector.broadcast %cst_47 : f32 to vector<4x16x8xf32>
    %c0_i32_48 = arith.constant 0 : i32
    %c16_i32_49 = arith.constant 16 : i32
    %104 = arith.muli %c0_i32_48, %c16_i32_49 : i32
    %105 = tpu.assume_multiple %104, 16 : i32
    %c0_50 = arith.constant 0 : index
    %106 = arith.index_cast %105 : i32 to index
    %c0_51 = arith.constant 0 : index
    %107 = vector.load %arg21[%c0_50, %106, %c0_51] : memref<4x16x8xf32, #tpu.memory_space<vmem>>, vector<4x16x8xf32>
    %c0_52 = arith.constant 0 : index
    %108 = arith.index_cast %105 : i32 to index
    %c0_53 = arith.constant 0 : index
    %109 = vector.load %arg22[%c0_52, %108, %c0_53] : memref<4x16x8xf32, #tpu.memory_space<vmem>>, vector<4x16x8xf32>
    "tpu.trace_start"() <{level = 10 : i32, message = "hqd,hkd->hqk"}> : () -> ()
    %cst_54 = arith.constant dense<0.000000e+00> : vector<4x16x16xf32>
    %110 = tpu.matmul %100, %107, %cst_54 {dimension_numbers = #tpu.dot_dimension_numbers<[2], [2], [1], [1], [0, 0, 0, 1, 1, 1], [0], [0]>} : vector<4x16x8xf32>, vector<4x16x8xf32>, vector<4x16x16xf32> -> vector<4x16x16xf32>
    "tpu.trace_stop"() : () -> ()
    %cst_55 = arith.constant dense<0xFF800000> : vector<4x16xf32>
    %111 = vector.multi_reduction <maximumf>, %110, %cst_55 [2] : vector<4x16x16xf32> to vector<4x16xf32>
    %112 = vector.shape_cast %111 : vector<4x16xf32> to vector<4x16x1xf32>
    %113 = arith.maximumf %101, %112 : vector<4x16x1xf32>
    %114 = arith.subf %101, %113 : vector<4x16x1xf32>
    %115 = math.exp %114 : vector<4x16x1xf32>
    %116 = vector.broadcast %113 : vector<4x16x1xf32> to vector<4x16x16xf32>
    %117 = arith.subf %110, %116 : vector<4x16x16xf32>
    %118 = math.exp %117 : vector<4x16x16xf32>
    %119 = arith.mulf %115, %102 : vector<4x16x1xf32>
    %cst_56 = arith.constant dense<0.000000e+00> : vector<4x16xf32>
    %120 = vector.multi_reduction <add>, %118, %cst_56 [2] : vector<4x16x16xf32> to vector<4x16xf32>
    %121 = vector.shape_cast %120 : vector<4x16xf32> to vector<4x16x1xf32>
    %122 = arith.addf %119, %121 : vector<4x16x1xf32>
    %123 = vector.broadcast %115 : vector<4x16x1xf32> to vector<4x16x8xf32>
    %124 = arith.mulf %123, %103 : vector<4x16x8xf32>
    "tpu.trace_start"() <{level = 10 : i32, message = "hqk,hkd->hqd"}> : () -> ()
    %cst_57 = arith.constant dense<0.000000e+00> : vector<4x16x8xf32>
    %125 = tpu.matmul %118, %109, %cst_57 {dimension_numbers = #tpu.dot_dimension_numbers<[2], [1], [1], [2], [0, 0, 0, 1, 1, 2], [0], [0]>} : vector<4x16x16xf32>, vector<4x16x8xf32>, vector<4x16x8xf32> -> vector<4x16x8xf32>
    "tpu.trace_stop"() : () -> ()
    %126 = arith.addf %124, %125 : vector<4x16x8xf32>
    %c1_i32_58 = arith.constant 1 : i32
    %127 = tpu.reciprocal %122 {approx = true} : vector<4x16x1xf32> -> vector<4x16x1xf32>
    %128 = arith.mulf %122, %127 : vector<4x16x1xf32>
    %cst_59 = arith.constant 2.000000e+00 : f32
    %129 = vector.broadcast %cst_59 : f32 to vector<4x16x1xf32>
    %130 = arith.subf %129, %128 : vector<4x16x1xf32>
    %131 = arith.mulf %127, %130 : vector<4x16x1xf32>
    %132 = vector.broadcast %131 : vector<4x16x1xf32> to vector<4x16x8xf32>
    %133 = arith.mulf %126, %132 : vector<4x16x8xf32>
    %134 = vector.extract_strided_slice %133 {offsets = [0, 0, 0], sizes = [1, 16, 8], strides = [1, 1, 1]} : vector<4x16x8xf32> to vector<1x16x8xf32>
    %135 = vector.shape_cast %134 : vector<1x16x8xf32> to vector<16x8xf32>
    %136 = vector.extract_strided_slice %133 {offsets = [1, 0, 0], sizes = [1, 16, 8], strides = [1, 1, 1]} : vector<4x16x8xf32> to vector<1x16x8xf32>
    %137 = vector.shape_cast %136 : vector<1x16x8xf32> to vector<16x8xf32>
    %138 = vector.extract_strided_slice %133 {offsets = [2, 0, 0], sizes = [1, 16, 8], strides = [1, 1, 1]} : vector<4x16x8xf32> to vector<1x16x8xf32>
    %139 = vector.shape_cast %138 : vector<1x16x8xf32> to vector<16x8xf32>
    %140 = vector.extract_strided_slice %133 {offsets = [3, 0, 0], sizes = [1, 16, 8], strides = [1, 1, 1]} : vector<4x16x8xf32> to vector<1x16x8xf32>
    %141 = vector.shape_cast %140 : vector<1x16x8xf32> to vector<16x8xf32>
    %142 = tpu.concatenate %135, %137, %139, %141 in 1 : vector<16x8xf32>, vector<16x8xf32>, vector<16x8xf32>, vector<16x8xf32> -> vector<16x32xf32>
    %c0_60 = arith.constant 0 : index
    %c0_61 = arith.constant 0 : index
    %143 = vector.load %arg5[%c0_60, %c0_61] : memref<32x32xf32, #tpu.memory_space<vmem>>, vector<32x32xf32>
    %cst_62 = arith.constant dense<0.000000e+00> : vector<16x32xf32>
    %144 = tpu.matmul %142, %143, %cst_62 {dimension_numbers = #tpu.dot_dimension_numbers<[1], [0], [0], [1], [0, 0, 1, 1], [], []>} : vector<16x32xf32>, vector<32x32xf32>, vector<16x32xf32> -> vector<16x32xf32>
    %c0_63 = arith.constant 0 : index
    %c0_64 = arith.constant 0 : index
    %145 = vector.load %arg6[%c0_63, %c0_64] : memref<1x32xf32, #tpu.memory_space<vmem>>, vector<1x32xf32>
    %146 = vector.broadcast %145 : vector<1x32xf32> to vector<16x32xf32>
    %147 = arith.addf %144, %146 : vector<16x32xf32>
    %148 = arith.index_cast %98 : i32 to index
    %c0_65 = arith.constant 0 : index
    %149 = vector.load %arg19[%148, %c0_65] : memref<16x32xf32, #tpu.memory_space<vmem>>, vector<16x32xf32>
    %150 = arith.addf %149, %147 : vector<16x32xf32>
    %151 = arith.index_cast %98 : i32 to index
    %c0_66 = arith.constant 0 : index
    %152 = vector.load %arg19[%151, %c0_66] : memref<16x32xf32, #tpu.memory_space<vmem>>, vector<16x32xf32>
    tpu.vector_store %arg19[%151, %c0_66], %150 {strides = array<i32>} : memref<16x32xf32, #tpu.memory_space<vmem>>, vector<16x32xf32>,
    %c1_i32_67 = arith.constant 1 : i32
    %c0_i32_68 = arith.constant 0 : i32
    %c1_i32_69 = arith.constant 1 : i32
    %153 = arith.muli %c0_i32_68, %c1_i32_69 : i32
    %c0_i32_70 = arith.constant 0 : i32
    %154 = arith.addi %c0_i32_70, %153 : i32
    %c16_i32_71 = arith.constant 16 : i32
    %155 = arith.muli %154, %c16_i32_71 : i32
    %156 = tpu.assume_multiple %155, 16 : i32
    %157 = arith.index_cast %156 : i32 to index
    %c0_72 = arith.constant 0 : index
    %158 = vector.load %arg19[%157, %c0_72] : memref<16x32xf32, #tpu.memory_space<vmem>>, vector<16x32xf32>
    %c0_73 = arith.constant 0 : index
    %c0_74 = arith.constant 0 : index
    %159 = vector.load %arg7[%c0_73, %c0_74] : memref<1x32xf32, #tpu.memory_space<vmem>>, vector<1x32xf32>
    %c0_75 = arith.constant 0 : index
    %c0_76 = arith.constant 0 : index
    %160 = vector.load %arg8[%c0_75, %c0_76] : memref<1x32xf32, #tpu.memory_space<vmem>>, vector<1x32xf32>
    %cst_77 = arith.constant dense<0.000000e+00> : vector<16xf32>
    %161 = vector.multi_reduction <add>, %158, %cst_77 [1] : vector<16x32xf32> to vector<16xf32>
    %162 = vector.shape_cast %161 : vector<16xf32> to vector<16x1xf32>
    %cst_78 = arith.constant 3.200000e+01 : f32
    %163 = vector.broadcast %cst_78 : f32 to vector<16x1xf32>
    %164 = arith.divf %162, %163 : vector<16x1xf32>
    %165 = vector.broadcast %164 : vector<16x1xf32> to vector<16x32xf32>
    %166 = arith.subf %158, %165 : vector<16x32xf32>
    %167 = arith.mulf %166, %166 : vector<16x32xf32>
    %cst_79 = arith.constant dense<0.000000e+00> : vector<16xf32>
    %168 = vector.multi_reduction <add>, %167, %cst_79 [1] : vector<16x32xf32> to vector<16xf32>
    %169 = vector.shape_cast %168 : vector<16xf32> to vector<16x1xf32>
    %cst_80 = arith.constant 3.200000e+01 : f32
    %170 = vector.broadcast %cst_80 : f32 to vector<16x1xf32>
    %171 = arith.divf %169, %170 : vector<16x1xf32>
    %172 = vector.broadcast %164 : vector<16x1xf32> to vector<16x32xf32>
    %173 = arith.subf %158, %172 : vector<16x32xf32>
    %cst_81 = arith.constant 9.99999974E-6 : f32
    %174 = vector.broadcast %cst_81 : f32 to vector<16x1xf32>
    %175 = arith.addf %171, %174 : vector<16x1xf32>
    %176 = math.rsqrt %175 : vector<16x1xf32>
    %177 = vector.broadcast %176 : vector<16x1xf32> to vector<16x32xf32>
    %178 = arith.mulf %173, %177 : vector<16x32xf32>
    %179 = vector.broadcast %159 : vector<1x32xf32> to vector<16x32xf32>
    %180 = arith.mulf %178, %179 : vector<16x32xf32>
    %181 = vector.broadcast %160 : vector<1x32xf32> to vector<16x32xf32>
    %182 = arith.addf %180, %181 : vector<16x32xf32>
    %c0_82 = arith.constant 0 : index
    %c0_83 = arith.constant 0 : index
    %183 = vector.load %arg9[%c0_82, %c0_83] : memref<32x96xf32, #tpu.memory_space<vmem>>, vector<32x96xf32>
    %cst_84 = arith.constant dense<0.000000e+00> : vector<16x96xf32>
    %184 = tpu.matmul %182, %183, %cst_84 {dimension_numbers = #tpu.dot_dimension_numbers<[1], [0], [0], [1], [0, 0, 1, 1], [], []>} : vector<16x32xf32>, vector<32x96xf32>, vector<16x96xf32> -> vector<16x96xf32>
    %185 = vector.extract_strided_slice %184 {offsets = [0, 0], sizes = [16, 8], strides = [1, 1]} : vector<16x96xf32> to vector<16x8xf32>
    %c0_85 = arith.constant 0 : index
    %186 = arith.index_cast %156 : i32 to index
    %c0_86 = arith.constant 0 : index
    %187 = vector.load %arg20[%c0_85, %186, %c0_86] : memref<4x16x8xf32, #tpu.memory_space<vmem>>, vector<1x16x8xf32>
    %188 = vector.shape_cast %187 : vector<1x16x8xf32> to vector<16x8xf32>
    %189 = vector.shape_cast %185 : vector<16x8xf32> to vector<1x16x8xf32>
    tpu.vector_store %arg20[%c0_85, %186, %c0_86], %189 {strides = array<i32>} : memref<4x16x8xf32, #tpu.memory_space<vmem>>, vector<1x16x8xf32>,
    %190 = vector.extract_strided_slice %184 {offsets = [0, 32], sizes = [16, 8], strides = [1, 1]} : vector<16x96xf32> to vector<16x8xf32>
    %c0_87 = arith.constant 0 : index
    %191 = arith.index_cast %156 : i32 to index
    %c0_88 = arith.constant 0 : index
    %192 = vector.load %arg21[%c0_87, %191, %c0_88] : memref<4x16x8xf32, #tpu.memory_space<vmem>>, vector<1x16x8xf32>
    %193 = vector.shape_cast %192 : vector<1x16x8xf32> to vector<16x8xf32>
    %194 = vector.shape_cast %190 : vector<16x8xf32> to vector<1x16x8xf32>
    tpu.vector_store %arg21[%c0_87, %191, %c0_88], %194 {strides = array<i32>} : memref<4x16x8xf32, #tpu.memory_space<vmem>>, vector<1x16x8xf32>,
    %195 = vector.extract_strided_slice %184 {offsets = [0, 64], sizes = [16, 8], strides = [1, 1]} : vector<16x96xf32> to vector<16x8xf32>
    %c0_89 = arith.constant 0 : index
    %196 = arith.index_cast %156 : i32 to index
    %c0_90 = arith.constant 0 : index
    %197 = vector.load %arg22[%c0_89, %196, %c0_90] : memref<4x16x8xf32, #tpu.memory_space<vmem>>, vector<1x16x8xf32>
    %198 = vector.shape_cast %197 : vector<1x16x8xf32> to vector<16x8xf32>
    %199 = vector.shape_cast %195 : vector<16x8xf32> to vector<1x16x8xf32>
    tpu.vector_store %arg22[%c0_89, %196, %c0_90], %199 {strides = array<i32>} : memref<4x16x8xf32, #tpu.memory_space<vmem>>, vector<1x16x8xf32>,
    %200 = vector.extract_strided_slice %184 {offsets = [0, 8], sizes = [16, 8], strides = [1, 1]} : vector<16x96xf32> to vector<16x8xf32>
    %c1_91 = arith.constant 1 : index
    %201 = arith.index_cast %156 : i32 to index
    %c0_92 = arith.constant 0 : index
    %202 = vector.load %arg20[%c1_91, %201, %c0_92] : memref<4x16x8xf32, #tpu.memory_space<vmem>>, vector<1x16x8xf32>
    %203 = vector.shape_cast %202 : vector<1x16x8xf32> to vector<16x8xf32>
    %204 = vector.shape_cast %200 : vector<16x8xf32> to vector<1x16x8xf32>
    tpu.vector_store %arg20[%c1_91, %201, %c0_92], %204 {strides = array<i32>} : memref<4x16x8xf32, #tpu.memory_space<vmem>>, vector<1x16x8xf32>,
    %205 = vector.extract_strided_slice %184 {offsets = [0, 40], sizes = [16, 8], strides = [1, 1]} : vector<16x96xf32> to vector<16x8xf32>
    %c1_93 = arith.constant 1 : index
    %206 = arith.index_cast %156 : i32 to index
    %c0_94 = arith.constant 0 : index
    %207 = vector.load %arg21[%c1_93, %206, %c0_94] : memref<4x16x8xf32, #tpu.memory_space<vmem>>, vector<1x16x8xf32>
    %208 = vector.shape_cast %207 : vector<1x16x8xf32> to vector<16x8xf32>
    %209 = vector.shape_cast %205 : vector<16x8xf32> to vector<1x16x8xf32>
    tpu.vector_store %arg21[%c1_93, %206, %c0_94], %209 {strides = array<i32>} : memref<4x16x8xf32, #tpu.memory_space<vmem>>, vector<1x16x8xf32>,
    %210 = vector.extract_strided_slice %184 {offsets = [0, 72], sizes = [16, 8], strides = [1, 1]} : vector<16x96xf32> to vector<16x8xf32>
    %c1_95 = arith.constant 1 : index
    %211 = arith.index_cast %156 : i32 to index
    %c0_96 = arith.constant 0 : index
    %212 = vector.load %arg22[%c1_95, %211, %c0_96] : memref<4x16x8xf32, #tpu.memory_space<vmem>>, vector<1x16x8xf32>
    %213 = vector.shape_cast %212 : vector<1x16x8xf32> to vector<16x8xf32>
    %214 = vector.shape_cast %210 : vector<16x8xf32> to vector<1x16x8xf32>
    tpu.vector_store %arg22[%c1_95, %211, %c0_96], %214 {strides = array<i32>} : memref<4x16x8xf32, #tpu.memory_space<vmem>>, vector<1x16x8xf32>,
    %215 = vector.extract_strided_slice %184 {offsets = [0, 16], sizes = [16, 8], strides = [1, 1]} : vector<16x96xf32> to vector<16x8xf32>
    %c2_97 = arith.constant 2 : index
    %216 = arith.index_cast %156 : i32 to index
    %c0_98 = arith.constant 0 : index
    %217 = vector.load %arg20[%c2_97, %216, %c0_98] : memref<4x16x8xf32, #tpu.memory_space<vmem>>, vector<1x16x8xf32>
    %218 = vector.shape_cast %217 : vector<1x16x8xf32> to vector<16x8xf32>
    %219 = vector.shape_cast %215 : vector<16x8xf32> to vector<1x16x8xf32>
    tpu.vector_store %arg20[%c2_97, %216, %c0_98], %219 {strides = array<i32>} : memref<4x16x8xf32, #tpu.memory_space<vmem>>, vector<1x16x8xf32>,
    %220 = vector.extract_strided_slice %184 {offsets = [0, 48], sizes = [16, 8], strides = [1, 1]} : vector<16x96xf32> to vector<16x8xf32>
    %c2_99 = arith.constant 2 : index
    %221 = arith.index_cast %156 : i32 to index
    %c0_100 = arith.constant 0 : index
    %222 = vector.load %arg21[%c2_99, %221, %c0_100] : memref<4x16x8xf32, #tpu.memory_space<vmem>>, vector<1x16x8xf32>
    %223 = vector.shape_cast %222 : vector<1x16x8xf32> to vector<16x8xf32>
    %224 = vector.shape_cast %220 : vector<16x8xf32> to vector<1x16x8xf32>
    tpu.vector_store %arg21[%c2_99, %221, %c0_100], %224 {strides = array<i32>} : memref<4x16x8xf32, #tpu.memory_space<vmem>>, vector<1x16x8xf32>,
    %225 = vector.extract_strided_slice %184 {offsets = [0, 80], sizes = [16, 8], strides = [1, 1]} : vector<16x96xf32> to vector<16x8xf32>
    %c2_101 = arith.constant 2 : index
    %226 = arith.index_cast %156 : i32 to index
    %c0_102 = arith.constant 0 : index
    %227 = vector.load %arg22[%c2_101, %226, %c0_102] : memref<4x16x8xf32, #tpu.memory_space<vmem>>, vector<1x16x8xf32>
    %228 = vector.shape_cast %227 : vector<1x16x8xf32> to vector<16x8xf32>
    %229 = vector.shape_cast %225 : vector<16x8xf32> to vector<1x16x8xf32>
    tpu.vector_store %arg22[%c2_101, %226, %c0_102], %229 {strides = array<i32>} : memref<4x16x8xf32, #tpu.memory_space<vmem>>, vector<1x16x8xf32>,
    %230 = vector.extract_strided_slice %184 {offsets = [0, 24], sizes = [16, 8], strides = [1, 1]} : vector<16x96xf32> to vector<16x8xf32>
    %c3_103 = arith.constant 3 : index
    %231 = arith.index_cast %156 : i32 to index
    %c0_104 = arith.constant 0 : index
    %232 = vector.load %arg20[%c3_103, %231, %c0_104] : memref<4x16x8xf32, #tpu.memory_space<vmem>>, vector<1x16x8xf32>
    %233 = vector.shape_cast %232 : vector<1x16x8xf32> to vector<16x8xf32>
    %234 = vector.shape_cast %230 : vector<16x8xf32> to vector<1x16x8xf32>
    tpu.vector_store %arg20[%c3_103, %231, %c0_104], %234 {strides = array<i32>} : memref<4x16x8xf32, #tpu.memory_space<vmem>>, vector<1x16x8xf32>,
    %235 = vector.extract_strided_slice %184 {offsets = [0, 56], sizes = [16, 8], strides = [1, 1]} : vector<16x96xf32> to vector<16x8xf32>
    %c3_105 = arith.constant 3 : index
    %236 = arith.index_cast %156 : i32 to index
    %c0_106 = arith.constant 0 : index
    %237 = vector.load %arg21[%c3_105, %236, %c0_106] : memref<4x16x8xf32, #tpu.memory_space<vmem>>, vector<1x16x8xf32>
    %238 = vector.shape_cast %237 : vector<1x16x8xf32> to vector<16x8xf32>
    %239 = vector.shape_cast %235 : vector<16x8xf32> to vector<1x16x8xf32>
    tpu.vector_store %arg21[%c3_105, %236, %c0_106], %239 {strides = array<i32>} : memref<4x16x8xf32, #tpu.memory_space<vmem>>, vector<1x16x8xf32>,
    %240 = vector.extract_strided_slice %184 {offsets = [0, 88], sizes = [16, 8], strides = [1, 1]} : vector<16x96xf32> to vector<16x8xf32>
    %c3_107 = arith.constant 3 : index
    %241 = arith.index_cast %156 : i32 to index
    %c0_108 = arith.constant 0 : index
    %242 = vector.load %arg22[%c3_107, %241, %c0_108] : memref<4x16x8xf32, #tpu.memory_space<vmem>>, vector<1x16x8xf32>
    %243 = vector.shape_cast %242 : vector<1x16x8xf32> to vector<16x8xf32>
    %244 = vector.shape_cast %240 : vector<16x8xf32> to vector<1x16x8xf32>
    tpu.vector_store %arg22[%c3_107, %241, %c0_108], %244 {strides = array<i32>} : memref<4x16x8xf32, #tpu.memory_space<vmem>>, vector<1x16x8xf32>,
    %c1_i32_109 = arith.constant 1 : i32
    %c0_i32_110 = arith.constant 0 : i32
    %c1_i32_111 = arith.constant 1 : i32
    %245 = arith.muli %c0_i32_110, %c1_i32_111 : i32
    %c0_i32_112 = arith.constant 0 : i32
    %246 = arith.addi %c0_i32_112, %245 : i32
    %c16_i32_113 = arith.constant 16 : i32
    %247 = arith.muli %246, %c16_i32_113 : i32
    %248 = tpu.assume_multiple %247, 16 : i32
    %c0_114 = arith.constant 0 : index
    %249 = arith.index_cast %248 : i32 to index
    %c0_115 = arith.constant 0 : index
    %250 = vector.load %arg20[%c0_114, %249, %c0_115] : memref<4x16x8xf32, #tpu.memory_space<vmem>>, vector<4x16x8xf32>
    %cst_116 = arith.constant 0xFF800000 : f32
    %251 = vector.broadcast %cst_116 : f32 to vector<4x16x1xf32>
    %cst_117 = arith.constant 0.000000e+00 : f32
    %252 = vector.broadcast %cst_117 : f32 to vector<4x16x1xf32>
    %cst_118 = arith.constant 0.000000e+00 : f32
    %253 = vector.broadcast %cst_118 : f32 to vector<4x16x8xf32>
    %c0_i32_119 = arith.constant 0 : i32
    %c16_i32_120 = arith.constant 16 : i32
    %254 = arith.muli %c0_i32_119, %c16_i32_120 : i32
    %255 = tpu.assume_multiple %254, 16 : i32
    %c0_121 = arith.constant 0 : index
    %256 = arith.index_cast %255 : i32 to index
    %c0_122 = arith.constant 0 : index
    %257 = vector.load %arg21[%c0_121, %256, %c0_122] : memref<4x16x8xf32, #tpu.memory_space<vmem>>, vector<4x16x8xf32>
    %c0_123 = arith.constant 0 : index
    %258 = arith.index_cast %255 : i32 to index
    %c0_124 = arith.constant 0 : index
    %259 = vector.load %arg22[%c0_123, %258, %c0_124] : memref<4x16x8xf32, #tpu.memory_space<vmem>>, vector<4x16x8xf32>
    "tpu.trace_start"() <{level = 10 : i32, message = "hqd,hkd->hqk"}> : () -> ()
    %cst_125 = arith.constant dense<0.000000e+00> : vector<4x16x16xf32>
    %260 = tpu.matmul %250, %257, %cst_125 {dimension_numbers = #tpu.dot_dimension_numbers<[2], [2], [1], [1], [0, 0, 0, 1, 1, 1], [0], [0]>} : vector<4x16x8xf32>, vector<4x16x8xf32>, vector<4x16x16xf32> -> vector<4x16x16xf32>
    "tpu.trace_stop"() : () -> ()
    %cst_126 = arith.constant dense<0xFF800000> : vector<4x16xf32>
    %261 = vector.multi_reduction <maximumf>, %260, %cst_126 [2] : vector<4x16x16xf32> to vector<4x16xf32>
    %262 = vector.shape_cast %261 : vector<4x16xf32> to vector<4x16x1xf32>
    %263 = arith.maximumf %251, %262 : vector<4x16x1xf32>
    %264 = arith.subf %251, %263 : vector<4x16x1xf32>
    %265 = math.exp %264 : vector<4x16x1xf32>
    %266 = vector.broadcast %263 : vector<4x16x1xf32> to vector<4x16x16xf32>
    %267 = arith.subf %260, %266 : vector<4x16x16xf32>
    %268 = math.exp %267 : vector<4x16x16xf32>
    %269 = arith.mulf %265, %252 : vector<4x16x1xf32>
    %cst_127 = arith.constant dense<0.000000e+00> : vector<4x16xf32>
    %270 = vector.multi_reduction <add>, %268, %cst_127 [2] : vector<4x16x16xf32> to vector<4x16xf32>
    %271 = vector.shape_cast %270 : vector<4x16xf32> to vector<4x16x1xf32>
    %272 = arith.addf %269, %271 : vector<4x16x1xf32>
    %273 = vector.broadcast %265 : vector<4x16x1xf32> to vector<4x16x8xf32>
    %274 = arith.mulf %273, %253 : vector<4x16x8xf32>
    "tpu.trace_start"() <{level = 10 : i32, message = "hqk,hkd->hqd"}> : () -> ()
    %cst_128 = arith.constant dense<0.000000e+00> : vector<4x16x8xf32>
    %275 = tpu.matmul %268, %259, %cst_128 {dimension_numbers = #tpu.dot_dimension_numbers<[2], [1], [1], [2], [0, 0, 0, 1, 1, 2], [0], [0]>} : vector<4x16x16xf32>, vector<4x16x8xf32>, vector<4x16x8xf32> -> vector<4x16x8xf32>
    "tpu.trace_stop"() : () -> ()
    %276 = arith.addf %274, %275 : vector<4x16x8xf32>
    %c1_i32_129 = arith.constant 1 : i32
    %277 = tpu.reciprocal %272 {approx = true} : vector<4x16x1xf32> -> vector<4x16x1xf32>
    %278 = arith.mulf %272, %277 : vector<4x16x1xf32>
    %cst_130 = arith.constant 2.000000e+00 : f32
    %279 = vector.broadcast %cst_130 : f32 to vector<4x16x1xf32>
    %280 = arith.subf %279, %278 : vector<4x16x1xf32>
    %281 = arith.mulf %277, %280 : vector<4x16x1xf32>
    %282 = vector.broadcast %281 : vector<4x16x1xf32> to vector<4x16x8xf32>
    %283 = arith.mulf %276, %282 : vector<4x16x8xf32>
    %284 = vector.extract_strided_slice %283 {offsets = [0, 0, 0], sizes = [1, 16, 8], strides = [1, 1, 1]} : vector<4x16x8xf32> to vector<1x16x8xf32>
    %285 = vector.shape_cast %284 : vector<1x16x8xf32> to vector<16x8xf32>
    %286 = vector.extract_strided_slice %283 {offsets = [1, 0, 0], sizes = [1, 16, 8], strides = [1, 1, 1]} : vector<4x16x8xf32> to vector<1x16x8xf32>
    %287 = vector.shape_cast %286 : vector<1x16x8xf32> to vector<16x8xf32>
    %288 = vector.extract_strided_slice %283 {offsets = [2, 0, 0], sizes = [1, 16, 8], strides = [1, 1, 1]} : vector<4x16x8xf32> to vector<1x16x8xf32>
    %289 = vector.shape_cast %288 : vector<1x16x8xf32> to vector<16x8xf32>
    %290 = vector.extract_strided_slice %283 {offsets = [3, 0, 0], sizes = [1, 16, 8], strides = [1, 1, 1]} : vector<4x16x8xf32> to vector<1x16x8xf32>
    %291 = vector.shape_cast %290 : vector<1x16x8xf32> to vector<16x8xf32>
    %292 = tpu.concatenate %285, %287, %289, %291 in 1 : vector<16x8xf32>, vector<16x8xf32>, vector<16x8xf32>, vector<16x8xf32> -> vector<16x32xf32>
    %c0_131 = arith.constant 0 : index
    %c0_132 = arith.constant 0 : index
    %293 = vector.load %arg10[%c0_131, %c0_132] : memref<32x32xf32, #tpu.memory_space<vmem>>, vector<32x32xf32>
    %cst_133 = arith.constant dense<0.000000e+00> : vector<16x32xf32>
    %294 = tpu.matmul %292, %293, %cst_133 {dimension_numbers = #tpu.dot_dimension_numbers<[1], [0], [0], [1], [0, 0, 1, 1], [], []>} : vector<16x32xf32>, vector<32x32xf32>, vector<16x32xf32> -> vector<16x32xf32>
    %c0_134 = arith.constant 0 : index
    %c0_135 = arith.constant 0 : index
    %295 = vector.load %arg11[%c0_134, %c0_135] : memref<1x32xf32, #tpu.memory_space<vmem>>, vector<1x32xf32>
    %296 = vector.broadcast %295 : vector<1x32xf32> to vector<16x32xf32>
    %297 = arith.addf %294, %296 : vector<16x32xf32>
    %298 = arith.index_cast %248 : i32 to index
    %c0_136 = arith.constant 0 : index
    %299 = vector.load %arg19[%298, %c0_136] : memref<16x32xf32, #tpu.memory_space<vmem>>, vector<16x32xf32>
    %300 = arith.addf %299, %297 : vector<16x32xf32>
    %301 = arith.index_cast %248 : i32 to index
    %c0_137 = arith.constant 0 : index
    %302 = vector.load %arg19[%301, %c0_137] : memref<16x32xf32, #tpu.memory_space<vmem>>, vector<16x32xf32>
    tpu.vector_store %arg19[%301, %c0_137], %300 {strides = array<i32>} : memref<16x32xf32, #tpu.memory_space<vmem>>, vector<16x32xf32>,
    %c1_i32_138 = arith.constant 1 : i32
    %c0_i32_139 = arith.constant 0 : i32
    %c1_i32_140 = arith.constant 1 : i32
    %303 = arith.muli %c0_i32_139, %c1_i32_140 : i32
    %c0_i32_141 = arith.constant 0 : i32
    %304 = arith.addi %c0_i32_141, %303 : i32
    %c16_i32_142 = arith.constant 16 : i32
    %305 = arith.muli %304, %c16_i32_142 : i32
    %306 = tpu.assume_multiple %305, 16 : i32
    %307 = arith.index_cast %306 : i32 to index
    %c0_143 = arith.constant 0 : index
    %308 = vector.load %arg19[%307, %c0_143] : memref<16x32xf32, #tpu.memory_space<vmem>>, vector<16x32xf32>
    %c0_144 = arith.constant 0 : index
    %c0_145 = arith.constant 0 : index
    %309 = vector.load %arg12[%c0_144, %c0_145] : memref<1x32xf32, #tpu.memory_space<vmem>>, vector<1x32xf32>
    %c0_146 = arith.constant 0 : index
    %c0_147 = arith.constant 0 : index
    %310 = vector.load %arg13[%c0_146, %c0_147] : memref<1x32xf32, #tpu.memory_space<vmem>>, vector<1x32xf32>
    %cst_148 = arith.constant dense<0.000000e+00> : vector<16xf32>
    %311 = vector.multi_reduction <add>, %308, %cst_148 [1] : vector<16x32xf32> to vector<16xf32>
    %312 = vector.shape_cast %311 : vector<16xf32> to vector<16x1xf32>
    %cst_149 = arith.constant 3.200000e+01 : f32
    %313 = vector.broadcast %cst_149 : f32 to vector<16x1xf32>
    %314 = arith.divf %312, %313 : vector<16x1xf32>
    %315 = vector.broadcast %314 : vector<16x1xf32> to vector<16x32xf32>
    %316 = arith.subf %308, %315 : vector<16x32xf32>
    %317 = arith.mulf %316, %316 : vector<16x32xf32>
    %cst_150 = arith.constant dense<0.000000e+00> : vector<16xf32>
    %318 = vector.multi_reduction <add>, %317, %cst_150 [1] : vector<16x32xf32> to vector<16xf32>
    %319 = vector.shape_cast %318 : vector<16xf32> to vector<16x1xf32>
    %cst_151 = arith.constant 3.200000e+01 : f32
    %320 = vector.broadcast %cst_151 : f32 to vector<16x1xf32>
    %321 = arith.divf %319, %320 : vector<16x1xf32>
    %322 = vector.broadcast %314 : vector<16x1xf32> to vector<16x32xf32>
    %323 = arith.subf %308, %322 : vector<16x32xf32>
    %cst_152 = arith.constant 9.99999974E-6 : f32
    %324 = vector.broadcast %cst_152 : f32 to vector<16x1xf32>
    %325 = arith.addf %321, %324 : vector<16x1xf32>
    %326 = math.rsqrt %325 : vector<16x1xf32>
    %327 = vector.broadcast %326 : vector<16x1xf32> to vector<16x32xf32>
    %328 = arith.mulf %323, %327 : vector<16x32xf32>
    %329 = vector.broadcast %309 : vector<1x32xf32> to vector<16x32xf32>
    %330 = arith.mulf %328, %329 : vector<16x32xf32>
    %331 = vector.broadcast %310 : vector<1x32xf32> to vector<16x32xf32>
    %332 = arith.addf %330, %331 : vector<16x32xf32>
    %c0_153 = arith.constant 0 : index
    %c0_154 = arith.constant 0 : index
    %333 = vector.load %arg14[%c0_153, %c0_154] : memref<32x256xf32, #tpu.memory_space<vmem>>, vector<32x256xf32>
    %cst_155 = arith.constant dense<0.000000e+00> : vector<16x256xf32>
    %334 = tpu.matmul %332, %333, %cst_155 {dimension_numbers = #tpu.dot_dimension_numbers<[1], [0], [0], [1], [0, 0, 1, 1], [], []>} : vector<16x32xf32>, vector<32x256xf32>, vector<16x256xf32> -> vector<16x256xf32>
    %c0_156 = arith.constant 0 : index
    %c0_157 = arith.constant 0 : index
    %335 = vector.load %arg15[%c0_156, %c0_157] : memref<1x256xf32, #tpu.memory_space<vmem>>, vector<1x256xf32>
    %336 = vector.broadcast %335 : vector<1x256xf32> to vector<16x256xf32>
    %337 = arith.addf %334, %336 : vector<16x256xf32>
    %338 = vector.extract_strided_slice %337 {offsets = [0, 0], sizes = [16, 128], strides = [1, 1]} : vector<16x256xf32> to vector<16x128xf32>
    %339 = vector.extract_strided_slice %337 {offsets = [0, 128], sizes = [16, 128], strides = [1, 1]} : vector<16x256xf32> to vector<16x128xf32>
    %cst_158 = arith.constant 5.000000e-01 : f32
    %340 = vector.broadcast %cst_158 : f32 to vector<16x128xf32>
    %341 = arith.mulf %339, %340 : vector<16x128xf32>
    %cst_159 = arith.constant 0.707106769 : f32
    %342 = vector.broadcast %cst_159 : f32 to vector<16x128xf32>
    %343 = arith.mulf %339, %342 : vector<16x128xf32>
    %344 = math.erf %343 : vector<16x128xf32>
    %cst_160 = arith.constant 1.000000e+00 : f32
    %345 = vector.broadcast %cst_160 : f32 to vector<16x128xf32>
    %346 = arith.addf %345, %344 : vector<16x128xf32>
    %347 = arith.mulf %341, %346 : vector<16x128xf32>
    %348 = arith.mulf %338, %347 : vector<16x128xf32>
    %c0_161 = arith.constant 0 : index
    %c0_162 = arith.constant 0 : index
    %349 = vector.load %arg16[%c0_161, %c0_162] : memref<128x32xf32, #tpu.memory_space<vmem>>, vector<128x32xf32>
    %cst_163 = arith.constant dense<0.000000e+00> : vector<16x32xf32>
    %350 = tpu.matmul %348, %349, %cst_163 {dimension_numbers = #tpu.dot_dimension_numbers<[1], [0], [0], [1], [0, 0, 1, 1], [], []>} : vector<16x128xf32>, vector<128x32xf32>, vector<16x32xf32> -> vector<16x32xf32>
    %c0_164 = arith.constant 0 : index
    %c0_165 = arith.constant 0 : index
    %351 = vector.load %arg17[%c0_164, %c0_165] : memref<1x32xf32, #tpu.memory_space<vmem>>, vector<1x32xf32>
    %352 = vector.broadcast %351 : vector<1x32xf32> to vector<16x32xf32>
    %353 = arith.addf %350, %352 : vector<16x32xf32>
    %354 = arith.addf %308, %353 : vector<16x32xf32>
    %355 = arith.index_cast %306 : i32 to index
    %c0_166 = arith.constant 0 : index
    %356 = vector.load %arg19[%355, %c0_166] : memref<16x32xf32, #tpu.memory_space<vmem>>, vector<16x32xf32>
    tpu.vector_store %arg19[%355, %c0_166], %354 {strides = array<i32>} : memref<16x32xf32, #tpu.memory_space<vmem>>, vector<16x32xf32>,
    %c1_i32_167 = arith.constant 1 : i32
    %c0_168 = arith.constant 0 : index
    %c0_169 = arith.constant 0 : index
    %357 = vector.load %arg19[%c0_168, %c0_169] : memref<16x32xf32, #tpu.memory_space<vmem>>, vector<16x32xf32>
    %c0_170 = arith.constant 0 : index
    %c0_171 = arith.constant 0 : index
    %c0_172 = arith.constant 0 : index
    %358 = vector.load %arg18[%c0_170, %c0_171, %c0_172] : memref<1x16x32xf32, #tpu.memory_space<vmem>>, vector<1x16x32xf32>
    %359 = vector.shape_cast %358 : vector<1x16x32xf32> to vector<16x32xf32>
    %360 = vector.shape_cast %357 : vector<16x32xf32> to vector<1x16x32xf32>
    tpu.vector_store %arg18[%c0_170, %c0_171, %c0_172], %360 {strides = array<i32>} : memref<1x16x32xf32, #tpu.memory_space<vmem>>, vector<1x16x32xf32>,
    return
  }
  func.func @transform_0(%arg0: i32) -> (i32, i32, i32) {
    %c0_i32 = arith.constant 0 : i32
    %c0_i32_0 = arith.constant 0 : i32
    %c0_i32_1 = arith.constant 0 : i32
    return %arg0, %c0_i32, %c0_i32_0 : i32, i32, i32
  }
  func.func @transform_1(%arg0: i32) -> (i32, i32) {
    %c0_i32 = arith.constant 0 : i32
    %c0_i32_0 = arith.constant 0 : i32
    %c0_i32_1 = arith.constant 0 : i32
    return %c0_i32, %c0_i32_0 : i32, i32
  }
  func.func @transform_2(%arg0: i32) -> (i32, i32) {
    %c0_i32 = arith.constant 0 : i32
    %c0_i32_0 = arith.constant 0 : i32
    %c0_i32_1 = arith.constant 0 : i32
    return %c0_i32, %c0_i32_0 : i32, i32
  }
  func.func @transform_3(%arg0: i32) -> (i32, i32) {
    %c0_i32 = arith.constant 0 : i32
    %c0_i32_0 = arith.constant 0 : i32
    %c0_i32_1 = arith.constant 0 : i32
    return %c0_i32, %c0_i32_0 : i32, i32
  }
  func.func @transform_4(%arg0: i32) -> (i32, i32) {
    %c0_i32 = arith.constant 0 : i32
    %c0_i32_0 = arith.constant 0 : i32
    %c0_i32_1 = arith.constant 0 : i32
    return %c0_i32, %c0_i32_0 : i32, i32
  }
  func.func @transform_5(%arg0: i32) -> (i32, i32) {
    %c0_i32 = arith.constant 0 : i32
    %c0_i32_0 = arith.constant 0 : i32
    %c0_i32_1 = arith.constant 0 : i32
    return %c0_i32, %c0_i32_0 : i32, i32
  }
  func.func @transform_6(%arg0: i32) -> (i32, i32) {
    %c0_i32 = arith.constant 0 : i32
    %c0_i32_0 = arith.constant 0 : i32
    %c0_i32_1 = arith.constant 0 : i32
    return %c0_i32, %c0_i32_0 : i32, i32
  }
  func.func @transform_7(%arg0: i32) -> (i32, i32) {
    %c0_i32 = arith.constant 0 : i32
    %c0_i32_0 = arith.constant 0 : i32
    %c0_i32_1 = arith.constant 0 : i32
    return %c0_i32, %c0_i32_0 : i32, i32
  }
  func.func @transform_8(%arg0: i32) -> (i32, i32) {
    %c0_i32 = arith.constant 0 : i32
    %c0_i32_0 = arith.constant 0 : i32
    %c0_i32_1 = arith.constant 0 : i32
    return %c0_i32, %c0_i32_0 : i32, i32
  }
  func.func @transform_9(%arg0: i32) -> (i32, i32) {
    %c0_i32 = arith.constant 0 : i32
    %c0_i32_0 = arith.constant 0 : i32
    %c0_i32_1 = arith.constant 0 : i32
    return %c0_i32, %c0_i32_0 : i32, i32
  }
  func.func @transform_10(%arg0: i32) -> (i32, i32) {
    %c0_i32 = arith.constant 0 : i32
    %c0_i32_0 = arith.constant 0 : i32
    %c0_i32_1 = arith.constant 0 : i32
    return %c0_i32, %c0_i32_0 : i32, i32
  }
  func.func @transform_11(%arg0: i32) -> (i32, i32) {
    %c0_i32 = arith.constant 0 : i32
    %c0_i32_0 = arith.constant 0 : i32
    %c0_i32_1 = arith.constant 0 : i32
    return %c0_i32, %c0_i32_0 : i32, i32
  }
  func.func @transform_12(%arg0: i32) -> (i32, i32) {
    %c0_i32 = arith.constant 0 : i32
    %c0_i32_0 = arith.constant 0 : i32
    %c0_i32_1 = arith.constant 0 : i32
    return %c0_i32, %c0_i32_0 : i32, i32
  }
  func.func @transform_13(%arg0: i32) -> (i32, i32) {
    %c0_i32 = arith.constant 0 : i32
    %c0_i32_0 = arith.constant 0 : i32
    %c0_i32_1 = arith.constant 0 : i32
    return %c0_i32, %c0_i32_0 : i32, i32
  }
  func.func @transform_14(%arg0: i32) -> (i32, i32) {
    %c0_i32 = arith.constant 0 : i32
    %c0_i32_0 = arith.constant 0 : i32
    %c0_i32_1 = arith.constant 0 : i32
    return %c0_i32, %c0_i32_0 : i32, i32
  }
  func.func @transform_15(%arg0: i32) -> (i32, i32) {
    %c0_i32 = arith.constant 0 : i32
    %c0_i32_0 = arith.constant 0 : i32
    %c0_i32_1 = arith.constant 0 : i32
    return %c0_i32, %c0_i32_0 : i32, i32
  }
  func.func @transform_16(%arg0: i32) -> (i32, i32) {
    %c0_i32 = arith.constant 0 : i32
    %c0_i32_0 = arith.constant 0 : i32
    %c0_i32_1 = arith.constant 0 : i32
    return %c0_i32, %c0_i32_0 : i32, i32
  }
  func.func @transform_17(%arg0: i32) -> (i32, i32, i32) {
    %c0_i32 = arith.constant 0 : i32
    %c0_i32_0 = arith.constant 0 : i32
    %c0_i32_1 = arith.constant 0 : i32
    return %arg0, %c0_i32, %c0_i32_0 : i32, i32, i32
  }
}

</mosaic_0001>

<bundles_post_ra>
// kernel: tpu_custom_call.1
= control target key start
LH: loop header
LB: loop body
LE: loop exit
PB: predicated region body
PF: predicated region fallthrough
CT: control target
= control target key end

     0   :  { %s4937_s0 = inlined_call_operand.vmem [shape: f32[2,16,32], index: 0, kind: input, shape index: {}]   ;;  %s4938_s1 = inlined_call_operand.vmem [shape: f32[1,32], index: 1, kind: input, shape index: {}]   ;;  %s4939_s2 = inlined_call_operand.hbm [shape: f32[1,32], index: 2, kind: input, shape index: {}]   ;;  %s4940_s3 = inlined_call_operand.vmem [shape: f32[32,96], index: 3, kind: input, shape index: {}]   ;;  %s4941_s4 = inlined_call_operand.vmem [shape: f32[32,32], index: 4, kind: input, shape index: {}]   ;;  %s4942_s5 = inlined_call_operand.vmem [shape: f32[1,32], index: 5, kind: input, shape index: {}]   ;;  %s4943_s6 = inlined_call_operand.vmem [shape: f32[1,32], index: 6, kind: input, shape index: {}]   ;;  %s4944_s7 = inlined_call_operand.vmem [shape: f32[1,32], index: 7, kind: input, shape index: {}]   ;;  %s4945_s8 = inlined_call_operand.hbm [shape: f32[32,96], index: 8, kind: input, shape index: {}]   ;;  %s4946_s9 = inlined_call_operand.hbm [shape: f32[32,32], index: 9, kind: input, shape index: {}]   ;;  %s4947_s10 = inlined_call_operand.vmem [shape: f32[1,32], index: 10, kind: input, shape index: {}]   ;;  %s4948_s11 = inlined_call_operand.vmem [shape: f32[1,32], index: 11, kind: input, shape index: {}]   ;;  %s4949_s12 = inlined_call_operand.vmem [shape: f32[1,32], index: 12, kind: input, shape index: {}]   ;;  %s4950_s13 = inlined_call_operand.vmem [shape: f32[32,256], index: 13, kind: input, shape index: {}]   ;;  %s4951_s14 = inlined_call_operand.vmem [shape: f32[1,256], index: 14, kind: input, shape index: {}]   ;;  %s4952_s15 = inlined_call_operand.vmem [shape: f32[128,32], index: 15, kind: input, shape index: {}]   ;;  %s4953_s16 = inlined_call_operand.vmem [shape: f32[1,32], index: 16, kind: input, shape index: {}]   ;;  %s4954_s17 = inlined_call_operand.hbm [shape: f32[2,16,32], index: 17, kind: output, shape index: {}]  }
   0x1   :  { %4974 = sst [smem:[#allocation22_spill]] %s4937_s0 }
   0x2   :  { %4975 = sst [smem:[#allocation23_spill]] %s4938_s1 }
   0x3   :  { %4976 = sst [smem:[#allocation24_spill]] %s4954_s17 }
   0x4   :  { %22 = vsyncpa [#allocation7], 0 }
   0x5   :  { %23 = vsyncpa [#allocation10], 0 }
   0x6   :  { %24 = vsyncpa [#allocation8], 0 }
   0x7   :  { %26 = vsyncpa [#allocation8 + $0x1], 0  ;;  %s4251_s24 = smov 0   ;;  %s4253_s25 = smov 0  }
   0x8   :  { %s4255_s26 = smov 0   ;;  %s4257_s27 = smov 0  }
   0x9 LB: > { %4977 = sst [smem:[#allocation16_spill]] %s4125_s24  ;;  %s4272_s28 = sadd.s32 4294967295, %s4137_s27   ;;  %s4137_s27 = sphi %s4257_s27, %s5004_s27   ;;  %s4133_s26 = sphi %s4255_s26, %s5006_s26   ;;  %s4129_s25 = sphi %s4253_s25, %s5008_s25   ;;  %s4125_s24 = sphi %s4251_s24, %s5007_s24  }
   0xa   : > { %4978 = sst [smem:[#allocation17_spill]] %s4133_s26  ;;  %s3407_s29 = sadd.s32 4294967294, %s4137_s27  }
   0xb   : > { %4979 = sst [smem:[#allocation18_spill]] %s4137_s27  ;;  %s4276_s0 = sadd.s32 1, %s4137_s27  }
   0xc   : > { %4980 = sst [smem:[#allocation19_spill]] %s4276_s0  ;;  %s401_s30 = sadd.s32 1, %s4133_s26 }
   0xd   : > { %s398_s18 = ssub.s32 %s4137_s27, %s4276_s0  ;;  %p411_p0 = scmp.ne.s32.totalorder %s4133_s26, %s4129_s25 }
   0xe   : > { %p399_p1 = scmp.eq.s32.totalorder %s398_s18, 0  ;;  %p412_p2 = scmp.eq.s32.totalorder %s4272_s28, 1 }
   0xf   : > { %p417_p3 = scmp.ne.s32.totalorder %s4129_s25, %s4125_s24  ;;  %p418_p4 = scmp.eq.s32.totalorder %s3407_s29, 1 }
  0x10   : > { %s4287_s19 = scalar_select %p399_p1, %s4133_s26, %s401_s30  }
  0x11   : > { %p4289_p5 = por %p412_p2, %p411_p0  ;;  %p4293_p6 = por %p418_p4, %p417_p3 }
  0x12   : > { %4981 = sst [smem:[#allocation20_spill]] %s4287_s19  ;;  %p3408_p7 = scmp.ge.s32.totalorder %s4137_s27, 1 }
  0x13   : > { %s4982_s1 = scalar_select %p4289_p5, 1, 0 }
  0x14   : > { %s4983_s20 = scalar_select %p4293_p6, 1, 0 }
  0x15   : > { %p425_p8 = scmp.lt.s32.totalorder %s4137_s27, 3  ;;  %p4961_p9 = scmp.eq.s32.totalorder %s4272_s28, 0 }
  0x16   : > { %4984 = sst [smem:[#allocation21_spill]] %s4983_s20  ;;  %s4139_s22 = smov [#allocation9]  }
  0x17   : > { %p4300_p10 = pnand %p3408_p7, %p425_p8  ;;  %s466_s23 = sshll.u32 %s4139_s22, 4  ;;  %s467_s23 = int_to_ptr.vmem [resolvable:$true] %s466_s23 }
  0x18   : > { %s4140_s30 = smov [#allocation6]   ;;  %s4141_s19 = smov [#allocation11]  }
  0x19   : > { %p3805_p11 = pneg %p4300_p10  ;;  %s441_s18 = sshll.u32 %s4140_s30, 4  ;;  %s442_s18 = int_to_ptr.vmem [resolvable:$true] %s441_s18 }
  0x1a   : > { %s479_s26 = sshll.u32 %s4141_s19, 4  ;;  %s4002_s0 = scalar_lea.vmem %s467_s23, 512  ;;  %s480_s26 = int_to_ptr.vmem [resolvable:$true] %s479_s26 }
  0x1b   : > { %p4308_p12 = pnand %p4961_p9, %p3805_p11  ;;  %p4003_p0 = scmp.ne.s32.totalorder %s467_s23, %s4002_s0 }
  0x1c   : > { %p4010_p3 = scmp.lt.s32.totalorder %s467_s23, %s467_s23  ;;  %p4011_p4 = scmp.lt.s32.totalorder %s4002_s0, %s4002_s0 }
  0x1d   : > { %p3993_p13 = pneg %p4308_p12 }
  0x1e   : > { %p4012_p7 = por %p4011_p4, %p4010_p3 }
  0x1f   : > { %p4005_p1 = pnand %p4003_p0, %p3993_p13 }
  0x21   : > { %p4006_p2 = pneg %p4005_p1 }
  0x23   : > { %p4013_p8 = pnand %p4012_p7, %p4006_p2 }
  0x25   : > { %4016 = shalt.err (!%p4013_p8)
}
  0x26   : > { %s4142_s22 = smov 128   ;;  %s4143_s30 = smov 8  }
  0x27   : > { %3811 = dma.hbm_to_vmem [thread:$0]  (!%p4308_p12), %s4945_s8, 512, %s467_s23, [#allocation10], %s4142_s22, %s4142_s22, %s4143_s30  }
  0x28   : > { %s4028_s24 = scalar_lea.vmem %s442_s18, 16  ;;  %s4035_s27 = scalar_lea.vmem %s442_s18, 32 }
  0x29   : > { %p4029_p11 = scmp.ne.s32.totalorder %s442_s18, %s4028_s24  ;;  %p4036_p9 = scmp.lt.s32.totalorder %s442_s18, %s442_s18 }
  0x2a   : > { %p4037_p3 = scmp.lt.s32.totalorder %s4035_s27, %s4028_s24 }
  0x2b   : > { %p4031_p0 = pnand %p4029_p11, %p3993_p13 }
  0x2c   : > { %p4038_p2 = por %p4037_p3, %p4036_p9 }
  0x2d   : > { %p4032_p1 = pneg %p4031_p0 }
  0x2f   : > { %p4039_p4 = pnand %p4038_p2, %p4032_p1 }
  0x31   : > { %4042 = shalt.err (!%p4039_p4)
}
  0x32   : > { %3808 = dma.hbm_to_vmem [thread:$0]  (!%p4308_p12), %s4939_s2, 16, %s442_s18, [#allocation7]  }
  0x33   : > { %s4054_s20 = scalar_lea.vmem %s480_s26, 512  ;;  %p4062_p0 = scmp.lt.s32.totalorder %s480_s26, %s480_s26 }
  0x34   : > { %p4055_p7 = scmp.ne.s32.totalorder %s480_s26, %s4054_s20  ;;  %p4063_p6 = scmp.lt.s32.totalorder %s4054_s20, %s4054_s20 }
  0x36   : > { %p4057_p8 = pnand %p4055_p7, %p3993_p13  ;;  %p4064_p5 = por %p4063_p6, %p4062_p0 }
  0x38   : > { %p4058_p11 = pneg %p4057_p8 }
  0x3a   : > { %p4065_p9 = pnand %p4064_p5, %p4058_p11 }
  0x3c   : > { %4068 = shalt.err (!%p4065_p9)
}
  0x3d   : > { %3814 = dma.hbm_to_vmem [thread:$0]  (!%p4308_p12), %s4946_s9, 512, %s480_s26, [#allocation10], %s4142_s22, %s4142_s22, %s4143_s30  }
  0x3e   : > { %524 = sbr.rel (%p4300_p10) target bundleno = 3930 (0xf5a), region = 88  ;;  %p4987_p1 = scmp.eq.s32.totalorder (!%p4300_p10), %s4272_s28, 0 }
  0x43   : > { %4112 = dma.done.wait (%p4987_p1), [#allocation7], 16   ;;  %p4988_p13 = pmov %p4987_p1 }
  0x44   : > { %p4989_p3 = pmov %p4987_p1 }
  0x45   : > { %4114 = vsyncadd (%p4988_p13), [#allocation7], 4294967280 }
  0x46   : > { %4116 = dma.done.wait (%p4989_p3), [#allocation10], 1024   ;;  %p4990_p5 = pmov %p4987_p1 }
  0x47   : > { %p584_p6 = scmp.lt.s32.totalorder %s4272_s28, 1  ;;  %s4991_s29 = sld [smem:[#allocation22_spill]]  ;;  %vm591_vm0 = vcmask 261120   ;;  %v644_v16 = vld [vmem:[%s4940_s3 + $0x18] sm:$0xff]  ;;  %v643_v17 = vld [vmem:[%s4940_s3 + $0x10] sm:$0xff]  ;;  %v642_v18 = vld [vmem:[%s4940_s3 + $0x8] sm:$0xff] }
  0x48   : > { %4118 = vsyncadd (%p4990_p5), [#allocation10], 4294966272  ;;  %3600 = vmatprep.subr.mxu1 %v644_v16  ;;  %v641_v19 = vld [vmem:[%s4940_s3] sm:$0xff]  ;;  %s4992_s21 = sld [smem:[#allocation23_spill]]  ;;  %v3421_v29 = vld [vmem:[#allocation6] ss:$0 sm:$0xff] }
  0x49   : > { %s585_s17 = scalar_select %p584_p6, %s4272_s28, 1  ;;  %3601 = vmatpush3.msra.mxu1 %v644_v16  ;;  %vm726_vm1 = vcmask 64512   ;;  %vm1203_vm2 = vcmask 130048   ;;  %vm1716_vm3 = vcmask 195584  }
  0x4a   : > { %3602 = vmatprep.subr.mxu1 %v643_v17  ;;  %s4146_s22 = smov 120   ;;  %s4147_s30 = smov 80  }
  0x4b   : > { %s3492_s26 = sshll.u32 %s585_s17, 4  ;;  %3603 = vmatpush3.msra.mxu1 %v643_v17  ;;  %s4148_s19 = smov 112  }
  0x4c   : > { %3604 = vmatprep.subr.mxu1 %v642_v18  ;;  %s4149_s0 = smov 72   ;;  %s4150_s20 = smov 104  }
  0x4d   : > { %s588_s18 = scalar_lea.vmem %s4991_s29, %s3492_s26  ;;  %3605 = vmatpush3.msra.mxu1 %v642_v18  ;;  %s4144_s29 = smov 88  }
  0x4e   : > { %v589_v0 = vld [vmem:[%s588_s18] sm:$0xff]  ;;  %v590_v1 = vld [vmem:[%s588_s18 + $0x8] sm:$0xff]  ;;  %3606 = vmatprep.subr.mxu1 %v641_v19  ;;  %s4145_s18 = smov 96   ;;  %s4970_s24 = smov 64  }
  0x4f   : > { %592 = vst.msk [vmem:[#allocation2] sm:$0xff] %vm591_vm0, %v589_v0  ;;  %593 = vst.msk [vmem:[#allocation2 + $0x8] sm:$0xff] %vm591_vm0, %v590_v1  ;;  %3607 = vmatpush3.msra.mxu1 %v641_v19  ;;  %v3420_v27 = vld [vmem:[%s4992_s21] ss:$0 sm:$0xff]  ;;  %s4968_s27 = smov 48   ;;  %s4966_s17 = smov 56  }
  0x50   : > { %s4964_s26 = smov 40   ;;  %s4972_s23 = smov 24  }
  0x51   : > { %s4998_s21 = sld [smem:[#allocation24_spill]]  ;;  %p4999_p12 = scmp.ne.s32.totalorder %s4982_s1, 0 }
  0x56   : > { %v4355_v2 = vld [vmem:[#allocation2] sm:$0xff]  ;;  %v4357_v3 = vld [vmem:[#allocation2 + $0x8] sm:$0xff] }
  0x57   : > { %v598_v4 = vsel %vm591_vm0, %v4355_v2, 0.0  ;;  %v601_v5 = vsel %vm591_vm0, %v4357_v3, 0.0 }
  0x58   : > { %599 = vadd.xlane.f32.xlu0 %v598_v4 }
  0x5c   : > { %602 = vadd.xlane.f32.xlu0 %v601_v5 }
  0xe1   : > { %v600_v6 = vpop.xlane.xlu0 %599 }
  0xe2   : > { %v605_v7 = vmul.f32 0.03125, %v600_v6 }
  0xe4   : > { %v607_v8 = vsub.f32 %v4355_v2, %v605_v7 }
  0xe5   : > { %v603_v9 = vpop.xlane.xlu0 %602 }
  0xe6   : > { %v606_v10 = vmul.f32 0.03125, %v603_v9  ;;  %v609_v11 = vmul.f32 %v607_v8, %v607_v8 }
  0xe8   : > { %v608_v12 = vsub.f32 %v4357_v3, %v606_v10  ;;  %v611_v13 = vsel %vm591_vm0, %v609_v11, 0.0 }
  0xe9   : > { %612 = vadd.xlane.f32.xlu1 %v611_v13 }
  0xea   : > { %v610_v14 = vmul.f32 %v608_v12, %v608_v12 }
  0xec   : > { %v614_v15 = vsel %vm591_vm0, %v610_v14, 0.0 }
  0xed   : > { %615 = vadd.xlane.f32.xlu1 %v614_v15 }
 0x172   : > { %v613_v20 = vpop.xlane.xlu1 %612 }
 0x173   : > { %v617_v21 = vmul.f32 0.03125, %v613_v20 }
 0x175   : > { %v619_v22 = vadd.f32 1e-05, %v617_v21 }
 0x176   : > { %v616_v23 = vpop.xlane.xlu1 %615 }
 0x177   : > { %3879 = vrsqrt.f32 %v619_v22  ;;  %v618_v24 = vmul.f32 0.03125, %v616_v23 }
 0x179   : > { %v620_v25 = vadd.f32 1e-05, %v618_v24 }
 0x17b   : > { %3881 = vrsqrt.f32 %v620_v25 }
 0x184   : > { %v3880_v26 = vpop.eup %3879 }
 0x185   : > { %v623_v28 = vmul.f32 %v3880_v26, %v607_v8 }
 0x187   : > { %v631_v30 = vmul.f32 %v3420_v27, %v623_v28 }
 0x188   : > { %v3882_v31 = vpop.eup %3881 }
 0x189   : > { %v624_v32 = vmul.f32 %v3882_v31, %v608_v12  ;;  %v639_v33 = vadd.f32 %v3421_v29, %v631_v30 }
 0x18b   : > { %v632_v34 = vmul.f32 %v3420_v27, %v624_v32  ;;  %3608 = vmatprep.mubr.msk.f32.mxu1 %vm591_vm0, %v639_v33 }
 0x18d   : > { %v640_v35 = vadd.f32 %v3421_v29, %v632_v34 }
 0x18f   : > { %3609 = vmatmul.mubr.msk.f32.vlgmr.msra.gmra.mxu1 %vm591_vm0, %v640_v35 }
 0x24f   : > { %v3610_v36 = vpop.f32.mrf.mxu1 }
 0x250   : > { %759 = vrot.lane.b32.xlu1 %v3610_v36, %s4144_s29  ;;  %733 = vrot.lane.b32.xlu0 %v3610_v36, %s4145_s18  ;;  %728 = vst.msk [vmem:[#allocation3 + $0x8] sm:$0xff] %vm726_vm1, %v3610_v36 }
 0x251   : > { %v4387_v37 = vpop.f32.mrf.mxu1 }
 0x252   : > { %727 = vst.msk [vmem:[#allocation3] sm:$0xff] %vm726_vm1, %v4387_v37 }
 0x254   : > { %749 = vrot.lane.b32.xlu0 %v3610_v36, %s4146_s22  ;;  %731 = vrot.lane.b32.xlu1 %v4387_v37, %s4145_s18 }
 0x257   : > { %v832_v52 = vld [vmem:[#allocation3 + $0x8] sm:$0xff] }
 0x258   : > { %747 = vrot.lane.b32.xlu0 %v4387_v37, %s4146_s22  ;;  %787 = vrot.lane.b32.xlu1 %v3610_v36, %s4147_s30 }
 0x259   : > { %v831_v38 = vld [vmem:[#allocation3] sm:$0xff] }
 0x25a   : > { %3615 = vmatprep.mubr.msk.f32.mxu1 %vm726_vm1, %v831_v38 }
 0x25c   : > { %785 = vrot.lane.b32.xlu0 %v4387_v37, %s4147_s30  ;;  %757 = vrot.lane.b32.xlu1 %v4387_v37, %s4144_s29 }
 0x260   : > { %775 = vrot.lane.b32.xlu0 %v4387_v37, %s4148_s19  ;;  %815 = vrot.lane.b32.xlu1 %v3610_v36, %s4149_s0 }
 0x264   : > { %803 = vrot.lane.b32.xlu0 %v4387_v37, %s4150_s20  ;;  %777 = vrot.lane.b32.xlu1 %v3610_v36, %s4148_s19 }
 0x268   : > { %741 = vrot.lane.b32.xlu0 %v3610_v36, %s4970_s24  ;;  %813 = vrot.lane.b32.xlu1 %v4387_v37, %s4149_s0 }
 0x26c   : > { %796 = vrot.lane.b32.xlu0 %v3610_v36, %s4968_s27  ;;  %805 = vrot.lane.b32.xlu1 %v3610_v36, %s4150_s20 }
 0x270   : > { %768 = vrot.lane.b32.xlu1 %v3610_v36, %s4966_s17 }
 0x274   : > { %824 = vrot.lane.b32.xlu1 %v3610_v36, %s4964_s26 }
 0x278   : > { %739 = vrot.lane.b32.xlu1 %v4387_v37, %s4970_s24  ;;  %s4155_s24 = smov 8  }
 0x27c   : > { %766 = vrot.lane.b32.xlu1 %v4387_v37, %s4966_s17 }
 0x2c2   : > { %v760_v39 = vpop.permute.xlu1 %759  ;;  %v734_v40 = vpop.permute.xlu0 %733 }
 0x2c3   : > { %765 = vst.msk [vmem:[#allocation4 + $0x18] sm:$0xff] %vm726_vm1, %v760_v39  ;;  %738 = vst.msk [vmem:[#allocation4 + $0x8] sm:$0xff] %vm726_vm1, %v734_v40 }
 0x2c6   : > { %v750_v41 = vpop.permute.xlu0 %749  ;;  %v732_v42 = vpop.permute.xlu1 %731 }
 0x2c7   : > { %756 = vst.msk [vmem:[#allocation3 + $0x18] sm:$0xff] %vm726_vm1, %v750_v41  ;;  %737 = vst.msk [vmem:[#allocation4] sm:$0xff] %vm726_vm1, %v732_v42 }
 0x2ca   : > { %v748_v43 = vpop.permute.xlu0 %747  ;;  %v788_v44 = vpop.permute.xlu1 %787  ;;  %v840_v45 = vld [vmem:[#allocation4 + $0x8] sm:$0xff]  ;;  %v842_v49 = vld [vmem:[#allocation4 + $0x18] sm:$0xff] }
 0x2cb   : > { %755 = vst.msk [vmem:[#allocation3 + $0x10] sm:$0xff] %vm726_vm1, %v748_v43  ;;  %793 = vst.msk [vmem:[#allocation4 + $0x28] sm:$0xff] %vm726_vm1, %v788_v44  ;;  %3611 = vmatprep.subr.msk.mxu1 %vm726_vm1, %v840_v45 }
 0x2cc   : > { %3612 = vmatpush3.xpose.msk.msra.mxu1 %vm726_vm1, %v840_v45 }
 0x2ce   : > { %v786_v46 = vpop.permute.xlu0 %785  ;;  %v758_v47 = vpop.permute.xlu1 %757  ;;  %v839_v48 = vld [vmem:[#allocation4] sm:$0xff]  ;;  %v834_v60 = vld [vmem:[#allocation3 + $0x18] sm:$0xff] }
 0x2cf   : > { %792 = vst.msk [vmem:[#allocation4 + $0x20] sm:$0xff] %vm726_vm1, %v786_v46  ;;  %764 = vst.msk [vmem:[#allocation4 + $0x10] sm:$0xff] %vm726_vm1, %v758_v47  ;;  %3613 = vmatprep.subr.msk.mxu1 %vm726_vm1, %v839_v48 }
 0x2d0   : > { %3614 = vmatpush3.xpose.msk.msra.mxu1 %vm726_vm1, %v839_v48 }
 0x2d1   : > { %3618 = vmatprep.subr.msk.mxu1 %vm726_vm1, %v842_v49 }
 0x2d2   : > { %v776_v50 = vpop.permute.xlu0 %775  ;;  %v816_v51 = vpop.permute.xlu1 %815  ;;  %v833_v53 = vld [vmem:[#allocation3 + $0x10] sm:$0xff]  ;;  %v844_v57 = vld [vmem:[#allocation4 + $0x28] sm:$0xff] }
 0x2d3   : > { %783 = vst.msk [vmem:[#allocation3 + $0x20] sm:$0xff] %vm726_vm1, %v776_v50  ;;  %821 = vst.msk [vmem:[#allocation4 + $0x38] sm:$0xff] %vm726_vm1, %v816_v51  ;;  %3616 = vmatmul.mubr.msk.f32.vlgmr.msra.gmra.mxu1 %vm726_vm1, %v832_v52 }
 0x2d4   : > { %3619 = vmatpush3.xpose.msk.msra.mxu1 %vm726_vm1, %v842_v49  ;;  %3622 = vmatprep.mubr.msk.f32.mxu1 %vm726_vm1, %v833_v53 }
 0x2d6   : > { %v804_v54 = vpop.permute.xlu0 %803  ;;  %v778_v55 = vpop.permute.xlu1 %777  ;;  %v841_v56 = vld [vmem:[#allocation4 + $0x10] sm:$0xff]  ;;  %v843_v63 = vld [vmem:[#allocation4 + $0x20] sm:$0xff] }
 0x2d7   : > { %811 = vst.msk [vmem:[#allocation3 + $0x30] sm:$0xff] %vm726_vm1, %v804_v54  ;;  %784 = vst.msk [vmem:[#allocation3 + $0x28] sm:$0xff] %vm726_vm1, %v778_v55  ;;  %3620 = vmatprep.subr.msk.mxu1 %vm726_vm1, %v841_v56 }
 0x2d8   : > { %3621 = vmatpush3.xpose.msk.msra.mxu1 %vm726_vm1, %v841_v56 }
 0x2d9   : > { %3625 = vmatprep.subr.msk.mxu1 %vm726_vm1, %v844_v57 }
 0x2da   : > { %v742_v58 = vpop.permute.xlu0 %741  ;;  %v814_v59 = vpop.permute.xlu1 %813  ;;  %v846_v61 = vld [vmem:[#allocation4 + $0x38] sm:$0xff]  ;;  %v835_v62 = vld [vmem:[#allocation3 + $0x20] sm:$0xff] }
 0x2db   : > { %746 = vst.msk [vmem:[#allocation5 + $0x8] sm:$0xff] %vm726_vm1, %v742_v58  ;;  %820 = vst.msk [vmem:[#allocation4 + $0x30] sm:$0xff] %vm726_vm1, %v814_v59  ;;  %3623 = vmatmul.mubr.msk.f32.vlgmr.msra.gmra.mxu1 %vm726_vm1, %v834_v60  ;;  %3632 = vmatprep.subr.msk.mxu0 %vm726_vm1, %v846_v61 }
 0x2dc   : > { %3626 = vmatpush3.xpose.msk.msra.mxu1 %vm726_vm1, %v844_v57  ;;  %3629 = vmatprep.mubr.msk.f32.mxu1 %vm726_vm1, %v835_v62 }
 0x2dd   : > { %3633 = vmatpush3.xpose.msk.msra.mxu0 %vm726_vm1, %v846_v61  ;;  %3627 = vmatprep.subr.msk.mxu1 %vm726_vm1, %v843_v63 }
 0x2de   : > { %v797_v0 = vpop.permute.xlu0 %796  ;;  %v806_v1 = vpop.permute.xlu1 %805  ;;  %v837_v4 = vld [vmem:[#allocation3 + $0x30] sm:$0xff]  ;;  %v836_v6 = vld [vmem:[#allocation3 + $0x28] sm:$0xff] }
 0x2df   : > { %802 = vst.msk [vmem:[#allocation5 + $0x28] sm:$0xff] %vm726_vm1, %v797_v0  ;;  %812 = vst.msk [vmem:[#allocation3 + $0x38] sm:$0xff] %vm726_vm1, %v806_v1  ;;  %3636 = vmatprep.mubr.msk.f32.mxu0 %vm726_vm1, %v837_v4 }
 0x2e0   : > { %3628 = vmatpush3.xpose.msk.msra.mxu1 %vm726_vm1, %v843_v63 }
 0x2e2   : > { %v769_v5 = vpop.permute.xlu1 %768  ;;  %v845_v7 = vld [vmem:[#allocation4 + $0x30] sm:$0xff]  ;;  %v848_v8 = vld [vmem:[#allocation5 + $0x8] sm:$0xff] }
 0x2e3   : > { %774 = vst.msk [vmem:[#allocation5 + $0x18] sm:$0xff] %vm726_vm1, %v769_v5  ;;  %3630 = vmatmul.mubr.msk.f32.vlgmr.msra.gmra.mxu1 %vm726_vm1, %v836_v6  ;;  %3634 = vmatprep.subr.msk.mxu0 %vm726_vm1, %v845_v7 }
 0x2e4   : > { %3639 = vmatprep.subr.mxu1 %v848_v8  ;;  %3635 = vmatpush3.xpose.msk.msra.mxu0 %vm726_vm1, %v845_v7 }
 0x2e5   : > { %3640 = vmatpush3.msra.mxu1 %v848_v8 }
 0x2e6   : > { %v825_v9 = vpop.permute.xlu1 %824  ;;  %v838_v10 = vld [vmem:[#allocation3 + $0x38] sm:$0xff]  ;;  %v852_v11 = vld [vmem:[#allocation5 + $0x28] sm:$0xff] }
 0x2e7   : > { %830 = vst.msk [vmem:[#allocation5 + $0x38] sm:$0xff] %vm726_vm1, %v825_v9  ;;  %3637 = vmatmul.mubr.msk.f32.vlgmr.msra.gmra.mxu0 %vm726_vm1, %v838_v10  ;;  %3653 = vmatprep.subr.mxu0 %v852_v11 }
 0x2e8   : > { %3654 = vmatpush3.msra.mxu0 %v852_v11 }
 0x2ea   : > { %v740_v12 = vpop.permute.xlu1 %739  ;;  %v850_v15 = vld [vmem:[#allocation5 + $0x18] sm:$0xff] }
 0x2eb   : > { %745 = vst.msk [vmem:[#allocation5] sm:$0xff] %vm726_vm1, %v740_v12 }
 0x2ee   : > { %v767_v13 = vpop.permute.xlu1 %766  ;;  %v854_v45 = vld [vmem:[#allocation5 + $0x38] sm:$0xff] }
 0x2ef   : > { %773 = vst.msk [vmem:[#allocation5 + $0x10] sm:$0xff] %vm726_vm1, %v767_v13 }
 0x2f2   : > { %v847_v14 = vld [vmem:[#allocation5] sm:$0xff] }
 0x2f3   : > { %3641 = vmatprep.subr.mxu1 %v847_v14 }
 0x2f4   : > { %3642 = vmatpush3.msra.mxu1 %v847_v14 }
 0x2f5   : > { %3646 = vmatprep.subr.mxu1 %v850_v15 }
 0x2f6   : > { %v849_v42 = vld [vmem:[#allocation5 + $0x10] sm:$0xff] }
 0x393   : > { %v3617_v16 = vpop.f32.mrf.mxu1 }
 0x394   : > { %v1207_v17 = vsel %vm1203_vm2, %v3617_v16, -inf }
 0x395   : > { %1208 = vmax.xlane.f32.xlu1 %v1207_v17  ;;  %v933_v18 = vpop.f32.mrf.mxu1 }
 0x396   : > { %v1204_v19 = vsel %vm1203_vm2, %v933_v18, -inf }
 0x397   : > { %1205 = vmax.xlane.f32.xlu0 %v1204_v19 }
 0x39b   : > { %v3624_v20 = vpop.f32.mrf.mxu1 }
 0x39c   : > { %v1213_v28 = vsel %vm1203_vm2, %v3624_v20, -inf }
 0x39d   : > { %v1020_v21 = vpop.f32.mrf.mxu1 }
 0x39e   : > { %v1210_v29 = vsel %vm1203_vm2, %v1020_v21, -inf }
 0x3a3   : > { %v3631_v24 = vpop.f32.mrf.mxu1 }
 0x3a4   : > { %v1219_v27 = vsel %vm1203_vm2, %v3631_v24, -inf }
 0x3a5   : > { %v1107_v30 = vpop.f32.mrf.mxu1 }
 0x3a6   : > { %v1216_v31 = vsel %vm1203_vm2, %v1107_v30, -inf }
 0x3a7   : > { %v3638_v22 = vpop.f32.mrf.mxu0 }
 0x3a8   : > { %v1225_v23 = vsel %vm1203_vm2, %v3638_v22, -inf }
 0x3a9   : > { %v1194_v25 = vpop.f32.mrf.mxu0  ;;  %1226 = vmax.xlane.f32.xlu1 %v1225_v23 }
 0x3aa   : > { %v1222_v26 = vsel %vm1203_vm2, %v1194_v25, -inf }
 0x3ab   : > { %1223 = vmax.xlane.f32.xlu0 %v1222_v26 }
 0x3ad   : > { %1220 = vmax.xlane.f32.xlu1 %v1219_v27 }
 0x3af   : > { %1214 = vmax.xlane.f32.xlu0 %v1213_v28 }
 0x3b3   : > { %1211 = vmax.xlane.f32.xlu0 %v1210_v29 }
 0x3b7   : > { %1217 = vmax.xlane.f32.xlu0 %v1216_v31 }
 0x3be   : > { %822 = vrot.lane.b32.xlu1 %v4387_v37, %s4964_s26 }
 0x3cd   : > { %794 = vrot.lane.b32.xlu0 %v4387_v37, %s4968_s27  ;;  %s4156_s27 = smov 16  }
 0x41e   : > { %v4474_v32 = vpop.xlane.xlu1 %1208 }
 0x41f   : > { %v1253_v33 = vsub.f32 %v3617_v16, %v4474_v32  ;;  %v1229_v16 = vsub.f32 -inf, %v4474_v32 }
 0x420   : > { %v4477_v34 = vpop.xlane.xlu0 %1205 }
 0x421   : > { %v1252_v35 = vsub.f32 %v933_v18, %v4477_v34  ;;  %v1262_v36 = vmul.f32 1.442695, %v1253_v33  ;;  %v1238_v17 = vmul.f32 1.442695, %v1229_v16  ;;  %v1228_v18 = vsub.f32 -inf, %v4477_v34 }
 0x423   : > { %v1260_v38 = vmul.f32 1.442695, %v1252_v35  ;;  %v1236_v19 = vmul.f32 1.442695, %v1228_v18 }
 0x425   : > { %3883 = vpow2.f32 %v1260_v38 }
 0x426   : > { %3885 = vpow2.f32 %v1262_v36 }
 0x432   : > { %v4480_v39 = vpop.xlane.xlu1 %1226  ;;  %v4482_v40 = vpop.eup %3883 }
 0x433   : > { %v3886_v41 = vpop.eup %3885  ;;  %3643 = vmatprep.mubr.msk.f32.mxu1 %vm1203_vm2, %v4482_v40  ;;  %v1259_v44 = vsub.f32 %v3638_v22, %v4480_v39 }
 0x434   : > { %v4486_v37 = vpop.xlane.xlu0 %1223  ;;  %3644 = vmatmul.mubr.msk.f32.vlgmr.msra.gmra.mxu1 %vm1203_vm2, %v3886_v41  ;;  %v1287_v11 = vsel %vm1203_vm2, %v3886_v41, 0.0 }
 0x435   : > { %3647 = vmatpush3.msra.mxu1 %v850_v15  ;;  %v1274_v50 = vmul.f32 1.442695, %v1259_v44  ;;  %v1258_v51 = vsub.f32 %v1194_v25, %v4486_v37  ;;  %v1284_v15 = vsel %vm1203_vm2, %v4482_v40, 0.0  ;;  %v1234_v32 = vsub.f32 -inf, %v4486_v37 }
 0x436   : > { %v4489_v43 = vpop.xlane.xlu1 %1220  ;;  %3648 = vmatprep.subr.mxu1 %v849_v42 }
 0x437   : > { %3649 = vmatpush3.msra.mxu1 %v849_v42  ;;  %v1257_v53 = vsub.f32 %v3631_v24, %v4489_v43  ;;  %v1272_v56 = vmul.f32 1.442695, %v1258_v51  ;;  %v1233_v31 = vsub.f32 -inf, %v4489_v43  ;;  %v1248_v38 = vmul.f32 1.442695, %v1234_v32  ;;  %v1720_v32 = vld [vmem:[%s4941_s4 + $0x8] sm:$0xff] }
 0x438   : > { %v4492_v46 = vpop.xlane.xlu0 %1214  ;;  %3660 = vmatprep.subr.mxu1 %v854_v45  ;;  %v1235_v42 = vsub.f32 -inf, %v4480_v39 }
 0x439   : > { %v1255_v47 = vsub.f32 %v3624_v20, %v4492_v46  ;;  %v1270_v58 = vmul.f32 1.442695, %v1257_v53  ;;  %v1231_v24 = vsub.f32 -inf, %v4492_v46  ;;  %v1246_v35 = vmul.f32 1.442695, %v1233_v31 }
 0x43a   : > { %v823_v48 = vpop.permute.xlu1 %822 }
 0x43b   : > { %v1266_v49 = vmul.f32 1.442695, %v1255_v47  ;;  %829 = vst.msk [vmem:[#allocation5 + $0x30] sm:$0xff] %vm726_vm1, %v823_v48  ;;  %v1250_v47 = vmul.f32 1.442695, %v1235_v42 }
 0x43c   : > { %v4497_v52 = vpop.xlane.xlu0 %1211 }
 0x43d   : > { %v1254_v54 = vsub.f32 %v1020_v21, %v4497_v52  ;;  %3887 = vpow2.f32 %v1266_v49  ;;  %v1230_v26 = vsub.f32 -inf, %v4497_v52 }
 0x43e   : > { %3889 = vpow2.f32 %v1274_v50 }
 0x43f   : > { %v1264_v55 = vmul.f32 1.442695, %v1254_v54  ;;  %v1240_v33 = vmul.f32 1.442695, %v1230_v26 }
 0x440   : > { %v4501_v57 = vpop.xlane.xlu0 %1217 }
 0x441   : > { %v1256_v59 = vsub.f32 %v1107_v30, %v4501_v57  ;;  %3891 = vpow2.f32 %v1264_v55  ;;  %v1242_v30 = vmul.f32 1.442695, %v1231_v24  ;;  %v1232_v36 = vsub.f32 -inf, %v4501_v57  ;;  %v1722_v24 = vld [vmem:[%s4941_s4 + $0x18] sm:$0xff] }
 0x442   : > { %3893 = vpow2.f32 %v1272_v56  ;;  %v853_v9 = vld [vmem:[#allocation5 + $0x30] sm:$0xff] }
 0x443   : > { %v1268_v60 = vmul.f32 1.442695, %v1256_v59  ;;  %3895 = vpow2.f32 %v1270_v58  ;;  %v1244_v44 = vmul.f32 1.442695, %v1232_v36 }
 0x444   : > { %v795_v61 = vpop.permute.xlu0 %794 }
 0x445   : > { %801 = vst.msk [vmem:[#allocation5 + $0x20] sm:$0xff] %vm726_vm1, %v795_v61  ;;  %3897 = vpow2.f32 %v1268_v60 }
 0x446   : > { %3899 = vpow2.f32 %v1238_v17 }
 0x447   : > { %3901 = vpow2.f32 %v1236_v19 }
 0x44a   : > { %v3888_v62 = vpop.eup %3887 }
 0x44b   : > { %v1293_v63 = vsel %vm1203_vm2, %v3888_v62, 0.0  ;;  %v3890_v1 = vpop.eup %3889 }
 0x44c   : > { %v851_v0 = vld [vmem:[#allocation5 + $0x20] sm:$0xff]  ;;  %1294 = vadd.xlane.f32.xlu1 %v1293_v63  ;;  %v1305_v5 = vsel %vm1203_vm2, %v3890_v1, 0.0 }
 0x44d   : > { %3655 = vmatprep.subr.mxu0 %v851_v0 }
 0x44e   : > { %3656 = vmatpush3.msra.mxu0 %v851_v0  ;;  %v3892_v4 = vpop.eup %3891 }
 0x44f   : > { %3650 = vmatprep.mubr.msk.f32.mxu1 %vm1203_vm2, %v3892_v4  ;;  %v1290_v6 = vsel %vm1203_vm2, %v3892_v4, 0.0  ;;  %v3894_v7 = vpop.eup %3893  ;;  %3667 = vmatprep.subr.mxu0 %v1722_v24 }
 0x450   : > { %3651 = vmatmul.mubr.msk.f32.vlgmr.msra.gmra.mxu1 %vm1203_vm2, %v3888_v62  ;;  %1306 = vadd.xlane.f32.xlu1 %v1305_v5  ;;  %v3896_v8 = vpop.eup %3895  ;;  %v1302_v14 = vsel %vm1203_vm2, %v3894_v7, 0.0 }
 0x451   : > { %3661 = vmatpush3.msra.mxu1 %v854_v45  ;;  %1291 = vadd.xlane.f32.xlu0 %v1290_v6  ;;  %v1299_v12 = vsel %vm1203_vm2, %v3896_v8, 0.0 }
 0x452   : > { %v3898_v10 = vpop.eup %3897  ;;  %3662 = vmatprep.subr.mxu1 %v853_v9  ;;  %3664 = vmatprep.mubr.msk.f32.mxu1 %vm1203_vm2, %v3894_v7 }
 0x453   : > { %3663 = vmatpush3.msra.mxu1 %v853_v9  ;;  %3657 = vmatprep.mubr.msk.f32.mxu0 %vm1203_vm2, %v3898_v10  ;;  %v1296_v13 = vsel %vm1203_vm2, %v3898_v10, 0.0  ;;  %v3900_v21 = vpop.eup %3899 }
 0x454   : > { %1288 = vadd.xlane.f32.xlu1 %v1287_v11  ;;  %3665 = vmatmul.mubr.msk.f32.vlgmr.msra.gmra.mxu1 %vm1203_vm2, %v3890_v1  ;;  %v1277_v25 = vmul.f32 0.0, %v3900_v21  ;;  %v3902_v40 = vpop.eup %3901 }
 0x455   : > { %1300 = vadd.xlane.f32.xlu0 %v1299_v12  ;;  %3658 = vmatmul.mubr.msk.f32.vlgmr.msra.gmra.mxu0 %vm1203_vm2, %v3896_v8  ;;  %v1276_v45 = vmul.f32 0.0, %v3902_v40 }
 0x456   : > { %3668 = vmatpush3.msra.mxu0 %v1722_v24 }
 0x459   : > { %1297 = vadd.xlane.f32.xlu0 %v1296_v13 }
 0x45d   : > { %1303 = vadd.xlane.f32.xlu0 %v1302_v14 }
 0x461   : > { %1285 = vadd.xlane.f32.xlu0 %v1284_v15 }
 0x4d5   : > { %v1295_v20 = vpop.xlane.xlu1 %1294 }
 0x4d9   : > { %v4522_v22 = vpop.xlane.xlu1 %1306 }
 0x4da   : > { %v1292_v23 = vpop.xlane.xlu0 %1291 }
 0x4dd   : > { %v1289_v27 = vpop.xlane.xlu1 %1288 }
 0x4de   : > { %v1309_v28 = vadd.f32 %v1289_v27, %v1277_v25  ;;  %v1301_v29 = vpop.xlane.xlu0 %1300 }
 0x4e0   : > { %3903 = vrcp.f32 %v1309_v28 }
 0x4e1   : > { %3905 = vpow2.f32 %v1242_v30 }
 0x4e2   : > { %v1298_v34 = vpop.xlane.xlu0 %1297  ;;  %3907 = vpow2.f32 %v1240_v33 }
 0x4e3   : > { %3909 = vpow2.f32 %v1246_v35 }
 0x4e4   : > { %3911 = vpow2.f32 %v1248_v38 }
 0x4e5   : > { %3913 = vpow2.f32 %v1244_v44  ;;  %v1719_v44 = vld [vmem:[%s4941_s4] sm:$0xff] }
 0x4e6   : > { %v1304_v41 = vpop.xlane.xlu0 %1303 }
 0x4ea   : > { %v1286_v43 = vpop.xlane.xlu0 %1285 }
 0x4eb   : > { %v1308_v46 = vadd.f32 %v1286_v43, %v1276_v45 }
 0x4ed   : > { %v3904_v37 = vpop.eup %3903  ;;  %3915 = vrcp.f32 %v1308_v46 }
 0x4ee   : > { %v1657_v48 = vmul.f32 %v3904_v37, %v1309_v28  ;;  %v3906_v49 = vpop.eup %3905  ;;  %3917 = vpow2.f32 %v1250_v47 }
 0x4ef   : > { %v3908_v51 = vpop.eup %3907  ;;  %v1279_v52 = vmul.f32 0.0, %v3906_v49 }
 0x4f0   : > { %v1665_v50 = vsub.f32 2.0, %v1657_v48  ;;  %v3910_v54 = vpop.eup %3909  ;;  %v1278_v39 = vmul.f32 0.0, %v3908_v51 }
 0x4f1   : > { %v1311_v55 = vadd.f32 %v1295_v20, %v1279_v52  ;;  %v3912_v58 = vpop.eup %3911  ;;  %v1281_v63 = vmul.f32 0.0, %v3910_v54 }
 0x4f2   : > { %v1673_v57 = vmul.f32 %v3904_v37, %v1665_v50  ;;  %v1310_v60 = vadd.f32 %v1292_v23, %v1278_v39  ;;  %v3914_v0 = vpop.eup %3913  ;;  %v4532_v1 = vmul.f32 0.0, %v3912_v58 }
 0x4f3   : > { %3919 = vrcp.f32 %v1311_v55  ;;  %v1313_v5 = vadd.f32 %v1301_v29, %v1281_v63  ;;  %v1280_v8 = vmul.f32 0.0, %v3914_v0 }
 0x4f4   : > { %v3645_v53 = vpop.f32.mrf.mxu1  ;;  %3921 = vrcp.f32 %v1310_v60  ;;  %v1314_v6 = vadd.f32 %v1304_v41, %v4532_v1 }
 0x4f5   : > { %v1641_v56 = vadd.f32 %v3645_v53, %v1277_v25  ;;  %3923 = vrcp.f32 %v1313_v5  ;;  %v1312_v11 = vadd.f32 %v1298_v34, %v1280_v8  ;;  %v1721_v25 = vld [vmem:[%s4941_s4 + $0x10] sm:$0xff] }
 0x4f6   : > { %v1388_v59 = vpop.f32.mrf.mxu1  ;;  %3925 = vrcp.f32 %v1314_v6  ;;  %3669 = vmatprep.subr.mxu0 %v1721_v25 }
 0x4f7   : > { %v4530_v61 = vmul.f32 %v1673_v57, %v1641_v56  ;;  %v1640_v62 = vadd.f32 %v1388_v59, %v1276_v45  ;;  %3927 = vrcp.f32 %v1312_v11  ;;  %3670 = vmatpush3.msra.mxu0 %v1721_v25 }
 0x4f8   : > { %3671 = vmatprep.subr.mxu0 %v1720_v32 }
 0x4f9   : > { %3672 = vmatpush3.msra.mxu0 %v1720_v32  ;;  %v1865_v32 = vld [vmem:[#allocation9 + $0x10] sm:$0xff] }
 0x4fa   : > { %v3916_v4 = vpop.eup %3915  ;;  %3673 = vmatprep.subr.mxu0 %v1719_v44 }
 0x4fb   : > { %v1656_v7 = vmul.f32 %v3916_v4, %v1308_v46  ;;  %v3918_v9 = vpop.eup %3917  ;;  %3674 = vmatpush3.msra.mxu0 %v1719_v44 }
 0x4fc   : > { %v1283_v13 = vmul.f32 0.0, %v3918_v9 }
 0x4fd   : > { %v1664_v10 = vsub.f32 2.0, %v1656_v7 }
 0x4fe   : > { %v1315_v15 = vadd.f32 %v4522_v22, %v1283_v13 }
 0x4ff   : > { %v1672_v12 = vmul.f32 %v3916_v4, %v1664_v10 }
 0x500   : > { %v3920_v16 = vpop.eup %3919  ;;  %3929 = vrcp.f32 %v1315_v15 }
 0x501   : > { %v4535_v14 = vmul.f32 %v1672_v12, %v1640_v62  ;;  %v3922_v17 = vpop.eup %3921  ;;  %v1659_v18 = vmul.f32 %v3920_v16, %v1311_v55 }
 0x502   : > { %v3924_v19 = vpop.eup %3923  ;;  %v1658_v20 = vmul.f32 %v3922_v17, %v1310_v60 }
 0x503   : > { %v3926_v21 = vpop.eup %3925  ;;  %v1667_v23 = vsub.f32 2.0, %v1659_v18  ;;  %v1661_v26 = vmul.f32 %v3924_v19, %v1313_v5 }
 0x504   : > { %v3928_v22 = vpop.eup %3927  ;;  %v1666_v27 = vsub.f32 2.0, %v1658_v20  ;;  %v1662_v28 = vmul.f32 %v3926_v21, %v1314_v6 }
 0x505   : > { %v1675_v31 = vmul.f32 %v3920_v16, %v1667_v23  ;;  %v1669_v33 = vsub.f32 2.0, %v1661_v26  ;;  %v1660_v34 = vmul.f32 %v3928_v22, %v1312_v11 }
 0x506   : > { %v1670_v38 = vsub.f32 2.0, %v1662_v28  ;;  %v1674_v42 = vmul.f32 %v3922_v17, %v1666_v27 }
 0x507   : > { %v1668_v37 = vsub.f32 2.0, %v1660_v34  ;;  %v1677_v49 = vmul.f32 %v3924_v19, %v1669_v33  ;;  %v1864_v33 = vld [vmem:[#allocation9 + $0x8] sm:$0xff]  ;;  %v1863_v34 = vld [vmem:[#allocation9] sm:$0xff] }
 0x508   : > { %v1678_v53 = vmul.f32 %v3926_v21, %v1670_v38 }
 0x509   : > { %v1676_v57 = vmul.f32 %v3928_v22, %v1668_v37 }
 0x50d   : > { %v3930_v36 = vpop.eup %3929 }
 0x50e   : > { %v1663_v47 = vmul.f32 %v3930_v36, %v1315_v15 }
 0x510   : > { %v3652_v29 = vpop.f32.mrf.mxu1  ;;  %v1671_v56 = vsub.f32 2.0, %v1663_v47 }
 0x511   : > { %v1643_v30 = vadd.f32 %v3652_v29, %v1279_v52 }
 0x512   : > { %v1469_v35 = vpop.f32.mrf.mxu1  ;;  %v1679_v60 = vmul.f32 %v3930_v36, %v1671_v56 }
 0x513   : > { %v1683_v40 = vmul.f32 %v1675_v31, %v1643_v30  ;;  %v1642_v41 = vadd.f32 %v1469_v35, %v1278_v39  ;;  %v1866_v31 = vld [vmem:[#allocation9 + $0x18] sm:$0xff] }
 0x514   : > { %v3666_v45 = vpop.f32.mrf.mxu1  ;;  %3678 = vmatprep.subr.mxu1 %v1866_v31 }
 0x515   : > { %v1682_v43 = vmul.f32 %v1674_v42, %v1642_v41  ;;  %v3659_v46 = vpop.f32.mrf.mxu0  ;;  %1692 = vrot.lane.b32.xlu1 %v1683_v40, %s4155_s24  ;;  %v1647_v58 = vadd.f32 %v3666_v45, %v1283_v13  ;;  %v3448_v13 = vld [vmem:[%s4942_s5] ss:$0 sm:$0xff]  ;;  %3679 = vmatpush3.msra.mxu1 %v1866_v31 }
 0x516   : > { %v1645_v48 = vadd.f32 %v3659_v46, %v1281_v63  ;;  %v1631_v50 = vpop.f32.mrf.mxu1  ;;  %3680 = vmatprep.subr.mxu1 %v1865_v32  ;;  %v3451_v45 = vld [vmem:[%s4943_s6] ss:$0 sm:$0xff] }
 0x517   : > { %v1550_v51 = vpop.f32.mrf.mxu0  ;;  %v1646_v52 = vadd.f32 %v1631_v50, %v4532_v1  ;;  %1690 = vrot.lane.b32.xlu0 %v1682_v43, %s4155_s24  ;;  %v1687_v62 = vmul.f32 %v1679_v60, %v1647_v58  ;;  %3681 = vmatpush3.msra.mxu1 %v1865_v32  ;;  %v3452_v46 = vld [vmem:[%s4944_s7] ss:$0 sm:$0xff] }
 0x518   : > { %v1685_v54 = vmul.f32 %v1677_v49, %v1645_v48  ;;  %v1644_v55 = vadd.f32 %v1550_v51, %v1280_v8  ;;  %3682 = vmatprep.subr.mxu1 %v1864_v33 }
 0x519   : > { %v1686_v39 = vmul.f32 %v1678_v53, %v1646_v52  ;;  %3683 = vmatpush3.msra.mxu1 %v1864_v33 }
 0x51a   : > { %1700 = vrot.lane.b32.xlu1 %v1685_v54, %s4156_s27  ;;  %v1684_v59 = vmul.f32 %v1676_v57, %v1644_v55  ;;  %3684 = vmatprep.subr.mxu1 %v1863_v34 }
 0x51b   : > { %1706 = vrot.lane.b32.xlu0 %v1686_v39, %s4972_s23  ;;  %3685 = vmatpush3.msra.mxu1 %v1863_v34 }
 0x51e   : > { %1698 = vrot.lane.b32.xlu1 %v1684_v59, %s4156_s27 }
 0x522   : > { %1708 = vrot.lane.b32.xlu1 %v1687_v62, %s4972_s23  ;;  %s4993_s23 = smov 64  }
 0x587   : > { %v1693_v63 = vpop.permute.xlu1 %1692 }
 0x588   : > { %v1713_v9 = vsel %vm726_vm1, %v4530_v61, %v1693_v63 }
 0x589   : > { %v1691_v0 = vpop.permute.xlu0 %1690 }
 0x58a   : > { %v1712_v4 = vsel %vm726_vm1, %v4535_v14, %v1691_v0 }
 0x58c   : > { %v1701_v1 = vpop.permute.xlu1 %1700 }
 0x58d   : > { %v1707_v6 = vpop.permute.xlu0 %1706  ;;  %v1715_v10 = vsel %vm1203_vm2, %v1713_v9, %v1701_v1 }
 0x590   : > { %v1699_v5 = vpop.permute.xlu1 %1698 }
 0x591   : > { %v1714_v7 = vsel %vm1203_vm2, %v1712_v4, %v1699_v5 }
 0x592   : > { %v1717_v8 = vsel %vm1716_vm3, %v1714_v7, %v1707_v6 }
 0x593   : > { %3675 = vmatprep.mubr.msk.f32.mxu0 %vm591_vm0, %v1717_v8 }
 0x594   : > { %v1709_v11 = vpop.permute.xlu1 %1708 }
 0x595   : > { %v1718_v12 = vsel %vm1716_vm3, %v1715_v10, %v1709_v11 }
 0x596   : > { %3676 = vmatmul.mubr.msk.f32.vlgmr.msra.gmra.mxu0 %vm591_vm0, %v1718_v12 }
 0x656   : > { %v3677_v14 = vpop.f32.mrf.mxu0 }
 0x657   : > { %v1808_v15 = vadd.f32 %v3677_v14, %v3448_v13 }
 0x658   : > { %v1802_v16 = vpop.f32.mrf.mxu0 }
 0x659   : > { %v1814_v17 = vadd.f32 %v1808_v15, %v4357_v3  ;;  %v1803_v18 = vadd.f32 %v3448_v13, %v1802_v16 }
 0x65b   : > { %1816 = vst.msk [vmem:[#allocation2 + $0x8] sm:$0xff] %vm591_vm0, %v1814_v17  ;;  %v1813_v61 = vadd.f32 %v1803_v18, %v4355_v2 }
 0x65d   : > { %1815 = vst.msk [vmem:[#allocation2] sm:$0xff] %vm591_vm0, %v1813_v61 }
 0x662   : > { %v4574_v19 = vld [vmem:[#allocation2 + $0x8] sm:$0xff] }
 0x663   : > { %v1824_v20 = vsel %vm591_vm0, %v4574_v19, 0.0 }
 0x664   : > { %1825 = vadd.xlane.f32.xlu1 %v1824_v20  ;;  %v4578_v21 = vld [vmem:[#allocation2] sm:$0xff] }
 0x665   : > { %v1821_v23 = vsel %vm591_vm0, %v4578_v21, 0.0 }
 0x666   : > { %1822 = vadd.xlane.f32.xlu0 %v1821_v23 }
 0x6ed   : > { %v1826_v3 = vpop.xlane.xlu1 %1825 }
 0x6ee   : > { %v1828_v24 = vmul.f32 0.03125, %v1826_v3 }
 0x6ef   : > { %v1823_v25 = vpop.xlane.xlu0 %1822 }
 0x6f0   : > { %v1827_v26 = vmul.f32 0.03125, %v1823_v25  ;;  %v1830_v2 = vsub.f32 %v4574_v19, %v1828_v24 }
 0x6f2   : > { %v1829_v22 = vsub.f32 %v4578_v21, %v1827_v26  ;;  %v1832_v29 = vmul.f32 %v1830_v2, %v1830_v2 }
 0x6f4   : > { %v1831_v27 = vmul.f32 %v1829_v22, %v1829_v22  ;;  %v1836_v30 = vsel %vm591_vm0, %v1832_v29, 0.0 }
 0x6f6   : > { %v1833_v28 = vsel %vm591_vm0, %v1831_v27, 0.0 }
 0x6f7   : > { %1834 = vadd.xlane.f32.xlu0 %v1833_v28 }
 0x6fb   : > { %1837 = vadd.xlane.f32.xlu0 %v1836_v30 }
 0x780   : > { %v1835_v35 = vpop.xlane.xlu0 %1834 }
 0x781   : > { %v1839_v36 = vmul.f32 0.03125, %v1835_v35 }
 0x783   : > { %v1841_v38 = vadd.f32 1e-05, %v1839_v36 }
 0x784   : > { %v1838_v40 = vpop.xlane.xlu0 %1837 }
 0x785   : > { %3931 = vrsqrt.f32 %v1841_v38  ;;  %v1840_v41 = vmul.f32 0.03125, %v1838_v40 }
 0x787   : > { %v1842_v42 = vadd.f32 1e-05, %v1840_v41 }
 0x789   : > { %3933 = vrsqrt.f32 %v1842_v42 }
 0x792   : > { %v3932_v44 = vpop.eup %3931 }
 0x793   : > { %v1845_v43 = vmul.f32 %v3932_v44, %v1829_v22 }
 0x795   : > { %v1853_v47 = vmul.f32 %v3451_v45, %v1845_v43 }
 0x796   : > { %v3934_v37 = vpop.eup %3933 }
 0x797   : > { %v1846_v48 = vmul.f32 %v3934_v37, %v1830_v2  ;;  %v1861_v49 = vadd.f32 %v3452_v46, %v1853_v47 }
 0x799   : > { %v1854_v50 = vmul.f32 %v3451_v45, %v1846_v48  ;;  %3686 = vmatprep.mubr.msk.f32.mxu1 %vm591_vm0, %v1861_v49 }
 0x79b   : > { %v1862_v51 = vadd.f32 %v3452_v46, %v1854_v50 }
 0x79d   : > { %3687 = vmatmul.mubr.msk.f32.vlgmr.msra.gmra.mxu1 %vm591_vm0, %v1862_v51 }
 0x85d   : > { %v3688_v52 = vpop.f32.mrf.mxu1 }
 0x85e   : > { %1949 = vst.msk [vmem:[#allocation3 + $0x8] sm:$0xff] %vm726_vm1, %v3688_v52  ;;  %1978 = vrot.lane.b32.xlu1 %v3688_v52, %s4144_s29  ;;  %1954 = vrot.lane.b32.xlu0 %v3688_v52, %s4145_s18 }
 0x85f   : > { %v4597_v53 = vpop.f32.mrf.mxu1 }
 0x860   : > { %1948 = vst.msk [vmem:[#allocation3] sm:$0xff] %vm726_vm1, %v4597_v53 }
 0x862   : > { %1970 = vrot.lane.b32.xlu1 %v3688_v52, %s4146_s22  ;;  %2002 = vrot.lane.b32.xlu0 %v3688_v52, %s4147_s30 }
 0x865   : > { %v2041_v11 = vld [vmem:[#allocation3 + $0x8] sm:$0xff] }
 0x866   : > { %1994 = vrot.lane.b32.xlu1 %v3688_v52, %s4148_s19  ;;  %2026 = vrot.lane.b32.xlu0 %v3688_v52, %s4149_s0 }
 0x867   : > { %v2040_v54 = vld [vmem:[#allocation3] sm:$0xff] }
 0x868   : > { %3693 = vmatprep.mubr.msk.f32.mxu0 %vm726_vm1, %v2040_v54 }
 0x86a   : > { %2000 = vrot.lane.b32.xlu0 %v4597_v53, %s4147_s30  ;;  %1952 = vrot.lane.b32.xlu1 %v4597_v53, %s4145_s18  ;;  %s4994_s30 = smov 48   ;;  %s4995_s18 = smov 56  }
 0x86e   : > { %1992 = vrot.lane.b32.xlu0 %v4597_v53, %s4148_s19  ;;  %1976 = vrot.lane.b32.xlu1 %v4597_v53, %s4144_s29  ;;  %s4996_s19 = smov 40   ;;  %s4997_s29 = smov 24  }
 0x872   : > { %2016 = vrot.lane.b32.xlu0 %v4597_v53, %s4150_s20  ;;  %1968 = vrot.lane.b32.xlu1 %v4597_v53, %s4146_s22  ;;  %s3493_s22 = sshll.u32 %s4272_s28, 8 }
 0x873   : > { %s4890_s17 = scalar_lea.hbm %s4998_s21, %s3493_s22 }
 0x876   : > { %1962 = vrot.lane.b32.xlu0 %v3688_v52, %s4993_s23  ;;  %2024 = vrot.lane.b32.xlu1 %v4597_v53, %s4149_s0 }
 0x87a   : > { %2010 = vrot.lane.b32.xlu0 %v3688_v52, %s4994_s30  ;;  %2018 = vrot.lane.b32.xlu1 %v3688_v52, %s4150_s20 }
 0x87e   : > { %1986 = vrot.lane.b32.xlu1 %v3688_v52, %s4995_s18 }
 0x882   : > { %2034 = vrot.lane.b32.xlu1 %v3688_v52, %s4996_s19 }
 0x886   : > { %1960 = vrot.lane.b32.xlu1 %v4597_v53, %s4993_s23 }
 0x88a   : > { %1984 = vrot.lane.b32.xlu1 %v4597_v53, %s4995_s18 }
 0x8d0   : > { %v1979_v55 = vpop.permute.xlu1 %1978  ;;  %v1955_v39 = vpop.permute.xlu0 %1954 }
 0x8d1   : > { %1983 = vst.msk [vmem:[#allocation4 + $0x18] sm:$0xff] %vm726_vm1, %v1979_v55  ;;  %1959 = vst.msk [vmem:[#allocation4 + $0x8] sm:$0xff] %vm726_vm1, %v1955_v39 }
 0x8d4   : > { %v1971_v56 = vpop.permute.xlu1 %1970  ;;  %v2003_v57 = vpop.permute.xlu0 %2002 }
 0x8d5   : > { %1975 = vst.msk [vmem:[#allocation3 + $0x18] sm:$0xff] %vm726_vm1, %v1971_v56  ;;  %2007 = vst.msk [vmem:[#allocation4 + $0x28] sm:$0xff] %vm726_vm1, %v2003_v57 }
 0x8d8   : > { %v1995_v58 = vpop.permute.xlu1 %1994  ;;  %v2027_v59 = vpop.permute.xlu0 %2026  ;;  %v2049_v60 = vld [vmem:[#allocation4 + $0x8] sm:$0xff]  ;;  %v2051_v62 = vld [vmem:[#allocation4 + $0x18] sm:$0xff] }
 0x8d9   : > { %1999 = vst.msk [vmem:[#allocation3 + $0x28] sm:$0xff] %vm726_vm1, %v1995_v58  ;;  %2031 = vst.msk [vmem:[#allocation4 + $0x38] sm:$0xff] %vm726_vm1, %v2027_v59  ;;  %3689 = vmatprep.subr.msk.mxu0 %vm726_vm1, %v2049_v60  ;;  %3696 = vmatprep.subr.msk.mxu1 %vm726_vm1, %v2051_v62 }
 0x8da   : > { %3690 = vmatpush3.xpose.msk.msra.mxu0 %vm726_vm1, %v2049_v60  ;;  %3697 = vmatpush3.xpose.msk.msra.mxu1 %vm726_vm1, %v2051_v62 }
 0x8dc   : > { %v2001_v63 = vpop.permute.xlu0 %2000  ;;  %v1953_v0 = vpop.permute.xlu1 %1952  ;;  %v2053_v8 = vld [vmem:[#allocation4 + $0x28] sm:$0xff]  ;;  %v2043_v61 = vld [vmem:[#allocation3 + $0x18] sm:$0xff] }
 0x8dd   : > { %2006 = vst.msk [vmem:[#allocation4 + $0x20] sm:$0xff] %vm726_vm1, %v2001_v63  ;;  %1958 = vst.msk [vmem:[#allocation4] sm:$0xff] %vm726_vm1, %v1953_v0 }
 0x8e0   : > { %v1993_v1 = vpop.permute.xlu0 %1992  ;;  %v1977_v4 = vpop.permute.xlu1 %1976  ;;  %v2055_v15 = vld [vmem:[#allocation4 + $0x38] sm:$0xff]  ;;  %v2045_v3 = vld [vmem:[#allocation3 + $0x28] sm:$0xff] }
 0x8e1   : > { %1998 = vst.msk [vmem:[#allocation3 + $0x20] sm:$0xff] %vm726_vm1, %v1993_v1  ;;  %1982 = vst.msk [vmem:[#allocation4 + $0x10] sm:$0xff] %vm726_vm1, %v1977_v4 }
 0x8e4   : > { %v2017_v5 = vpop.permute.xlu0 %2016  ;;  %v1969_v6 = vpop.permute.xlu1 %1968  ;;  %v2048_v7 = vld [vmem:[#allocation4] sm:$0xff] }
 0x8e5   : > { %2022 = vst.msk [vmem:[#allocation3 + $0x30] sm:$0xff] %vm726_vm1, %v2017_v5  ;;  %1974 = vst.msk [vmem:[#allocation3 + $0x10] sm:$0xff] %vm726_vm1, %v1969_v6  ;;  %3691 = vmatprep.subr.msk.mxu0 %vm726_vm1, %v2048_v7  ;;  %v2052_v14 = vld [vmem:[#allocation4 + $0x20] sm:$0xff] }
 0x8e6   : > { %3692 = vmatpush3.xpose.msk.msra.mxu0 %vm726_vm1, %v2048_v7 }
 0x8e7   : > { %3703 = vmatprep.subr.msk.mxu0 %vm726_vm1, %v2053_v8 }
 0x8e8   : > { %v1963_v9 = vpop.permute.xlu0 %1962  ;;  %v2025_v10 = vpop.permute.xlu1 %2024  ;;  %v2050_v12 = vld [vmem:[#allocation4 + $0x10] sm:$0xff]  ;;  %v2044_v13 = vld [vmem:[#allocation3 + $0x20] sm:$0xff] }
 0x8e9   : > { %1967 = vst.msk [vmem:[#allocation5 + $0x8] sm:$0xff] %vm726_vm1, %v1963_v9  ;;  %2030 = vst.msk [vmem:[#allocation4 + $0x30] sm:$0xff] %vm726_vm1, %v2025_v10  ;;  %3694 = vmatmul.mubr.msk.f32.vlgmr.msra.gmra.mxu0 %vm726_vm1, %v2041_v11  ;;  %3698 = vmatprep.subr.msk.mxu1 %vm726_vm1, %v2050_v12 }
 0x8ea   : > { %3699 = vmatpush3.xpose.msk.msra.mxu1 %vm726_vm1, %v2050_v12  ;;  %3704 = vmatpush3.xpose.msk.msra.mxu0 %vm726_vm1, %v2053_v8 }
 0x8eb   : > { %3707 = vmatprep.mubr.msk.f32.mxu0 %vm726_vm1, %v2044_v13  ;;  %3705 = vmatprep.subr.msk.mxu0 %vm726_vm1, %v2052_v14 }
 0x8ec   : > { %3710 = vmatprep.subr.msk.mxu1 %vm726_vm1, %v2055_v15  ;;  %v2011_v16 = vpop.permute.xlu0 %2010  ;;  %v2019_v17 = vpop.permute.xlu1 %2018  ;;  %v2042_v18 = vld [vmem:[#allocation3 + $0x10] sm:$0xff] }
 0x8ed   : > { %2015 = vst.msk [vmem:[#allocation5 + $0x28] sm:$0xff] %vm726_vm1, %v2011_v16  ;;  %2023 = vst.msk [vmem:[#allocation3 + $0x38] sm:$0xff] %vm726_vm1, %v2019_v17  ;;  %3700 = vmatprep.mubr.msk.f32.mxu1 %vm726_vm1, %v2042_v18  ;;  %v2046_v20 = vld [vmem:[#allocation3 + $0x30] sm:$0xff] }
 0x8ee   : > { %3701 = vmatmul.mubr.msk.f32.vlgmr.msra.gmra.mxu1 %vm726_vm1, %v2043_v61  ;;  %3706 = vmatpush3.xpose.msk.msra.mxu0 %vm726_vm1, %v2052_v14 }
 0x8ef   : > { %3711 = vmatpush3.xpose.msk.msra.mxu1 %vm726_vm1, %v2055_v15  ;;  %3714 = vmatprep.mubr.msk.f32.mxu1 %vm726_vm1, %v2046_v20 }
 0x8f0   : > { %v1987_v23 = vpop.permute.xlu1 %1986  ;;  %v2054_v24 = vld [vmem:[#allocation4 + $0x30] sm:$0xff]  ;;  %v2057_v25 = vld [vmem:[#allocation5 + $0x8] sm:$0xff] }
 0x8f1   : > { %1991 = vst.msk [vmem:[#allocation5 + $0x18] sm:$0xff] %vm726_vm1, %v1987_v23  ;;  %3708 = vmatmul.mubr.msk.f32.vlgmr.msra.gmra.mxu0 %vm726_vm1, %v2045_v3  ;;  %3712 = vmatprep.subr.msk.mxu1 %vm726_vm1, %v2054_v24 }
 0x8f2   : > { %3717 = vmatprep.subr.mxu0 %v2057_v25 }
 0x8f3   : > { %3713 = vmatpush3.xpose.msk.msra.mxu1 %vm726_vm1, %v2054_v24  ;;  %3718 = vmatpush3.msra.mxu0 %v2057_v25 }
 0x8f4   : > { %v2035_v26 = vpop.permute.xlu1 %2034  ;;  %v2047_v2 = vld [vmem:[#allocation3 + $0x38] sm:$0xff]  ;;  %v4672_v30 = vld [vmem:[#allocation5 + $0x28] sm:$0xff] }
 0x8f5   : > { %2039 = vst.msk [vmem:[#allocation5 + $0x38] sm:$0xff] %vm726_vm1, %v2035_v26 }
 0x8f6   : > { %3715 = vmatmul.mubr.msk.f32.vlgmr.msra.gmra.mxu1 %vm726_vm1, %v2047_v2 }
 0x8f8   : > { %v1961_v22 = vpop.permute.xlu1 %1960  ;;  %v2059_v27 = vld [vmem:[#allocation5 + $0x18] sm:$0xff] }
 0x8f9   : > { %1966 = vst.msk [vmem:[#allocation5] sm:$0xff] %vm726_vm1, %v1961_v22  ;;  %3724 = vmatprep.subr.mxu1 %v2059_v27 }
 0x8fa   : > { %3725 = vmatpush3.msra.mxu1 %v2059_v27 }
 0x8fc   : > { %v1985_v28 = vpop.permute.xlu1 %1984  ;;  %v4675_v32 = vld [vmem:[#allocation5 + $0x38] sm:$0xff] }
 0x8fd   : > { %1990 = vst.msk [vmem:[#allocation5 + $0x10] sm:$0xff] %vm726_vm1, %v1985_v28 }
 0x900   : > { %v2056_v29 = vld [vmem:[#allocation5] sm:$0xff] }
 0x901   : > { %3719 = vmatprep.subr.mxu0 %v2056_v29 }
 0x902   : > { %3720 = vmatpush3.msra.mxu0 %v2056_v29 }
 0x903   : > { %3731 = vmatprep.subr.mxu0 %v4672_v30 }
 0x904   : > { %v2058_v31 = vld [vmem:[#allocation5 + $0x10] sm:$0xff] }
 0x905   : > { %3726 = vmatprep.subr.mxu1 %v2058_v31 }
 0x906   : > { %3727 = vmatpush3.msra.mxu1 %v2058_v31 }
 0x907   : > { %3738 = vmatprep.subr.mxu1 %v4675_v32 }
 0x9a9   : > { %v3695_v33 = vpop.f32.mrf.mxu0 }
 0x9aa   : > { %v2415_v34 = vsel %vm1203_vm2, %v3695_v33, -inf }
 0x9ab   : > { %2416 = vmax.xlane.f32.xlu1 %v2415_v34  ;;  %v2142_v36 = vpop.f32.mrf.mxu0 }
 0x9ac   : > { %v2412_v42 = vsel %vm1203_vm2, %v2142_v36, -inf }
 0x9ae   : > { %v3702_v35 = vpop.f32.mrf.mxu1 }
 0x9af   : > { %v2421_v38 = vsel %vm1203_vm2, %v3702_v35, -inf }
 0x9b0   : > { %2422 = vmax.xlane.f32.xlu0 %v2421_v38  ;;  %v2229_v44 = vpop.f32.mrf.mxu1 }
 0x9b1   : > { %v3709_v40 = vpop.f32.mrf.mxu0  ;;  %v2418_v46 = vsel %vm1203_vm2, %v2229_v44, -inf }
 0x9b2   : > { %v2427_v41 = vsel %vm1203_vm2, %v3709_v40, -inf }
 0x9b3   : > { %2428 = vmax.xlane.f32.xlu1 %v2427_v41  ;;  %v2316_v47 = vpop.f32.mrf.mxu0 }
 0x9b4   : > { %2413 = vmax.xlane.f32.xlu0 %v2412_v42  ;;  %v2424_v37 = vsel %vm1203_vm2, %v2316_v47, -inf }
 0x9b6   : > { %v3716_v45 = vpop.f32.mrf.mxu1 }
 0x9b7   : > { %v2433_v43 = vsel %vm1203_vm2, %v3716_v45, -inf }
 0x9b8   : > { %2434 = vmax.xlane.f32.xlu1 %v2433_v43  ;;  %2419 = vmax.xlane.f32.xlu0 %v2418_v46  ;;  %v2403_v48 = vpop.f32.mrf.mxu1 }
 0x9b9   : > { %v2430_v49 = vsel %vm1203_vm2, %v2403_v48, -inf }
 0x9bc   : > { %2425 = vmax.xlane.f32.xlu0 %v2424_v37 }
 0x9c0   : > { %2431 = vmax.xlane.f32.xlu0 %v2430_v49 }
 0x9c9   : > { %2032 = vrot.lane.b32.xlu1 %v4597_v53, %s4996_s19  ;;  %s581_s19 = sand.u32 1, %s4129_s25  }
 0x9ca   : > { %s4896_s23 = scalar_lea.sflag [#allocation8], %s581_s19 }
 0x9d6   : > { %2008 = vrot.lane.b32.xlu0 %v4597_v53, %s4994_s30  ;;  %s4159_s30 = smov [#allocation12]  }
 0x9d7   : > { %s4073_s18 = sshll.u32 %s4159_s30, 4  ;;  %s4074_s18 = int_to_ptr.vmem [resolvable:$false] %s4073_s18 }
 0xa34   : > { %v4690_v50 = vpop.xlane.xlu1 %2416 }
 0xa35   : > { %v2461_v39 = vsub.f32 %v3695_v33, %v4690_v50  ;;  %v2437_v31 = vsub.f32 -inf, %v4690_v50 }
 0xa37   : > { %v2470_v59 = vmul.f32 1.442695, %v2461_v39  ;;  %v2446_v34 = vmul.f32 1.442695, %v2437_v31 }
 0xa39   : > { %v4692_v51 = vpop.xlane.xlu0 %2422 }
 0xa3a   : > { %v2463_v52 = vsub.f32 %v3702_v35, %v4692_v51  ;;  %v2439_v35 = vsub.f32 -inf, %v4692_v51 }
 0xa3c   : > { %v2474_v54 = vmul.f32 1.442695, %v2463_v52  ;;  %v4695_v55 = vpop.xlane.xlu1 %2428  ;;  %v2450_v42 = vmul.f32 1.442695, %v2439_v35 }
 0xa3d   : > { %v4698_v56 = vpop.xlane.xlu0 %2413  ;;  %v2465_v62 = vsub.f32 %v3709_v40, %v4695_v55  ;;  %v2441_v41 = vsub.f32 -inf, %v4695_v55 }
 0xa3e   : > { %v2460_v57 = vsub.f32 %v2142_v36, %v4698_v56  ;;  %3935 = vpow2.f32 %v2474_v54 }
 0xa3f   : > { %v2478_v7 = vmul.f32 1.442695, %v2465_v62 }
 0xa40   : > { %v2468_v58 = vmul.f32 1.442695, %v2460_v57 }
 0xa41   : > { %v4701_v60 = vpop.xlane.xlu1 %2434  ;;  %v4703_v53 = vpop.xlane.xlu0 %2419 }
 0xa42   : > { %v2467_v63 = vsub.f32 %v3716_v45, %v4701_v60  ;;  %v2462_v0 = vsub.f32 %v2229_v44, %v4703_v53  ;;  %3937 = vpow2.f32 %v2468_v58  ;;  %v2438_v38 = vsub.f32 -inf, %v4703_v53 }
 0xa43   : > { %3939 = vpow2.f32 %v2470_v59  ;;  %v2454_v45 = vmul.f32 1.442695, %v2441_v41  ;;  %v2443_v49 = vsub.f32 -inf, %v4701_v60 }
 0xa44   : > { %v2482_v1 = vmul.f32 1.442695, %v2467_v63  ;;  %v2472_v4 = vmul.f32 1.442695, %v2462_v0  ;;  %v2448_v44 = vmul.f32 1.442695, %v2438_v38 }
 0xa45   : > { %v2033_v5 = vpop.permute.xlu1 %2032  ;;  %v4708_v6 = vpop.xlane.xlu0 %2425  ;;  %v2458_v55 = vmul.f32 1.442695, %v2443_v49 }
 0xa46   : > { %2038 = vst.msk [vmem:[#allocation5 + $0x30] sm:$0xff] %vm726_vm1, %v2033_v5  ;;  %v2464_v8 = vsub.f32 %v2316_v47, %v4708_v6  ;;  %3941 = vpow2.f32 %v2482_v1  ;;  %v2440_v43 = vsub.f32 -inf, %v4708_v6 }
 0xa47   : > { %3943 = vpow2.f32 %v2472_v4 }
 0xa48   : > { %v2476_v9 = vmul.f32 1.442695, %v2464_v8  ;;  %3945 = vpow2.f32 %v2478_v7 }
 0xa49   : > { %v4712_v10 = vpop.xlane.xlu0 %2431 }
 0xa4a   : > { %v2466_v11 = vsub.f32 %v2403_v48, %v4712_v10  ;;  %3947 = vpow2.f32 %v2476_v9  ;;  %v2442_v46 = vsub.f32 -inf, %v4712_v10  ;;  %v2452_v48 = vmul.f32 1.442695, %v2440_v43 }
 0xa4b   : > { %v3936_v12 = vpop.eup %3935 }
 0xa4c   : > { %v2480_v13 = vmul.f32 1.442695, %v2466_v11  ;;  %v2501_v14 = vsel %vm1203_vm2, %v3936_v12, 0.0  ;;  %v2456_v50 = vmul.f32 1.442695, %v2442_v46 }
 0xa4d   : > { %v2009_v15 = vpop.permute.xlu0 %2008  ;;  %2502 = vadd.xlane.f32.xlu1 %v2501_v14  ;;  %v2062_v26 = vld [vmem:[#allocation5 + $0x30] sm:$0xff] }
 0xa4e   : > { %2014 = vst.msk [vmem:[#allocation5 + $0x20] sm:$0xff] %vm726_vm1, %v2009_v15  ;;  %3949 = vpow2.f32 %v2480_v13 }
 0xa4f   : > { %v3938_v16 = vpop.eup %3937  ;;  %3951 = vpow2.f32 %v2446_v34 }
 0xa50   : > { %v3940_v17 = vpop.eup %3939  ;;  %3721 = vmatprep.mubr.msk.f32.mxu0 %vm1203_vm2, %v3938_v16 }
 0xa51   : > { %3722 = vmatmul.mubr.msk.f32.vlgmr.msra.gmra.mxu0 %vm1203_vm2, %v3940_v17  ;;  %v2495_v2 = vsel %vm1203_vm2, %v3940_v17, 0.0 }
 0xa52   : > { %3732 = vmatpush3.msra.mxu0 %v4672_v30  ;;  %v2492_v30 = vsel %vm1203_vm2, %v3938_v16, 0.0 }
 0xa53   : > { %v3942_v18 = vpop.eup %3941 }
 0xa54   : > { %v2513_v61 = vsel %vm1203_vm2, %v3942_v18, 0.0  ;;  %v3944_v23 = vpop.eup %3943 }
 0xa55   : > { %v2060_v20 = vld [vmem:[#allocation5 + $0x20] sm:$0xff]  ;;  %2514 = vadd.xlane.f32.xlu1 %v2513_v61  ;;  %v3946_v3 = vpop.eup %3945  ;;  %3728 = vmatprep.mubr.msk.f32.mxu1 %vm1203_vm2, %v3944_v23  ;;  %v2498_v24 = vsel %vm1203_vm2, %v3944_v23, 0.0 }
 0xa56   : > { %3733 = vmatprep.subr.mxu0 %v2060_v20  ;;  %3729 = vmatmul.mubr.msk.f32.vlgmr.msra.gmra.mxu1 %vm1203_vm2, %v3936_v12  ;;  %v2507_v22 = vsel %vm1203_vm2, %v3946_v3, 0.0 }
 0xa57   : > { %3734 = vmatpush3.msra.mxu0 %v2060_v20  ;;  %v3948_v25 = vpop.eup %3947  ;;  %2499 = vadd.xlane.f32.xlu0 %v2498_v24 }
 0xa58   : > { %3739 = vmatpush3.msra.mxu1 %v4675_v32  ;;  %3735 = vmatprep.mubr.msk.f32.mxu0 %vm1203_vm2, %v3948_v25  ;;  %v2504_v28 = vsel %vm1203_vm2, %v3948_v25, 0.0  ;;  %v2436_v32 = vsub.f32 -inf, %v4698_v56 }
 0xa59   : > { %3740 = vmatprep.subr.mxu1 %v2062_v26  ;;  %2496 = vadd.xlane.f32.xlu1 %v2495_v2 }
 0xa5a   : > { %3741 = vmatpush3.msra.mxu1 %v2062_v26  ;;  %3736 = vmatmul.mubr.msk.f32.vlgmr.msra.gmra.mxu0 %vm1203_vm2, %v3946_v3  ;;  %v2444_v36 = vmul.f32 1.442695, %v2436_v32  ;;  %v2929_v32 = vld [vmem:[#allocation11 + $0x18] sm:$0xff] }
 0xa5b   : > { %v3950_v27 = vpop.eup %3949  ;;  %2508 = vadd.xlane.f32.xlu0 %v2507_v22  ;;  %3745 = vmatprep.subr.mxu0 %v2929_v32 }
 0xa5c   : > { %3742 = vmatprep.mubr.msk.f32.mxu1 %vm1203_vm2, %v3950_v27  ;;  %v2510_v29 = vsel %vm1203_vm2, %v3950_v27, 0.0  ;;  %3953 = vpow2.f32 %v2444_v36  ;;  %v3952_v54 = vpop.eup %3951  ;;  %3746 = vmatpush3.msra.mxu0 %v2929_v32 }
 0xa5d   : > { %3743 = vmatmul.mubr.msk.f32.vlgmr.msra.gmra.mxu1 %vm1203_vm2, %v3942_v18  ;;  %3955 = vpow2.f32 %v2450_v42  ;;  %v2485_v57 = vmul.f32 0.0, %v3952_v54 }
 0xa5e   : > { %3957 = vpow2.f32 %v2448_v44 }
 0xa5f   : > { %2505 = vadd.xlane.f32.xlu0 %v2504_v28  ;;  %3959 = vpow2.f32 %v2454_v45 }
 0xa60   : > { %3961 = vpow2.f32 %v2452_v48 }
 0xa61   : > { %3963 = vpow2.f32 %v2456_v50 }
 0xa62   : > { %3965 = vpow2.f32 %v2458_v55 }
 0xa63   : > { %2511 = vadd.xlane.f32.xlu0 %v2510_v29 }
 0xa67   : > { %2493 = vadd.xlane.f32.xlu0 %v2492_v30 }
 0xa69   : > { %v3954_v39 = vpop.eup %3953 }
 0xa6a   : > { %v3956_v59 = vpop.eup %3955  ;;  %v2484_v62 = vmul.f32 0.0, %v3954_v39 }
 0xa6b   : > { %v3958_v63 = vpop.eup %3957  ;;  %v2487_v4 = vmul.f32 0.0, %v3956_v59 }
 0xa6c   : > { %v3960_v1 = vpop.eup %3959  ;;  %v4742_v5 = vmul.f32 0.0, %v3958_v63 }
 0xa6d   : > { %v4744_v6 = vmul.f32 0.0, %v3960_v1  ;;  %v3962_v7 = vpop.eup %3961 }
 0xa6e   : > { %v3964_v9 = vpop.eup %3963  ;;  %v4748_v11 = vmul.f32 0.0, %v3962_v7 }
 0xa6f   : > { %v4750_v12 = vmul.f32 0.0, %v3964_v9  ;;  %v3966_v13 = vpop.eup %3965 }
 0xa70   : > { %v4754_v16 = vmul.f32 0.0, %v3966_v13 }
 0xad6   : > { %v2503_v47 = vpop.xlane.xlu1 %2502 }
 0xad7   : > { %v2519_v60 = vadd.f32 %v2503_v47, %v2487_v4  ;;  %v2927_v47 = vld [vmem:[#allocation11 + $0x8] sm:$0xff] }
 0xade   : > { %v2515_v51 = vpop.xlane.xlu1 %2514 }
 0xadf   : > { %v2523_v18 = vadd.f32 %v2515_v51, %v4754_v16  ;;  %v2926_v51 = vld [vmem:[#allocation11] sm:$0xff] }
 0xae0   : > { %v2500_v33 = vpop.xlane.xlu0 %2499 }
 0xae1   : > { %v2518_v8 = vadd.f32 %v2500_v33, %v4742_v5  ;;  %v2928_v33 = vld [vmem:[#allocation11 + $0x10] sm:$0xff] }
 0xae2   : > { %v2497_v56 = vpop.xlane.xlu1 %2496  ;;  %3747 = vmatprep.subr.mxu0 %v2928_v33 }
 0xae3   : > { %v2517_v53 = vadd.f32 %v2497_v56, %v2485_v57  ;;  %3748 = vmatpush3.msra.mxu0 %v2928_v33 }
 0xae4   : > { %v2509_v40 = vpop.xlane.xlu0 %2508  ;;  %3749 = vmatprep.subr.mxu0 %v2927_v47 }
 0xae5   : > { %3967 = vrcp.f32 %v2517_v53  ;;  %v2521_v10 = vadd.f32 %v2509_v40, %v4744_v6  ;;  %3750 = vmatpush3.msra.mxu0 %v2927_v47 }
 0xae6   : > { %3751 = vmatprep.subr.mxu0 %v2926_v51 }
 0xae7   : > { %3752 = vmatpush3.msra.mxu0 %v2926_v51  ;;  %v3073_v51 = vld [vmem:[%s4950_s13 + $0x18] sm:$0xff] }
 0xae8   : > { %v2506_v37 = vpop.xlane.xlu0 %2505 }
 0xae9   : > { %v2520_v14 = vadd.f32 %v2506_v37, %v4748_v11 }
 0xaec   : > { %v2512_v52 = vpop.xlane.xlu0 %2511 }
 0xaed   : > { %v2522_v15 = vadd.f32 %v2512_v52, %v4750_v12 }
 0xaf0   : > { %v2494_v58 = vpop.xlane.xlu0 %2493 }
 0xaf1   : > { %v2516_v0 = vadd.f32 %v2494_v58, %v2484_v62 }
 0xaf2   : > { %v3968_v17 = vpop.eup %3967 }
 0xaf3   : > { %3969 = vrcp.f32 %v2516_v0  ;;  %v2865_v20 = vmul.f32 %v3968_v17, %v2517_v53 }
 0xaf4   : > { %3971 = vrcp.f32 %v2519_v60 }
 0xaf5   : > { %3973 = vrcp.f32 %v2518_v8  ;;  %v2873_v25 = vsub.f32 2.0, %v2865_v20 }
 0xaf6   : > { %3975 = vrcp.f32 %v2521_v10 }
 0xaf7   : > { %3977 = vrcp.f32 %v2520_v14  ;;  %v2881_v31 = vmul.f32 %v3968_v17, %v2873_v25 }
 0xaf8   : > { %3979 = vrcp.f32 %v2522_v15 }
 0xaf9   : > { %3981 = vrcp.f32 %v2523_v18 }
 0xb00   : > { %v3970_v61 = vpop.eup %3969 }
 0xb01   : > { %v3972_v23 = vpop.eup %3971  ;;  %v2864_v3 = vmul.f32 %v3970_v61, %v2516_v0 }
 0xb02   : > { %v3974_v24 = vpop.eup %3973  ;;  %v2867_v2 = vmul.f32 %v3972_v23, %v2519_v60 }
 0xb03   : > { %v3976_v26 = vpop.eup %3975  ;;  %v2872_v22 = vsub.f32 2.0, %v2864_v3  ;;  %v2866_v27 = vmul.f32 %v3974_v24, %v2518_v8 }
 0xb04   : > { %v2869_v29 = vmul.f32 %v3976_v26, %v2521_v10  ;;  %v3978_v34 = vpop.eup %3977  ;;  %v2875_v35 = vsub.f32 2.0, %v2867_v2 }
 0xb05   : > { %v3980_v38 = vpop.eup %3979  ;;  %v2880_v42 = vmul.f32 %v3970_v61, %v2872_v22  ;;  %v2874_v44 = vsub.f32 2.0, %v2866_v27  ;;  %v2868_v37 = vmul.f32 %v3978_v34, %v2520_v14  ;;  %v3479_v27 = vld [vmem:[%s4947_s10] ss:$0 sm:$0xff] }
 0xb06   : > { %v2877_v45 = vsub.f32 2.0, %v2869_v29  ;;  %v2870_v48 = vmul.f32 %v3980_v38, %v2522_v15  ;;  %v2883_v50 = vmul.f32 %v3972_v23, %v2875_v35  ;;  %v3982_v52 = vpop.eup %3981 }
 0xb07   : > { %v2882_v56 = vmul.f32 %v3974_v24, %v2874_v44  ;;  %v2871_v53 = vmul.f32 %v3982_v52, %v2523_v18 }
 0xb08   : > { %v2885_v59 = vmul.f32 %v3976_v26, %v2877_v45  ;;  %v2878_v63 = vsub.f32 2.0, %v2870_v48  ;;  %v3076_v48 = vld [vmem:[%s4950_s13 + $0x30] sm:$0xff] }
 0xb09   : > { %v2879_v8 = vsub.f32 2.0, %v2871_v53 }
 0xb0a   : > { %v2886_v10 = vmul.f32 %v3980_v38, %v2878_v63 }
 0xb0b   : > { %v2887_v17 = vmul.f32 %v3982_v52, %v2879_v8  ;;  %v3072_v52 = vld [vmem:[%s4950_s13 + $0x10] sm:$0xff] }
 0xb11   : > { %v3723_v28 = vpop.f32.mrf.mxu0 }
 0xb12   : > { %v2849_v30 = vadd.f32 %v3723_v28, %v2485_v57 }
 0xb13   : > { %v2596_v36 = vpop.f32.mrf.mxu0 }
 0xb14   : > { %v2889_v40 = vmul.f32 %v2881_v31, %v2849_v30  ;;  %v2848_v41 = vadd.f32 %v2596_v36, %v2484_v62  ;;  %v2876_v62 = vsub.f32 2.0, %v2868_v37  ;;  %v3077_v37 = vld [vmem:[%s4950_s13 + $0x38] sm:$0xff] }
 0xb15   : > { %3120 = vmatprep.subr.mxu1 %v3077_v37 }
 0xb16   : > { %v2888_v43 = vmul.f32 %v2880_v42, %v2848_v41  ;;  %v3730_v46 = vpop.f32.mrf.mxu1  ;;  %v2884_v9 = vmul.f32 %v3978_v34, %v2876_v62  ;;  %3121 = vmatpush1.msra.mxu1 %v3076_v48 }
 0xb17   : > { %v2851_v49 = vadd.f32 %v3730_v46, %v2487_v4 }
 0xb18   : > { %v2677_v54 = vpop.f32.mrf.mxu1 }
 0xb19   : > { %v2891_v55 = vmul.f32 %v2883_v50, %v2851_v49  ;;  %v2850_v39 = vadd.f32 %v2677_v54, %v4742_v5  ;;  %v3075_v49 = vld [vmem:[%s4950_s13 + $0x28] sm:$0xff]  ;;  %v3074_v50 = vld [vmem:[%s4950_s13 + $0x20] sm:$0xff]  ;;  %v4158_v54 = vmov 0.0  }
 0xb1a   : > { %v3737_v57 = vpop.f32.mrf.mxu0  ;;  %3122 = vmatprep.subr.mxu1 %v3075_v49  ;;  %3160 = vmatprep.mubr.f32.mxu1 %v4158_v54 }
 0xb1b   : > { %v2853_v58 = vadd.f32 %v3737_v57, %v4744_v6  ;;  %v2890_v0 = vmul.f32 %v2882_v56, %v2850_v39  ;;  %2900 = vrot.lane.b32.xlu1 %v2891_v55, %s4155_s24  ;;  %3123 = vmatpush1.msra.mxu1 %v3074_v50  ;;  %v3071_v55 = vld [vmem:[%s4950_s13 + $0x8] sm:$0xff]  ;;  %v3070_v39 = vld [vmem:[%s4950_s13] sm:$0xff]  ;;  %v3200_v56 = vld [vmem:[%s4952_s15 + $0x78] sm:$0xff] }
 0xb1c   : > { %v2758_v1 = vpop.f32.mrf.mxu0  ;;  %3124 = vmatprep.subr.mxu1 %v3073_v51  ;;  %3756 = vmatprep.subr.mxu0 %v3200_v56 }
 0xb1d   : > { %v2893_v4 = vmul.f32 %v2885_v59, %v2853_v58  ;;  %v3744_v60 = vpop.f32.mrf.mxu1  ;;  %v2852_v7 = vadd.f32 %v2758_v1, %v4748_v11  ;;  %2898 = vrot.lane.b32.xlu0 %v2890_v0, %s4155_s24  ;;  %3125 = vmatpush1.msra.mxu1 %v3072_v52  ;;  %v3482_v1 = vld [vmem:[%s4948_s11] ss:$0 sm:$0xff] }
 0xb1e   : > { %v2855_v14 = vadd.f32 %v3744_v60, %v4754_v16  ;;  %3126 = vmatprep.subr.mxu1 %v3071_v55  ;;  %v3483_v60 = vld [vmem:[%s4949_s12] ss:$0 sm:$0xff] }
 0xb1f   : > { %v2839_v5 = vpop.f32.mrf.mxu1  ;;  %2908 = vrot.lane.b32.xlu1 %v2893_v4, %s4156_s27  ;;  %v2892_v13 = vmul.f32 %v2884_v9, %v2852_v7  ;;  %3127 = vmatpush1.msra.mxu1 %v3070_v39 }
 0xb20   : > { %v2854_v6 = vadd.f32 %v2839_v5, %v4750_v12  ;;  %v2895_v11 = vmul.f32 %v2887_v17, %v2855_v14  ;;  %v3198_v14 = vld [vmem:[%s4952_s15 + $0x68] sm:$0xff]  ;;  %v3196_v17 = vld [vmem:[%s4952_s15 + $0x58] sm:$0xff] }
 0xb22   : > { %v2894_v15 = vmul.f32 %v2886_v10, %v2854_v6 }
 0xb23   : > { %2906 = vrot.lane.b32.xlu1 %v2892_v13, %s4156_s27  ;;  %v3199_v13 = vld [vmem:[%s4952_s15 + $0x70] sm:$0xff] }
 0xb24   : > { %2914 = vrot.lane.b32.xlu0 %v2894_v15, %s4997_s29  ;;  %v3197_v15 = vld [vmem:[%s4952_s15 + $0x60] sm:$0xff] }
 0xb27   : > { %2916 = vrot.lane.b32.xlu1 %v2895_v11, %s4997_s29  ;;  %v3195_v11 = vld [vmem:[%s4952_s15 + $0x50] sm:$0xff]  ;;  %s3417_s29 = sshll.u32 %s581_s19, 4 }
 0xb28   : > { %s583_s0 = scalar_lea.vmem [#allocation12], %s3417_s29  ;;  %s4075_s29 = scalar_lea.vmem %s4074_s18, 512 }
 0xb29   : > { %s3305_s20 = sshll.u32 %s583_s0, 4  ;;  %s4893_s20 = int_to_ptr.vmem [resolvable:$true] %s3305_s20 }
 0xb2a   : > { %s4069_s28 = scalar_lea.vmem %s4893_s20, 256  ;;  %p4076_p7 = scmp.lt.s32.totalorder %s4893_s20, %s4074_s18 }
 0xb2b   : > { %p4070_p10 = scmp.ne.s32.totalorder %s4893_s20, %s4069_s28  ;;  %p4077_p8 = scmp.lt.s32.totalorder %s4075_s29, %s4069_s28 }
 0xb2d   : > { %p4071_p2 = pnand %p4070_p10, %p4999_p12  ;;  %p4078_p11 = por %p4077_p8, %p4076_p7 }
 0xb2f   : > { %p4072_p4 = pneg %p4071_p2 }
 0xb31   : > { %p4079_p0 = pnand %p4078_p11, %p4072_p4 }
 0xb8d   : > { %v2901_v18 = vpop.permute.xlu1 %2900 }
 0xb8e   : > { %v2921_v25 = vsel %vm726_vm1, %v2889_v40, %v2901_v18  ;;  %v3194_v18 = vld [vmem:[%s4952_s15 + $0x48] sm:$0xff] }
 0xb8f   : > { %v2899_v61 = vpop.permute.xlu0 %2898 }
 0xb90   : > { %v2920_v23 = vsel %vm726_vm1, %v2888_v43, %v2899_v61  ;;  %v3193_v61 = vld [vmem:[%s4952_s15 + $0x40] sm:$0xff] }
 0xb91   : > { %v2909_v20 = vpop.permute.xlu1 %2908 }
 0xb92   : > { %v2923_v26 = vsel %vm1203_vm2, %v2921_v25, %v2909_v20  ;;  %v3192_v20 = vld [vmem:[%s4952_s15 + $0x38] sm:$0xff]  ;;  %v3186_v25 = vld [vmem:[%s4952_s15 + $0x8] sm:$0xff] }
 0xb95   : > { %v2907_v3 = vpop.permute.xlu1 %2906 }
 0xb96   : > { %v2915_v12 = vpop.permute.xlu0 %2914  ;;  %v2922_v24 = vsel %vm1203_vm2, %v2920_v23, %v2907_v3  ;;  %v3191_v23 = vld [vmem:[%s4952_s15 + $0x30] sm:$0xff]  ;;  %v3190_v3 = vld [vmem:[%s4952_s15 + $0x28] sm:$0xff] }
 0xb97   : > { %v2924_v16 = vsel %vm1716_vm3, %v2922_v24, %v2915_v12  ;;  %v3189_v12 = vld [vmem:[%s4952_s15 + $0x20] sm:$0xff]  ;;  %v3188_v24 = vld [vmem:[%s4952_s15 + $0x18] sm:$0xff] }
 0xb98   : > { %3753 = vmatprep.mubr.msk.f32.mxu0 %vm591_vm0, %v2924_v16  ;;  %v3187_v16 = vld [vmem:[%s4952_s15 + $0x10] sm:$0xff] }
 0xb99   : > { %v2917_v2 = vpop.permute.xlu1 %2916 }
 0xb9a   : > { %v2925_v22 = vsel %vm1716_vm3, %v2923_v26, %v2917_v2  ;;  %v3185_v26 = vld [vmem:[%s4952_s15] sm:$0xff]  ;;  %v3080_v2 = vlaneseq }
 0xb9b   : > { %3754 = vmatmul.mubr.msk.f32.vlgmr.msra.gmra.mxu0 %vm591_vm0, %v2925_v22 }
 0xb9c   : > { %3757 = vmatpush3.msra.mxu0 %v3200_v56  ;;  %v3081_v22 = vshrl.u32 %v3080_v2, 7 }
 0xb9d   : > { %3758 = vmatprep.subr.mxu0 %v3199_v13 }
 0xb9e   : > { %3759 = vmatpush3.msra.mxu0 %v3199_v13 }
 0xb9f   : > { %3760 = vmatprep.subr.mxu0 %v3198_v14 }
 0xba0   : > { %3761 = vmatpush3.msra.mxu0 %v3198_v14 }
 0xba1   : > { %3762 = vmatprep.subr.mxu0 %v3197_v15 }
 0xba2   : > { %3763 = vmatpush3.msra.mxu0 %v3197_v15 }
 0xba3   : > { %3764 = vmatprep.subr.mxu0 %v3196_v17 }
 0xba4   : > { %3765 = vmatpush3.msra.mxu0 %v3196_v17 }
 0xba5   : > { %3766 = vmatprep.subr.mxu0 %v3195_v11 }
 0xba6   : > { %3767 = vmatpush3.msra.mxu0 %v3195_v11 }
 0xba7   : > { %3768 = vmatprep.subr.mxu0 %v3194_v18 }
 0xba8   : > { %3769 = vmatpush3.msra.mxu0 %v3194_v18 }
 0xba9   : > { %3770 = vmatprep.subr.mxu0 %v3193_v61 }
 0xbaa   : > { %3771 = vmatpush3.msra.mxu0 %v3193_v61 }
 0xbab   : > { %3772 = vmatprep.subr.mxu0 %v3192_v20 }
 0xbac   : > { %3773 = vmatpush3.msra.mxu0 %v3192_v20 }
 0xbad   : > { %3774 = vmatprep.subr.mxu0 %v3191_v23 }
 0xbae   : > { %3775 = vmatpush3.msra.mxu0 %v3191_v23 }
 0xbaf   : > { %3776 = vmatprep.subr.mxu0 %v3190_v3 }
 0xbb0   : > { %3777 = vmatpush3.msra.mxu0 %v3190_v3 }
 0xbb1   : > { %3778 = vmatprep.subr.mxu0 %v3189_v12 }
 0xbb2   : > { %3779 = vmatpush3.msra.mxu0 %v3189_v12 }
 0xbb3   : > { %3780 = vmatprep.subr.mxu0 %v3188_v24 }
 0xbb4   : > { %3781 = vmatpush3.msra.mxu0 %v3188_v24 }
 0xbb5   : > { %3782 = vmatprep.subr.mxu0 %v3187_v16 }
 0xbb6   : > { %3783 = vmatpush3.msra.mxu0 %v3187_v16 }
 0xbb7   : > { %3784 = vmatprep.subr.mxu0 %v3186_v25 }
 0xbb8   : > { %3785 = vmatpush3.msra.mxu0 %v3186_v25 }
 0xbb9   : > { %3786 = vmatprep.subr.mxu0 %v3185_v26 }
 0xbba   : > { %3787 = vmatpush3.msra.mxu0 %v3185_v26 }
 0xc5b   : > { %v3755_v28 = vpop.f32.mrf.mxu0 }
 0xc5c   : > { %v3015_v29 = vadd.f32 %v3755_v28, %v3479_v27  ;;  %v3078_v28 = vld [vmem:[%s4951_s14] sm:$0x3] }
 0xc5d   : > { %v3009_v30 = vpop.f32.mrf.mxu0 }
 0xc5e   : > { %v3021_v31 = vadd.f32 %v3015_v29, %v4574_v19  ;;  %v3010_v32 = vadd.f32 %v3479_v27, %v3009_v30  ;;  %v3086_v27 = vsub.s32 1, %v3081_v22 }
 0xc60   : > { %3023 = vst.msk [vmem:[#allocation2 + $0x8] sm:$0xff] %vm591_vm0, %v3021_v31  ;;  %v3020_v33 = vadd.f32 %v3010_v32, %v4578_v21  ;;  %v3087_v29 = vrot.slane %v3078_v28, %v3086_v27 }
 0xc62   : > { %3022 = vst.msk [vmem:[#allocation2] sm:$0xff] %vm591_vm0, %v3020_v33 }
 0xc67   : > { %v4783_v34 = vld [vmem:[#allocation2 + $0x8] sm:$0xff] }
 0xc68   : > { %v3031_v35 = vsel %vm591_vm0, %v4783_v34, 0.0 }
 0xc69   : > { %3032 = vadd.xlane.f32.xlu1 %v3031_v35  ;;  %v4787_v36 = vld [vmem:[#allocation2] sm:$0xff] }
 0xc6a   : > { %v3028_v38 = vsel %vm591_vm0, %v4787_v36, 0.0 }
 0xc6b   : > { %3029 = vadd.xlane.f32.xlu0 %v3028_v38 }
 0xcf2   : > { %v3033_v19 = vpop.xlane.xlu1 %3032 }
 0xcf3   : > { %v3035_v40 = vmul.f32 0.03125, %v3033_v19 }
 0xcf4   : > { %v3030_v41 = vpop.xlane.xlu0 %3029 }
 0xcf5   : > { %v3034_v42 = vmul.f32 0.03125, %v3030_v41  ;;  %v3037_v21 = vsub.f32 %v4783_v34, %v3035_v40  ;;  %v3082_v41 = vsub.s32 0, %v3081_v22 }
 0xcf7   : > { %v3036_v44 = vsub.f32 %v4787_v36, %v3034_v42  ;;  %v3039_v46 = vmul.f32 %v3037_v21, %v3037_v21  ;;  %v3083_v42 = vrot.slane %v3078_v28, %v3082_v41 }
 0xcf9   : > { %v3038_v45 = vmul.f32 %v3036_v44, %v3036_v44  ;;  %v3043_v47 = vsel %vm591_vm0, %v3039_v46, 0.0 }
 0xcfb   : > { %v3040_v43 = vsel %vm591_vm0, %v3038_v45, 0.0 }
 0xcfc   : > { %3041 = vadd.xlane.f32.xlu0 %v3040_v43 }
 0xd00   : > { %3044 = vadd.xlane.f32.xlu0 %v3043_v47 }
 0xd85   : > { %v3042_v57 = vpop.xlane.xlu0 %3041 }
 0xd86   : > { %v3046_v58 = vmul.f32 0.03125, %v3042_v57 }
 0xd88   : > { %v3048_v59 = vadd.f32 1e-05, %v3046_v58 }
 0xd89   : > { %v3045_v53 = vpop.xlane.xlu0 %3044 }
 0xd8a   : > { %3983 = vrsqrt.f32 %v3048_v59  ;;  %v3047_v62 = vmul.f32 0.03125, %v3045_v53 }
 0xd8c   : > { %v3049_v63 = vadd.f32 1e-05, %v3047_v62 }
 0xd8e   : > { %3985 = vrsqrt.f32 %v3049_v63 }
 0xd97   : > { %v3984_v0 = vpop.eup %3983 }
 0xd98   : > { %v3052_v4 = vmul.f32 %v3984_v0, %v3036_v44 }
 0xd9a   : > { %v3060_v7 = vmul.f32 %v3482_v1, %v3052_v4 }
 0xd9b   : > { %v3986_v5 = vpop.eup %3985 }
 0xd9c   : > { %v3068_v8 = vadd.f32 %v3483_v60, %v3060_v7  ;;  %v3053_v9 = vmul.f32 %v3986_v5, %v3037_v21 }
 0xd9e   : > { %3484 = vmatmul.mubr.msk.f32.vlgmr.msra.gmra.mxu1 %vm591_vm0, %v3068_v8  ;;  %v3061_v6 = vmul.f32 %v3482_v1, %v3053_v9 }
 0xd9f   : > { %3166 = vmatprep.mubr.f32.mxu1 %v4158_v54  ;;  %v3486_v54 = vld [vmem:[%s4953_s16] ss:$0 sm:$0xff] }
 0xda0   : > { %v3069_v10 = vadd.f32 %v3483_v60, %v3061_v6 }
 0xda2   : > { %3485 = vmatmul.mubr.msk.f32.gmra.mxu1 %vm591_vm0, %v3069_v10 }
 0xe5e   : > { %v3162_v30 = vpop.f32.mrf.mxu1 }
 0xe5f   : > { %v3163_v43 = vadd.f32 %v3162_v30, %v3083_v42 }
 0xe60   : > { %v3164_v31 = vpop.f32.mrf.mxu1 }
 0xe61   : > { %v3165_v32 = vadd.f32 %v3164_v31, %v3087_v29 }
 0xe62   : > { %v3168_v33 = vpop.f32.mrf.mxu1 }
 0xe63   : > { %v3175_v35 = vmul.f32 0.70710677, %v3165_v32  ;;  %v3173_v44 = vmul.f32 0.5, %v3165_v32  ;;  %v3169_v50 = vadd.f32 %v3168_v33, %v3083_v42 }
 0xe64   : > { %v3170_v38 = vpop.f32.mrf.mxu1 }
 0xe65   : > { %3987 = verf.f32 %v3175_v35  ;;  %v3171_v19 = vadd.f32 %v3170_v38, %v3087_v29 }
 0xe67   : > { %v3176_v40 = vmul.f32 0.70710677, %v3171_v19  ;;  %v3174_v37 = vmul.f32 0.5, %v3171_v19 }
 0xe69   : > { %3989 = verf.f32 %v3176_v40 }
 0xe72   : > { %v3988_v21 = vpop.eup %3987 }
 0xe73   : > { %v3179_v45 = vadd.f32 1.0, %v3988_v21 }
 0xe75   : > { %v3181_v46 = vmul.f32 %v3179_v45, %v3173_v44 }
 0xe76   : > { %v3990_v47 = vpop.eup %3989 }
 0xe77   : > { %v3180_v48 = vadd.f32 1.0, %v3990_v47  ;;  %v3183_v49 = vmul.f32 %v3181_v46, %v3163_v43 }
 0xe79   : > { %v3182_v51 = vmul.f32 %v3180_v48, %v3174_v37  ;;  %3788 = vmatprep.mubr.f32.mxu0 %v3183_v49 }
 0xe7b   : > { %v3184_v52 = vmul.f32 %v3182_v51, %v3169_v50 }
 0xe7d   : > { %3789 = vmatmul.mubr.f32.vlgmr.msra.gmra.mxu0 %v3184_v52 }
 0xf3d   : > { %v3790_v55 = vpop.f32.mrf.mxu0 }
 0xf3e   : > { %v3280_v39 = vadd.f32 %v3790_v55, %v3486_v54 }
 0xf3f   : > { %v3274_v56 = vpop.f32.mrf.mxu0 }
 0xf40   : > { %v3284_v57 = vadd.f32 %v3280_v39, %v4783_v34  ;;  %v3275_v58 = vadd.f32 %v3486_v54, %v3274_v56 }
 0xf42   : > { %3286 = vst.msk [vmem:[#allocation2 + $0x8] sm:$0xff] %vm591_vm0, %v3284_v57  ;;  %v3283_v59 = vadd.f32 %v3275_v58, %v4787_v36 }
 0xf44   : > { %3285 = vst.msk [vmem:[#allocation2] sm:$0xff] %vm591_vm0, %v3283_v59 }
 0xf49   : > { %v3288_v53 = vld [vmem:[#allocation2 + $0x8] sm:$0xff] }
 0xf4a   : > { %3290 = vst.msk [vmem:[%s583_s0 + $0x8] sm:$0xff] %vm591_vm0, %v3288_v53 }
 0xf4b   : > { %v3287_v34 = vld [vmem:[#allocation2] sm:$0xff] }
 0xf4c   : > { %3289 = vst.msk [vmem:[%s583_s0] sm:$0xff] %vm591_vm0, %v3287_v34 }
 0xf4d   : > { %4082 = shalt.err (!%p4079_p0)
}
 0xf4e   : > { %s4083_s19 = scalar_lea.hbm %s4890_s17, 256  ;;  %s4087_s27 = scalar_lea.hbm %s4998_s21, 512 }
 0xf4f   : > { %p4084_p9 = scmp.ne.s32.totalorder %s4890_s17, %s4083_s19  ;;  %p4088_p3 = scmp.lt.s32.totalorder %s4890_s17, %s4998_s21 }
 0xf50   : > { %p4089_p5 = scmp.lt.s32.totalorder %s4087_s27, %s4083_s19 }
 0xf51   : > { %p4085_p1 = pnand %p4084_p9, %p4999_p12 }
 0xf52   : > { %p4090_p6 = por %p4089_p5, %p4088_p3 }
 0xf53   : > { %p4086_p13 = pneg %p4085_p1 }
 0xf55   : > { %p4091_p10 = pnand %p4090_p6, %p4086_p13 }
 0xf57   : > { %4094 = shalt.err (!%p4091_p10)
}
 0xf58   : > { %s4160_s28 = smov 128  }
 0xf59   : > { %3803 = dma.vmem_to_hbm [thread:$0]  (%p4999_p12), %s4893_s20, 256, %s4890_s17, %s4896_s23, %s4160_s28, %s4160_s28, %s4155_s24  }
 0xf5a PF: > { %s5000_s18 = sld [smem:[#allocation18_spill]] }
 0xf5b   : > { %s5001_s29 = sld [smem:[#allocation16_spill]] }
 0xf5c   : > { %s5002_s22 = sld [smem:[#allocation21_spill]] }
 0xf60   : > { %p3825_p2 = scmp.ge.s32.totalorder %s5000_s18, 2 }
 0xf61   : > { %s3320_s0 = sand.u32 1, %s5001_s29  }
 0xf62   : > { %p5003_p4 = scmp.ne.s32.totalorder %s5002_s22, 0  ;;  %s3321_s19 = scalar_lea.sflag [#allocation8], %s3320_s0 }
 0xf64   : > { %p3816_p7 = pnand %p3825_p2, %p5003_p4 }
 0xf66   : > { %p3817_p8 = pneg %p3816_p7 }
 0xf68   : > { %4120 = dma.done.wait (%p3817_p8), %s3321_s19, 256  }
 0xf69   : > { %4122 = vsyncadd (%p3817_p8), %s3321_s19, 4294967040  ;;  %s5004_s27 = sld [smem:[#allocation19_spill]]  ;;  %s5007_s24 = smov %s4129_s25 }
 0xf6a   : > { %s5005_s1 = sld [smem:[#allocation17_spill]] }
 0xf6b   : > { %s5006_s26 = sld [smem:[#allocation20_spill]] }
 0xf6f   : > { %p29_p11 = scmp.ge.s32.totalorder %s5004_s27, 4  }
 0xf70   : > { %s5008_s25 = smov %s5005_s1 }
 0xf71   :  { %31 = sbr.rel (!%p29_p11) target bundleno = 9 (0x9), region = 145 }
 0xf76   :  { %3326 = vsyncpa [#allocation7], 1 }
 0xf77   :  { %3328 = vsyncpa [#allocation7 + $0x1], 1 }
 0xf78   :  { %3329 = vsyncpa [#allocation10], 1 }
 0xf79   :  { %3330 = vsyncpa [#allocation8], 1 }
 0xf7a   :  { %3332 = vsyncpa [#allocation8 + $0x1], 1 }

// kernel: tpu_custom_call.1
= control target key start
LH: loop header
LB: loop body
LE: loop exit
PB: predicated region body
PF: predicated region fallthrough
CT: control target
= control target key end

     0   :  { %s4937_s0 = inlined_call_operand.vmem [shape: f32[2,16,32], index: 0, kind: input, shape index: {}]   ;;  %s4938_s1 = inlined_call_operand.vmem [shape: f32[1,32], index: 1, kind: input, shape index: {}]   ;;  %s4939_s2 = inlined_call_operand.hbm [shape: f32[1,32], index: 2, kind: input, shape index: {}]   ;;  %s4940_s3 = inlined_call_operand.vmem [shape: f32[32,96], index: 3, kind: input, shape index: {}]   ;;  %s4941_s4 = inlined_call_operand.vmem [shape: f32[32,32], index: 4, kind: input, shape index: {}]   ;;  %s4942_s5 = inlined_call_operand.vmem [shape: f32[1,32], index: 5, kind: input, shape index: {}]   ;;  %s4943_s6 = inlined_call_operand.vmem [shape: f32[1,32], index: 6, kind: input, shape index: {}]   ;;  %s4944_s7 = inlined_call_operand.vmem [shape: f32[1,32], index: 7, kind: input, shape index: {}]   ;;  %s4945_s8 = inlined_call_operand.hbm [shape: f32[32,96], index: 8, kind: input, shape index: {}]   ;;  %s4946_s9 = inlined_call_operand.hbm [shape: f32[32,32], index: 9, kind: input, shape index: {}]   ;;  %s4947_s10 = inlined_call_operand.vmem [shape: f32[1,32], index: 10, kind: input, shape index: {}]   ;;  %s4948_s11 = inlined_call_operand.vmem [shape: f32[1,32], index: 11, kind: input, shape index: {}]   ;;  %s4949_s12 = inlined_call_operand.vmem [shape: f32[1,32], index: 12, kind: input, shape index: {}]   ;;  %s4950_s13 = inlined_call_operand.vmem [shape: f32[32,256], index: 13, kind: input, shape index: {}]   ;;  %s4951_s14 = inlined_call_operand.vmem [shape: f32[1,256], index: 14, kind: input, shape index: {}]   ;;  %s4952_s15 = inlined_call_operand.vmem [shape: f32[128,32], index: 15, kind: input, shape index: {}]   ;;  %s4953_s16 = inlined_call_operand.vmem [shape: f32[1,32], index: 16, kind: input, shape index: {}]   ;;  %s4954_s17 = inlined_call_operand.hbm [shape: f32[2,16,32], index: 17, kind: output, shape index: {}]  }
   0x1   :  { %4974 = sst [smem:[#allocation22_spill]] %s4937_s0 }
   0x2   :  { %4975 = sst [smem:[#allocation23_spill]] %s4938_s1 }
   0x3   :  { %4976 = sst [smem:[#allocation24_spill]] %s4954_s17 }
   0x4   :  { %22 = vsyncpa [#allocation7], 0 }
   0x5   :  { %23 = vsyncpa [#allocation10], 0 }
   0x6   :  { %24 = vsyncpa [#allocation8], 0 }
   0x7   :  { %26 = vsyncpa [#allocation8 + $0x1], 0  ;;  %s4251_s24 = smov 0   ;;  %s4253_s25 = smov 0  }
   0x8   :  { %s4255_s26 = smov 0   ;;  %s4257_s27 = smov 0  }
   0x9 LB: > { %4977 = sst [smem:[#allocation16_spill]] %s4125_s24  ;;  %s4272_s28 = sadd.s32 4294967295, %s4137_s27   ;;  %s4137_s27 = sphi %s4257_s27, %s5004_s27   ;;  %s4133_s26 = sphi %s4255_s26, %s5006_s26   ;;  %s4129_s25 = sphi %s4253_s25, %s5008_s25   ;;  %s4125_s24 = sphi %s4251_s24, %s5007_s24  }
   0xa   : > { %4978 = sst [smem:[#allocation17_spill]] %s4133_s26  ;;  %s3407_s29 = sadd.s32 4294967294, %s4137_s27  }
   0xb   : > { %4979 = sst [smem:[#allocation18_spill]] %s4137_s27  ;;  %s4276_s0 = sadd.s32 1, %s4137_s27  }
   0xc   : > { %4980 = sst [smem:[#allocation19_spill]] %s4276_s0  ;;  %s401_s30 = sadd.s32 1, %s4133_s26 }
   0xd   : > { %s398_s18 = ssub.s32 %s4137_s27, %s4276_s0  ;;  %p411_p0 = scmp.ne.s32.totalorder %s4133_s26, %s4129_s25 }
   0xe   : > { %p399_p1 = scmp.eq.s32.totalorder %s398_s18, 0  ;;  %p412_p2 = scmp.eq.s32.totalorder %s4272_s28, 1 }
   0xf   : > { %p417_p3 = scmp.ne.s32.totalorder %s4129_s25, %s4125_s24  ;;  %p418_p4 = scmp.eq.s32.totalorder %s3407_s29, 1 }
  0x10   : > { %s4287_s19 = scalar_select %p399_p1, %s4133_s26, %s401_s30  }
  0x11   : > { %p4289_p5 = por %p412_p2, %p411_p0  ;;  %p4293_p6 = por %p418_p4, %p417_p3 }
  0x12   : > { %4981 = sst [smem:[#allocation20_spill]] %s4287_s19  ;;  %p3408_p7 = scmp.ge.s32.totalorder %s4137_s27, 1 }
  0x13   : > { %s4982_s1 = scalar_select %p4289_p5, 1, 0 }
  0x14   : > { %s4983_s20 = scalar_select %p4293_p6, 1, 0 }
  0x15   : > { %p425_p8 = scmp.lt.s32.totalorder %s4137_s27, 3  ;;  %p4961_p9 = scmp.eq.s32.totalorder %s4272_s28, 0 }
  0x16   : > { %4984 = sst [smem:[#allocation21_spill]] %s4983_s20  ;;  %s4139_s22 = smov [#allocation9]  }
  0x17   : > { %p4300_p10 = pnand %p3408_p7, %p425_p8  ;;  %s466_s23 = sshll.u32 %s4139_s22, 4  ;;  %s467_s23 = int_to_ptr.vmem [resolvable:$true] %s466_s23 }
  0x18   : > { %s4140_s30 = smov [#allocation6]   ;;  %s4141_s19 = smov [#allocation11]  }
  0x19   : > { %p3805_p11 = pneg %p4300_p10  ;;  %s441_s18 = sshll.u32 %s4140_s30, 4  ;;  %s442_s18 = int_to_ptr.vmem [resolvable:$true] %s441_s18 }
  0x1a   : > { %s479_s26 = sshll.u32 %s4141_s19, 4  ;;  %s4002_s0 = scalar_lea.vmem %s467_s23, 512  ;;  %s480_s26 = int_to_ptr.vmem [resolvable:$true] %s479_s26 }
  0x1b   : > { %p4308_p12 = pnand %p4961_p9, %p3805_p11  ;;  %p4003_p0 = scmp.ne.s32.totalorder %s467_s23, %s4002_s0 }
  0x1c   : > { %p4010_p3 = scmp.lt.s32.totalorder %s467_s23, %s467_s23  ;;  %p4011_p4 = scmp.lt.s32.totalorder %s4002_s0, %s4002_s0 }
  0x1d   : > { %p3993_p13 = pneg %p4308_p12 }
  0x1e   : > { %p4012_p7 = por %p4011_p4, %p4010_p3 }
  0x1f   : > { %p4005_p1 = pnand %p4003_p0, %p3993_p13 }
  0x21   : > { %p4006_p2 = pneg %p4005_p1 }
  0x23   : > { %p4013_p8 = pnand %p4012_p7, %p4006_p2 }
  0x25   : > { %4016 = shalt.err (!%p4013_p8)
}
  0x26   : > { %s4142_s22 = smov 128   ;;  %s4143_s30 = smov 8  }
  0x27   : > { %3811 = dma.hbm_to_vmem [thread:$0]  (!%p4308_p12), %s4945_s8, 512, %s467_s23, [#allocation10], %s4142_s22, %s4142_s22, %s4143_s30  }
  0x28   : > { %s4028_s24 = scalar_lea.vmem %s442_s18, 16  ;;  %s4035_s27 = scalar_lea.vmem %s442_s18, 32 }
  0x29   : > { %p4029_p11 = scmp.ne.s32.totalorder %s442_s18, %s4028_s24  ;;  %p4036_p9 = scmp.lt.s32.totalorder %s442_s18, %s442_s18 }
  0x2a   : > { %p4037_p3 = scmp.lt.s32.totalorder %s4035_s27, %s4028_s24 }
  0x2b   : > { %p4031_p0 = pnand %p4029_p11, %p3993_p13 }
  0x2c   : > { %p4038_p2 = por %p4037_p3, %p4036_p9 }
  0x2d   : > { %p4032_p1 = pneg %p4031_p0 }
  0x2f   : > { %p4039_p4 = pnand %p4038_p2, %p4032_p1 }
  0x31   : > { %4042 = shalt.err (!%p4039_p4)
}
  0x32   : > { %3808 = dma.hbm_to_vmem [thread:$0]  (!%p4308_p12), %s4939_s2, 16, %s442_s18, [#allocation7]  }
  0x33   : > { %s4054_s20 = scalar_lea.vmem %s480_s26, 512  ;;  %p4062_p0 = scmp.lt.s32.totalorder %s480_s26, %s480_s26 }
  0x34   : > { %p4055_p7 = scmp.ne.s32.totalorder %s480_s26, %s4054_s20  ;;  %p4063_p6 = scmp.lt.s32.totalorder %s4054_s20, %s4054_s20 }
  0x36   : > { %p4057_p8 = pnand %p4055_p7, %p3993_p13  ;;  %p4064_p5 = por %p4063_p6, %p4062_p0 }
  0x38   : > { %p4058_p11 = pneg %p4057_p8 }
  0x3a   : > { %p4065_p9 = pnand %p4064_p5, %p4058_p11 }
  0x3c   : > { %4068 = shalt.err (!%p4065_p9)
}
  0x3d   : > { %3814 = dma.hbm_to_vmem [thread:$0]  (!%p4308_p12), %s4946_s9, 512, %s480_s26, [#allocation10], %s4142_s22, %s4142_s22, %s4143_s30  }
  0x3e   : > { %524 = sbr.rel (%p4300_p10) target bundleno = 3930 (0xf5a), region = 88  ;;  %p4987_p1 = scmp.eq.s32.totalorder (!%p4300_p10), %s4272_s28, 0 }
  0x43   : > { %4112 = dma.done.wait (%p4987_p1), [#allocation7], 16   ;;  %p4988_p13 = pmov %p4987_p1 }
  0x44   : > { %p4989_p3 = pmov %p4987_p1 }
  0x45   : > { %4114 = vsyncadd (%p4988_p13), [#allocation7], 4294967280 }
  0x46   : > { %4116 = dma.done.wait (%p4989_p3), [#allocation10], 1024   ;;  %p4990_p5 = pmov %p4987_p1 }
  0x47   : > { %p584_p6 = scmp.lt.s32.totalorder %s4272_s28, 1  ;;  %s4991_s29 = sld [smem:[#allocation22_spill]]  ;;  %vm591_vm0 = vcmask 261120   ;;  %v644_v16 = vld [vmem:[%s4940_s3 + $0x18] sm:$0xff]  ;;  %v643_v17 = vld [vmem:[%s4940_s3 + $0x10] sm:$0xff]  ;;  %v642_v18 = vld [vmem:[%s4940_s3 + $0x8] sm:$0xff] }
  0x48   : > { %4118 = vsyncadd (%p4990_p5), [#allocation10], 4294966272  ;;  %3600 = vmatprep.subr.mxu1 %v644_v16  ;;  %v641_v19 = vld [vmem:[%s4940_s3] sm:$0xff]  ;;  %s4992_s21 = sld [smem:[#allocation23_spill]]  ;;  %v3421_v29 = vld [vmem:[#allocation6] ss:$0 sm:$0xff] }
  0x49   : > { %s585_s17 = scalar_select %p584_p6, %s4272_s28, 1  ;;  %3601 = vmatpush3.msra.mxu1 %v644_v16  ;;  %vm726_vm1 = vcmask 64512   ;;  %vm1203_vm2 = vcmask 130048   ;;  %vm1716_vm3 = vcmask 195584  }
  0x4a   : > { %3602 = vmatprep.subr.mxu1 %v643_v17  ;;  %s4146_s22 = smov 120   ;;  %s4147_s30 = smov 80  }
  0x4b   : > { %s3492_s26 = sshll.u32 %s585_s17, 4  ;;  %3603 = vmatpush3.msra.mxu1 %v643_v17  ;;  %s4148_s19 = smov 112  }
  0x4c   : > { %3604 = vmatprep.subr.mxu1 %v642_v18  ;;  %s4149_s0 = smov 72   ;;  %s4150_s20 = smov 104  }
  0x4d   : > { %s588_s18 = scalar_lea.vmem %s4991_s29, %s3492_s26  ;;  %3605 = vmatpush3.msra.mxu1 %v642_v18  ;;  %s4144_s29 = smov 88  }
  0x4e   : > { %v589_v0 = vld [vmem:[%s588_s18] sm:$0xff]  ;;  %v590_v1 = vld [vmem:[%s588_s18 + $0x8] sm:$0xff]  ;;  %3606 = vmatprep.subr.mxu1 %v641_v19  ;;  %s4145_s18 = smov 96   ;;  %s4970_s24 = smov 64  }
  0x4f   : > { %592 = vst.msk [vmem:[#allocation2] sm:$0xff] %vm591_vm0, %v589_v0  ;;  %593 = vst.msk [vmem:[#allocation2 + $0x8] sm:$0xff] %vm591_vm0, %v590_v1  ;;  %3607 = vmatpush3.msra.mxu1 %v641_v19  ;;  %v3420_v27 = vld [vmem:[%s4992_s21] ss:$0 sm:$0xff]  ;;  %s4968_s27 = smov 48   ;;  %s4966_s17 = smov 56  }
  0x50   : > { %s4964_s26 = smov 40   ;;  %s4972_s23 = smov 24  }
  0x51   : > { %s4998_s21 = sld [smem:[#allocation24_spill]]  ;;  %p4999_p12 = scmp.ne.s32.totalorder %s4982_s1, 0 }
  0x56   : > { %v4355_v2 = vld [vmem:[#allocation2] sm:$0xff]  ;;  %v4357_v3 = vld [vmem:[#allocation2 + $0x8] sm:$0xff] }
  0x57   : > { %v598_v4 = vsel %vm591_vm0, %v4355_v2, 0.0  ;;  %v601_v5 = vsel %vm591_vm0, %v4357_v3, 0.0 }
  0x58   : > { %599 = vadd.xlane.f32.xlu0 %v598_v4 }
  0x5c   : > { %602 = vadd.xlane.f32.xlu0 %v601_v5 }
  0xe1   : > { %v600_v6 = vpop.xlane.xlu0 %599 }
  0xe2   : > { %v605_v7 = vmul.f32 0.03125, %v600_v6 }
  0xe4   : > { %v607_v8 = vsub.f32 %v4355_v2, %v605_v7 }
  0xe5   : > { %v603_v9 = vpop.xlane.xlu0 %602 }
  0xe6   : > { %v606_v10 = vmul.f32 0.03125, %v603_v9  ;;  %v609_v11 = vmul.f32 %v607_v8, %v607_v8 }
  0xe8   : > { %v608_v12 = vsub.f32 %v4357_v3, %v606_v10  ;;  %v611_v13 = vsel %vm591_vm0, %v609_v11, 0.0 }
  0xe9   : > { %612 = vadd.xlane.f32.xlu1 %v611_v13 }
  0xea   : > { %v610_v14 = vmul.f32 %v608_v12, %v608_v12 }
  0xec   : > { %v614_v15 = vsel %vm591_vm0, %v610_v14, 0.0 }
  0xed   : > { %615 = vadd.xlane.f32.xlu1 %v614_v15 }
 0x172   : > { %v613_v20 = vpop.xlane.xlu1 %612 }
 0x173   : > { %v617_v21 = vmul.f32 0.03125, %v613_v20 }
 0x175   : > { %v619_v22 = vadd.f32 1e-05, %v617_v21 }
 0x176   : > { %v616_v23 = vpop.xlane.xlu1 %615 }
 0x177   : > { %3879 = vrsqrt.f32 %v619_v22  ;;  %v618_v24 = vmul.f32 0.03125, %v616_v23 }
 0x179   : > { %v620_v25 = vadd.f32 1e-05, %v618_v24 }
 0x17b   : > { %3881 = vrsqrt.f32 %v620_v25 }
 0x184   : > { %v3880_v26 = vpop.eup %3879 }
 0x185   : > { %v623_v28 = vmul.f32 %v3880_v26, %v607_v8 }
 0x187   : > { %v631_v30 = vmul.f32 %v3420_v27, %v623_v28 }
 0x188   : > { %v3882_v31 = vpop.eup %3881 }
 0x189   : > { %v624_v32 = vmul.f32 %v3882_v31, %v608_v12  ;;  %v639_v33 = vadd.f32 %v3421_v29, %v631_v30 }
 0x18b   : > { %v632_v34 = vmul.f32 %v3420_v27, %v624_v32  ;;  %3608 = vmatprep.mubr.msk.f32.mxu1 %vm591_vm0, %v639_v33 }
 0x18d   : > { %v640_v35 = vadd.f32 %v3421_v29, %v632_v34 }
 0x18f   : > { %3609 = vmatmul.mubr.msk.f32.vlgmr.msra.gmra.mxu1 %vm591_vm0, %v640_v35 }
 0x24f   : > { %v3610_v36 = vpop.f32.mrf.mxu1 }
 0x250   : > { %759 = vrot.lane.b32.xlu1 %v3610_v36, %s4144_s29  ;;  %733 = vrot.lane.b32.xlu0 %v3610_v36, %s4145_s18  ;;  %728 = vst.msk [vmem:[#allocation3 + $0x8] sm:$0xff] %vm726_vm1, %v3610_v36 }
 0x251   : > { %v4387_v37 = vpop.f32.mrf.mxu1 }
 0x252   : > { %727 = vst.msk [vmem:[#allocation3] sm:$0xff] %vm726_vm1, %v4387_v37 }
 0x254   : > { %749 = vrot.lane.b32.xlu0 %v3610_v36, %s4146_s22  ;;  %731 = vrot.lane.b32.xlu1 %v4387_v37, %s4145_s18 }
 0x257   : > { %v832_v52 = vld [vmem:[#allocation3 + $0x8] sm:$0xff] }
 0x258   : > { %747 = vrot.lane.b32.xlu0 %v4387_v37, %s4146_s22  ;;  %787 = vrot.lane.b32.xlu1 %v3610_v36, %s4147_s30 }
 0x259   : > { %v831_v38 = vld [vmem:[#allocation3] sm:$0xff] }
 0x25a   : > { %3615 = vmatprep.mubr.msk.f32.mxu1 %vm726_vm1, %v831_v38 }
 0x25c   : > { %785 = vrot.lane.b32.xlu0 %v4387_v37, %s4147_s30  ;;  %757 = vrot.lane.b32.xlu1 %v4387_v37, %s4144_s29 }
 0x260   : > { %775 = vrot.lane.b32.xlu0 %v4387_v37, %s4148_s19  ;;  %815 = vrot.lane.b32.xlu1 %v3610_v36, %s4149_s0 }
 0x264   : > { %803 = vrot.lane.b32.xlu0 %v4387_v37, %s4150_s20  ;;  %777 = vrot.lane.b32.xlu1 %v3610_v36, %s4148_s19 }
 0x268   : > { %741 = vrot.lane.b32.xlu0 %v3610_v36, %s4970_s24  ;;  %813 = vrot.lane.b32.xlu1 %v4387_v37, %s4149_s0 }
 0x26c   : > { %796 = vrot.lane.b32.xlu0 %v3610_v36, %s4968_s27  ;;  %805 = vrot.lane.b32.xlu1 %v3610_v36, %s4150_s20 }
 0x270   : > { %768 = vrot.lane.b32.xlu1 %v3610_v36, %s4966_s17 }
 0x274   : > { %824 = vrot.lane.b32.xlu1 %v3610_v36, %s4964_s26 }
 0x278   : > { %739 = vrot.lane.b32.xlu1 %v4387_v37, %s4970_s24  ;;  %s4155_s24 = smov 8  }
 0x27c   : > { %766 = vrot.lane.b32.xlu1 %v4387_v37, %s4966_s17 }
 0x2c2   : > { %v760_v39 = vpop.permute.xlu1 %759  ;;  %v734_v40 = vpop.permute.xlu0 %733 }
 0x2c3   : > { %765 = vst.msk [vmem:[#allocation4 + $0x18] sm:$0xff] %vm726_vm1, %v760_v39  ;;  %738 = vst.msk [vmem:[#allocation4 + $0x8] sm:$0xff] %vm726_vm1, %v734_v40 }
 0x2c6   : > { %v750_v41 = vpop.permute.xlu0 %749  ;;  %v732_v42 = vpop.permute.xlu1 %731 }
 0x2c7   : > { %756 = vst.msk [vmem:[#allocation3 + $0x18] sm:$0xff] %vm726_vm1, %v750_v41  ;;  %737 = vst.msk [vmem:[#allocation4] sm:$0xff] %vm726_vm1, %v732_v42 }
 0x2ca   : > { %v748_v43 = vpop.permute.xlu0 %747  ;;  %v788_v44 = vpop.permute.xlu1 %787  ;;  %v840_v45 = vld [vmem:[#allocation4 + $0x8] sm:$0xff]  ;;  %v842_v49 = vld [vmem:[#allocation4 + $0x18] sm:$0xff] }
 0x2cb   : > { %755 = vst.msk [vmem:[#allocation3 + $0x10] sm:$0xff] %vm726_vm1, %v748_v43  ;;  %793 = vst.msk [vmem:[#allocation4 + $0x28] sm:$0xff] %vm726_vm1, %v788_v44  ;;  %3611 = vmatprep.subr.msk.mxu1 %vm726_vm1, %v840_v45 }
 0x2cc   : > { %3612 = vmatpush3.xpose.msk.msra.mxu1 %vm726_vm1, %v840_v45 }
 0x2ce   : > { %v786_v46 = vpop.permute.xlu0 %785  ;;  %v758_v47 = vpop.permute.xlu1 %757  ;;  %v839_v48 = vld [vmem:[#allocation4] sm:$0xff]  ;;  %v834_v60 = vld [vmem:[#allocation3 + $0x18] sm:$0xff] }
 0x2cf   : > { %792 = vst.msk [vmem:[#allocation4 + $0x20] sm:$0xff] %vm726_vm1, %v786_v46  ;;  %764 = vst.msk [vmem:[#allocation4 + $0x10] sm:$0xff] %vm726_vm1, %v758_v47  ;;  %3613 = vmatprep.subr.msk.mxu1 %vm726_vm1, %v839_v48 }
 0x2d0   : > { %3614 = vmatpush3.xpose.msk.msra.mxu1 %vm726_vm1, %v839_v48 }
 0x2d1   : > { %3618 = vmatprep.subr.msk.mxu1 %vm726_vm1, %v842_v49 }
 0x2d2   : > { %v776_v50 = vpop.permute.xlu0 %775  ;;  %v816_v51 = vpop.permute.xlu1 %815  ;;  %v833_v53 = vld [vmem:[#allocation3 + $0x10] sm:$0xff]  ;;  %v844_v57 = vld [vmem:[#allocation4 + $0x28] sm:$0xff] }
 0x2d3   : > { %783 = vst.msk [vmem:[#allocation3 + $0x20] sm:$0xff] %vm726_vm1, %v776_v50  ;;  %821 = vst.msk [vmem:[#allocation4 + $0x38] sm:$0xff] %vm726_vm1, %v816_v51  ;;  %3616 = vmatmul.mubr.msk.f32.vlgmr.msra.gmra.mxu1 %vm726_vm1, %v832_v52 }
 0x2d4   : > { %3619 = vmatpush3.xpose.msk.msra.mxu1 %vm726_vm1, %v842_v49  ;;  %3622 = vmatprep.mubr.msk.f32.mxu1 %vm726_vm1, %v833_v53 }
 0x2d6   : > { %v804_v54 = vpop.permute.xlu0 %803  ;;  %v778_v55 = vpop.permute.xlu1 %777  ;;  %v841_v56 = vld [vmem:[#allocation4 + $0x10] sm:$0xff]  ;;  %v843_v63 = vld [vmem:[#allocation4 + $0x20] sm:$0xff] }
 0x2d7   : > { %811 = vst.msk [vmem:[#allocation3 + $0x30] sm:$0xff] %vm726_vm1, %v804_v54  ;;  %784 = vst.msk [vmem:[#allocation3 + $0x28] sm:$0xff] %vm726_vm1, %v778_v55  ;;  %3620 = vmatprep.subr.msk.mxu1 %vm726_vm1, %v841_v56 }
 0x2d8   : > { %3621 = vmatpush3.xpose.msk.msra.mxu1 %vm726_vm1, %v841_v56 }
 0x2d9   : > { %3625 = vmatprep.subr.msk.mxu1 %vm726_vm1, %v844_v57 }
 0x2da   : > { %v742_v58 = vpop.permute.xlu0 %741  ;;  %v814_v59 = vpop.permute.xlu1 %813  ;;  %v846_v61 = vld [vmem:[#allocation4 + $0x38] sm:$0xff]  ;;  %v835_v62 = vld [vmem:[#allocation3 + $0x20] sm:$0xff] }
 0x2db   : > { %746 = vst.msk [vmem:[#allocation5 + $0x8] sm:$0xff] %vm726_vm1, %v742_v58  ;;  %820 = vst.msk [vmem:[#allocation4 + $0x30] sm:$0xff] %vm726_vm1, %v814_v59  ;;  %3623 = vmatmul.mubr.msk.f32.vlgmr.msra.gmra.mxu1 %vm726_vm1, %v834_v60  ;;  %3632 = vmatprep.subr.msk.mxu0 %vm726_vm1, %v846_v61 }
 0x2dc   : > { %3626 = vmatpush3.xpose.msk.msra.mxu1 %vm726_vm1, %v844_v57  ;;  %3629 = vmatprep.mubr.msk.f32.mxu1 %vm726_vm1, %v835_v62 }
 0x2dd   : > { %3633 = vmatpush3.xpose.msk.msra.mxu0 %vm726_vm1, %v846_v61  ;;  %3627 = vmatprep.subr.msk.mxu1 %vm726_vm1, %v843_v63 }
 0x2de   : > { %v797_v0 = vpop.permute.xlu0 %796  ;;  %v806_v1 = vpop.permute.xlu1 %805  ;;  %v837_v4 = vld [vmem:[#allocation3 + $0x30] sm:$0xff]  ;;  %v836_v6 = vld [vmem:[#allocation3 + $0x28] sm:$0xff] }
 0x2df   : > { %802 = vst.msk [vmem:[#allocation5 + $0x28] sm:$0xff] %vm726_vm1, %v797_v0  ;;  %812 = vst.msk [vmem:[#allocation3 + $0x38] sm:$0xff] %vm726_vm1, %v806_v1  ;;  %3636 = vmatprep.mubr.msk.f32.mxu0 %vm726_vm1, %v837_v4 }
 0x2e0   : > { %3628 = vmatpush3.xpose.msk.msra.mxu1 %vm726_vm1, %v843_v63 }
 0x2e2   : > { %v769_v5 = vpop.permute.xlu1 %768  ;;  %v845_v7 = vld [vmem:[#allocation4 + $0x30] sm:$0xff]  ;;  %v848_v8 = vld [vmem:[#allocation5 + $0x8] sm:$0xff] }
 0x2e3   : > { %774 = vst.msk [vmem:[#allocation5 + $0x18] sm:$0xff] %vm726_vm1, %v769_v5  ;;  %3630 = vmatmul.mubr.msk.f32.vlgmr.msra.gmra.mxu1 %vm726_vm1, %v836_v6  ;;  %3634 = vmatprep.subr.msk.mxu0 %vm726_vm1, %v845_v7 }
 0x2e4   : > { %3639 = vmatprep.subr.mxu1 %v848_v8  ;;  %3635 = vmatpush3.xpose.msk.msra.mxu0 %vm726_vm1, %v845_v7 }
 0x2e5   : > { %3640 = vmatpush3.msra.mxu1 %v848_v8 }
 0x2e6   : > { %v825_v9 = vpop.permute.xlu1 %824  ;;  %v838_v10 = vld [vmem:[#allocation3 + $0x38] sm:$0xff]  ;;  %v852_v11 = vld [vmem:[#allocation5 + $0x28] sm:$0xff] }
 0x2e7   : > { %830 = vst.msk [vmem:[#allocation5 + $0x38] sm:$0xff] %vm726_vm1, %v825_v9  ;;  %3637 = vmatmul.mubr.msk.f32.vlgmr.msra.gmra.mxu0 %vm726_vm1, %v838_v10  ;;  %3653 = vmatprep.subr.mxu0 %v852_v11 }
 0x2e8   : > { %3654 = vmatpush3.msra.mxu0 %v852_v11 }
 0x2ea   : > { %v740_v12 = vpop.permute.xlu1 %739  ;;  %v850_v15 = vld [vmem:[#allocation5 + $0x18] sm:$0xff] }
 0x2eb   : > { %745 = vst.msk [vmem:[#allocation5] sm:$0xff] %vm726_vm1, %v740_v12 }
 0x2ee   : > { %v767_v13 = vpop.permute.xlu1 %766  ;;  %v854_v45 = vld [vmem:[#allocation5 + $0x38] sm:$0xff] }
 0x2ef   : > { %773 = vst.msk [vmem:[#allocation5 + $0x10] sm:$0xff] %vm726_vm1, %v767_v13 }
 0x2f2   : > { %v847_v14 = vld [vmem:[#allocation5] sm:$0xff] }
 0x2f3   : > { %3641 = vmatprep.subr.mxu1 %v847_v14 }
 0x2f4   : > { %3642 = vmatpush3.msra.mxu1 %v847_v14 }
 0x2f5   : > { %3646 = vmatprep.subr.mxu1 %v850_v15 }
 0x2f6   : > { %v849_v42 = vld [vmem:[#allocation5 + $0x10] sm:$0xff] }
 0x393   : > { %v3617_v16 = vpop.f32.mrf.mxu1 }
 0x394   : > { %v1207_v17 = vsel %vm1203_vm2, %v3617_v16, -inf }
 0x395   : > { %1208 = vmax.xlane.f32.xlu1 %v1207_v17  ;;  %v933_v18 = vpop.f32.mrf.mxu1 }
 0x396   : > { %v1204_v19 = vsel %vm1203_vm2, %v933_v18, -inf }
 0x397   : > { %1205 = vmax.xlane.f32.xlu0 %v1204_v19 }
 0x39b   : > { %v3624_v20 = vpop.f32.mrf.mxu1 }
 0x39c   : > { %v1213_v28 = vsel %vm1203_vm2, %v3624_v20, -inf }
 0x39d   : > { %v1020_v21 = vpop.f32.mrf.mxu1 }
 0x39e   : > { %v1210_v29 = vsel %vm1203_vm2, %v1020_v21, -inf }
 0x3a3   : > { %v3631_v24 = vpop.f32.mrf.mxu1 }
 0x3a4   : > { %v1219_v27 = vsel %vm1203_vm2, %v3631_v24, -inf }
 0x3a5   : > { %v1107_v30 = vpop.f32.mrf.mxu1 }
 0x3a6   : > { %v1216_v31 = vsel %vm1203_vm2, %v1107_v30, -inf }
 0x3a7   : > { %v3638_v22 = vpop.f32.mrf.mxu0 }
 0x3a8   : > { %v1225_v23 = vsel %vm1203_vm2, %v3638_v22, -inf }
 0x3a9   : > { %v1194_v25 = vpop.f32.mrf.mxu0  ;;  %1226 = vmax.xlane.f32.xlu1 %v1225_v23 }
 0x3aa   : > { %v1222_v26 = vsel %vm1203_vm2, %v1194_v25, -inf }
 0x3ab   : > { %1223 = vmax.xlane.f32.xlu0 %v1222_v26 }
 0x3ad   : > { %1220 = vmax.xlane.f32.xlu1 %v1219_v27 }
 0x3af   : > { %1214 = vmax.xlane.f32.xlu0 %v1213_v28 }
 0x3b3   : > { %1211 = vmax.xlane.f32.xlu0 %v1210_v29 }
 0x3b7   : > { %1217 = vmax.xlane.f32.xlu0 %v1216_v31 }
 0x3be   : > { %822 = vrot.lane.b32.xlu1 %v4387_v37, %s4964_s26 }
 0x3cd   : > { %794 = vrot.lane.b32.xlu0 %v4387_v37, %s4968_s27  ;;  %s4156_s27 = smov 16  }
 0x41e   : > { %v4474_v32 = vpop.xlane.xlu1 %1208 }
 0x41f   : > { %v1253_v33 = vsub.f32 %v3617_v16, %v4474_v32  ;;  %v1229_v16 = vsub.f32 -inf, %v4474_v32 }
 0x420   : > { %v4477_v34 = vpop.xlane.xlu0 %1205 }
 0x421   : > { %v1252_v35 = vsub.f32 %v933_v18, %v4477_v34  ;;  %v1262_v36 = vmul.f32 1.442695, %v1253_v33  ;;  %v1238_v17 = vmul.f32 1.442695, %v1229_v16  ;;  %v1228_v18 = vsub.f32 -inf, %v4477_v34 }
 0x423   : > { %v1260_v38 = vmul.f32 1.442695, %v1252_v35  ;;  %v1236_v19 = vmul.f32 1.442695, %v1228_v18 }
 0x425   : > { %3883 = vpow2.f32 %v1260_v38 }
 0x426   : > { %3885 = vpow2.f32 %v1262_v36 }
 0x432   : > { %v4480_v39 = vpop.xlane.xlu1 %1226  ;;  %v4482_v40 = vpop.eup %3883 }
 0x433   : > { %v3886_v41 = vpop.eup %3885  ;;  %3643 = vmatprep.mubr.msk.f32.mxu1 %vm1203_vm2, %v4482_v40  ;;  %v1259_v44 = vsub.f32 %v3638_v22, %v4480_v39 }
 0x434   : > { %v4486_v37 = vpop.xlane.xlu0 %1223  ;;  %3644 = vmatmul.mubr.msk.f32.vlgmr.msra.gmra.mxu1 %vm1203_vm2, %v3886_v41  ;;  %v1287_v11 = vsel %vm1203_vm2, %v3886_v41, 0.0 }
 0x435   : > { %3647 = vmatpush3.msra.mxu1 %v850_v15  ;;  %v1274_v50 = vmul.f32 1.442695, %v1259_v44  ;;  %v1258_v51 = vsub.f32 %v1194_v25, %v4486_v37  ;;  %v1284_v15 = vsel %vm1203_vm2, %v4482_v40, 0.0  ;;  %v1234_v32 = vsub.f32 -inf, %v4486_v37 }
 0x436   : > { %v4489_v43 = vpop.xlane.xlu1 %1220  ;;  %3648 = vmatprep.subr.mxu1 %v849_v42 }
 0x437   : > { %3649 = vmatpush3.msra.mxu1 %v849_v42  ;;  %v1257_v53 = vsub.f32 %v3631_v24, %v4489_v43  ;;  %v1272_v56 = vmul.f32 1.442695, %v1258_v51  ;;  %v1233_v31 = vsub.f32 -inf, %v4489_v43  ;;  %v1248_v38 = vmul.f32 1.442695, %v1234_v32  ;;  %v1720_v32 = vld [vmem:[%s4941_s4 + $0x8] sm:$0xff] }
 0x438   : > { %v4492_v46 = vpop.xlane.xlu0 %1214  ;;  %3660 = vmatprep.subr.mxu1 %v854_v45  ;;  %v1235_v42 = vsub.f32 -inf, %v4480_v39 }
 0x439   : > { %v1255_v47 = vsub.f32 %v3624_v20, %v4492_v46  ;;  %v1270_v58 = vmul.f32 1.442695, %v1257_v53  ;;  %v1231_v24 = vsub.f32 -inf, %v4492_v46  ;;  %v1246_v35 = vmul.f32 1.442695, %v1233_v31 }
 0x43a   : > { %v823_v48 = vpop.permute.xlu1 %822 }
 0x43b   : > { %v1266_v49 = vmul.f32 1.442695, %v1255_v47  ;;  %829 = vst.msk [vmem:[#allocation5 + $0x30] sm:$0xff] %vm726_vm1, %v823_v48  ;;  %v1250_v47 = vmul.f32 1.442695, %v1235_v42 }
 0x43c   : > { %v4497_v52 = vpop.xlane.xlu0 %1211 }
 0x43d   : > { %v1254_v54 = vsub.f32 %v1020_v21, %v4497_v52  ;;  %3887 = vpow2.f32 %v1266_v49  ;;  %v1230_v26 = vsub.f32 -inf, %v4497_v52 }
 0x43e   : > { %3889 = vpow2.f32 %v1274_v50 }
 0x43f   : > { %v1264_v55 = vmul.f32 1.442695, %v1254_v54  ;;  %v1240_v33 = vmul.f32 1.442695, %v1230_v26 }
 0x440   : > { %v4501_v57 = vpop.xlane.xlu0 %1217 }
 0x441   : > { %v1256_v59 = vsub.f32 %v1107_v30, %v4501_v57  ;;  %3891 = vpow2.f32 %v1264_v55  ;;  %v1242_v30 = vmul.f32 1.442695, %v1231_v24  ;;  %v1232_v36 = vsub.f32 -inf, %v4501_v57  ;;  %v1722_v24 = vld [vmem:[%s4941_s4 + $0x18] sm:$0xff] }
 0x442   : > { %3893 = vpow2.f32 %v1272_v56  ;;  %v853_v9 = vld [vmem:[#allocation5 + $0x30] sm:$0xff] }
 0x443   : > { %v1268_v60 = vmul.f32 1.442695, %v1256_v59  ;;  %3895 = vpow2.f32 %v1270_v58  ;;  %v1244_v44 = vmul.f32 1.442695, %v1232_v36 }
 0x444   : > { %v795_v61 = vpop.permute.xlu0 %794 }
 0x445   : > { %801 = vst.msk [vmem:[#allocation5 + $0x20] sm:$0xff] %vm726_vm1, %v795_v61  ;;  %3897 = vpow2.f32 %v1268_v60 }
 0x446   : > { %3899 = vpow2.f32 %v1238_v17 }
 0x447   : > { %3901 = vpow2.f32 %v1236_v19 }
 0x44a   : > { %v3888_v62 = vpop.eup %3887 }
 0x44b   : > { %v1293_v63 = vsel %vm1203_vm2, %v3888_v62, 0.0  ;;  %v3890_v1 = vpop.eup %3889 }
 0x44c   : > { %v851_v0 = vld [vmem:[#allocation5 + $0x20] sm:$0xff]  ;;  %1294 = vadd.xlane.f32.xlu1 %v1293_v63  ;;  %v1305_v5 = vsel %vm1203_vm2, %v3890_v1, 0.0 }
 0x44d   : > { %3655 = vmatprep.subr.mxu0 %v851_v0 }
 0x44e   : > { %3656 = vmatpush3.msra.mxu0 %v851_v0  ;;  %v3892_v4 = vpop.eup %3891 }
 0x44f   : > { %3650 = vmatprep.mubr.msk.f32.mxu1 %vm1203_vm2, %v3892_v4  ;;  %v1290_v6 = vsel %vm1203_vm2, %v3892_v4, 0.0  ;;  %v3894_v7 = vpop.eup %3893  ;;  %3667 = vmatprep.subr.mxu0 %v1722_v24 }
 0x450   : > { %3651 = vmatmul.mubr.msk.f32.vlgmr.msra.gmra.mxu1 %vm1203_vm2, %v3888_v62  ;;  %1306 = vadd.xlane.f32.xlu1 %v1305_v5  ;;  %v3896_v8 = vpop.eup %3895  ;;  %v1302_v14 = vsel %vm1203_vm2, %v3894_v7, 0.0 }
 0x451   : > { %3661 = vmatpush3.msra.mxu1 %v854_v45  ;;  %1291 = vadd.xlane.f32.xlu0 %v1290_v6  ;;  %v1299_v12 = vsel %vm1203_vm2, %v3896_v8, 0.0 }
 0x452   : > { %v3898_v10 = vpop.eup %3897  ;;  %3662 = vmatprep.subr.mxu1 %v853_v9  ;;  %3664 = vmatprep.mubr.msk.f32.mxu1 %vm1203_vm2, %v3894_v7 }
 0x453   : > { %3663 = vmatpush3.msra.mxu1 %v853_v9  ;;  %3657 = vmatprep.mubr.msk.f32.mxu0 %vm1203_vm2, %v3898_v10  ;;  %v1296_v13 = vsel %vm1203_vm2, %v3898_v10, 0.0  ;;  %v3900_v21 = vpop.eup %3899 }
 0x454   : > { %1288 = vadd.xlane.f32.xlu1 %v1287_v11  ;;  %3665 = vmatmul.mubr.msk.f32.vlgmr.msra.gmra.mxu1 %vm1203_vm2, %v3890_v1  ;;  %v1277_v25 = vmul.f32 0.0, %v3900_v21  ;;  %v3902_v40 = vpop.eup %3901 }
 0x455   : > { %1300 = vadd.xlane.f32.xlu0 %v1299_v12  ;;  %3658 = vmatmul.mubr.msk.f32.vlgmr.msra.gmra.mxu0 %vm1203_vm2, %v3896_v8  ;;  %v1276_v45 = vmul.f32 0.0, %v3902_v40 }
 0x456   : > { %3668 = vmatpush3.msra.mxu0 %v1722_v24 }
 0x459   : > { %1297 = vadd.xlane.f32.xlu0 %v1296_v13 }
 0x45d   : > { %1303 = vadd.xlane.f32.xlu0 %v1302_v14 }
 0x461   : > { %1285 = vadd.xlane.f32.xlu0 %v1284_v15 }
 0x4d5   : > { %v1295_v20 = vpop.xlane.xlu1 %1294 }
 0x4d9   : > { %v4522_v22 = vpop.xlane.xlu1 %1306 }
 0x4da   : > { %v1292_v23 = vpop.xlane.xlu0 %1291 }
 0x4dd   : > { %v1289_v27 = vpop.xlane.xlu1 %1288 }
 0x4de   : > { %v1309_v28 = vadd.f32 %v1289_v27, %v1277_v25  ;;  %v1301_v29 = vpop.xlane.xlu0 %1300 }
 0x4e0   : > { %3903 = vrcp.f32 %v1309_v28 }
 0x4e1   : > { %3905 = vpow2.f32 %v1242_v30 }
 0x4e2   : > { %v1298_v34 = vpop.xlane.xlu0 %1297  ;;  %3907 = vpow2.f32 %v1240_v33 }
 0x4e3   : > { %3909 = vpow2.f32 %v1246_v35 }
 0x4e4   : > { %3911 = vpow2.f32 %v1248_v38 }
 0x4e5   : > { %3913 = vpow2.f32 %v1244_v44  ;;  %v1719_v44 = vld [vmem:[%s4941_s4] sm:$0xff] }
 0x4e6   : > { %v1304_v41 = vpop.xlane.xlu0 %1303 }
 0x4ea   : > { %v1286_v43 = vpop.xlane.xlu0 %1285 }
 0x4eb   : > { %v1308_v46 = vadd.f32 %v1286_v43, %v1276_v45 }
 0x4ed   : > { %v3904_v37 = vpop.eup %3903  ;;  %3915 = vrcp.f32 %v1308_v46 }
 0x4ee   : > { %v1657_v48 = vmul.f32 %v3904_v37, %v1309_v28  ;;  %v3906_v49 = vpop.eup %3905  ;;  %3917 = vpow2.f32 %v1250_v47 }
 0x4ef   : > { %v3908_v51 = vpop.eup %3907  ;;  %v1279_v52 = vmul.f32 0.0, %v3906_v49 }
 0x4f0   : > { %v1665_v50 = vsub.f32 2.0, %v1657_v48  ;;  %v3910_v54 = vpop.eup %3909  ;;  %v1278_v39 = vmul.f32 0.0, %v3908_v51 }
 0x4f1   : > { %v1311_v55 = vadd.f32 %v1295_v20, %v1279_v52  ;;  %v3912_v58 = vpop.eup %3911  ;;  %v1281_v63 = vmul.f32 0.0, %v3910_v54 }
 0x4f2   : > { %v1673_v57 = vmul.f32 %v3904_v37, %v1665_v50  ;;  %v1310_v60 = vadd.f32 %v1292_v23, %v1278_v39  ;;  %v3914_v0 = vpop.eup %3913  ;;  %v4532_v1 = vmul.f32 0.0, %v3912_v58 }
 0x4f3   : > { %3919 = vrcp.f32 %v1311_v55  ;;  %v1313_v5 = vadd.f32 %v1301_v29, %v1281_v63  ;;  %v1280_v8 = vmul.f32 0.0, %v3914_v0 }
 0x4f4   : > { %v3645_v53 = vpop.f32.mrf.mxu1  ;;  %3921 = vrcp.f32 %v1310_v60  ;;  %v1314_v6 = vadd.f32 %v1304_v41, %v4532_v1 }
 0x4f5   : > { %v1641_v56 = vadd.f32 %v3645_v53, %v1277_v25  ;;  %3923 = vrcp.f32 %v1313_v5  ;;  %v1312_v11 = vadd.f32 %v1298_v34, %v1280_v8  ;;  %v1721_v25 = vld [vmem:[%s4941_s4 + $0x10] sm:$0xff] }
 0x4f6   : > { %v1388_v59 = vpop.f32.mrf.mxu1  ;;  %3925 = vrcp.f32 %v1314_v6  ;;  %3669 = vmatprep.subr.mxu0 %v1721_v25 }
 0x4f7   : > { %v4530_v61 = vmul.f32 %v1673_v57, %v1641_v56  ;;  %v1640_v62 = vadd.f32 %v1388_v59, %v1276_v45  ;;  %3927 = vrcp.f32 %v1312_v11  ;;  %3670 = vmatpush3.msra.mxu0 %v1721_v25 }
 0x4f8   : > { %3671 = vmatprep.subr.mxu0 %v1720_v32 }
 0x4f9   : > { %3672 = vmatpush3.msra.mxu0 %v1720_v32  ;;  %v1865_v32 = vld [vmem:[#allocation9 + $0x10] sm:$0xff] }
 0x4fa   : > { %v3916_v4 = vpop.eup %3915  ;;  %3673 = vmatprep.subr.mxu0 %v1719_v44 }
 0x4fb   : > { %v1656_v7 = vmul.f32 %v3916_v4, %v1308_v46  ;;  %v3918_v9 = vpop.eup %3917  ;;  %3674 = vmatpush3.msra.mxu0 %v1719_v44 }
 0x4fc   : > { %v1283_v13 = vmul.f32 0.0, %v3918_v9 }
 0x4fd   : > { %v1664_v10 = vsub.f32 2.0, %v1656_v7 }
 0x4fe   : > { %v1315_v15 = vadd.f32 %v4522_v22, %v1283_v13 }
 0x4ff   : > { %v1672_v12 = vmul.f32 %v3916_v4, %v1664_v10 }
 0x500   : > { %v3920_v16 = vpop.eup %3919  ;;  %3929 = vrcp.f32 %v1315_v15 }
 0x501   : > { %v4535_v14 = vmul.f32 %v1672_v12, %v1640_v62  ;;  %v3922_v17 = vpop.eup %3921  ;;  %v1659_v18 = vmul.f32 %v3920_v16, %v1311_v55 }
 0x502   : > { %v3924_v19 = vpop.eup %3923  ;;  %v1658_v20 = vmul.f32 %v3922_v17, %v1310_v60 }
 0x503   : > { %v3926_v21 = vpop.eup %3925  ;;  %v1667_v23 = vsub.f32 2.0, %v1659_v18  ;;  %v1661_v26 = vmul.f32 %v3924_v19, %v1313_v5 }
 0x504   : > { %v3928_v22 = vpop.eup %3927  ;;  %v1666_v27 = vsub.f32 2.0, %v1658_v20  ;;  %v1662_v28 = vmul.f32 %v3926_v21, %v1314_v6 }
 0x505   : > { %v1675_v31 = vmul.f32 %v3920_v16, %v1667_v23  ;;  %v1669_v33 = vsub.f32 2.0, %v1661_v26  ;;  %v1660_v34 = vmul.f32 %v3928_v22, %v1312_v11 }
 0x506   : > { %v1670_v38 = vsub.f32 2.0, %v1662_v28  ;;  %v1674_v42 = vmul.f32 %v3922_v17, %v1666_v27 }
 0x507   : > { %v1668_v37 = vsub.f32 2.0, %v1660_v34  ;;  %v1677_v49 = vmul.f32 %v3924_v19, %v1669_v33  ;;  %v1864_v33 = vld [vmem:[#allocation9 + $0x8] sm:$0xff]  ;;  %v1863_v34 = vld [vmem:[#allocation9] sm:$0xff] }
 0x508   : > { %v1678_v53 = vmul.f32 %v3926_v21, %v1670_v38 }
 0x509   : > { %v1676_v57 = vmul.f32 %v3928_v22, %v1668_v37 }
 0x50d   : > { %v3930_v36 = vpop.eup %3929 }
 0x50e   : > { %v1663_v47 = vmul.f32 %v3930_v36, %v1315_v15 }
 0x510   : > { %v3652_v29 = vpop.f32.mrf.mxu1  ;;  %v1671_v56 = vsub.f32 2.0, %v1663_v47 }
 0x511   : > { %v1643_v30 = vadd.f32 %v3652_v29, %v1279_v52 }
 0x512   : > { %v1469_v35 = vpop.f32.mrf.mxu1  ;;  %v1679_v60 = vmul.f32 %v3930_v36, %v1671_v56 }
 0x513   : > { %v1683_v40 = vmul.f32 %v1675_v31, %v1643_v30  ;;  %v1642_v41 = vadd.f32 %v1469_v35, %v1278_v39  ;;  %v1866_v31 = vld [vmem:[#allocation9 + $0x18] sm:$0xff] }
 0x514   : > { %v3666_v45 = vpop.f32.mrf.mxu1  ;;  %3678 = vmatprep.subr.mxu1 %v1866_v31 }
 0x515   : > { %v1682_v43 = vmul.f32 %v1674_v42, %v1642_v41  ;;  %v3659_v46 = vpop.f32.mrf.mxu0  ;;  %1692 = vrot.lane.b32.xlu1 %v1683_v40, %s4155_s24  ;;  %v1647_v58 = vadd.f32 %v3666_v45, %v1283_v13  ;;  %v3448_v13 = vld [vmem:[%s4942_s5] ss:$0 sm:$0xff]  ;;  %3679 = vmatpush3.msra.mxu1 %v1866_v31 }
 0x516   : > { %v1645_v48 = vadd.f32 %v3659_v46, %v1281_v63  ;;  %v1631_v50 = vpop.f32.mrf.mxu1  ;;  %3680 = vmatprep.subr.mxu1 %v1865_v32  ;;  %v3451_v45 = vld [vmem:[%s4943_s6] ss:$0 sm:$0xff] }
 0x517   : > { %v1550_v51 = vpop.f32.mrf.mxu0  ;;  %v1646_v52 = vadd.f32 %v1631_v50, %v4532_v1  ;;  %1690 = vrot.lane.b32.xlu0 %v1682_v43, %s4155_s24  ;;  %v1687_v62 = vmul.f32 %v1679_v60, %v1647_v58  ;;  %3681 = vmatpush3.msra.mxu1 %v1865_v32  ;;  %v3452_v46 = vld [vmem:[%s4944_s7] ss:$0 sm:$0xff] }
 0x518   : > { %v1685_v54 = vmul.f32 %v1677_v49, %v1645_v48  ;;  %v1644_v55 = vadd.f32 %v1550_v51, %v1280_v8  ;;  %3682 = vmatprep.subr.mxu1 %v1864_v33 }
 0x519   : > { %v1686_v39 = vmul.f32 %v1678_v53, %v1646_v52  ;;  %3683 = vmatpush3.msra.mxu1 %v1864_v33 }
 0x51a   : > { %1700 = vrot.lane.b32.xlu1 %v1685_v54, %s4156_s27  ;;  %v1684_v59 = vmul.f32 %v1676_v57, %v1644_v55  ;;  %3684 = vmatprep.subr.mxu1 %v1863_v34 }
 0x51b   : > { %1706 = vrot.lane.b32.xlu0 %v1686_v39, %s4972_s23  ;;  %3685 = vmatpush3.msra.mxu1 %v1863_v34 }
 0x51e   : > { %1698 = vrot.lane.b32.xlu1 %v1684_v59, %s4156_s27 }
 0x522   : > { %1708 = vrot.lane.b32.xlu1 %v1687_v62, %s4972_s23  ;;  %s4993_s23 = smov 64  }
 0x587   : > { %v1693_v63 = vpop.permute.xlu1 %1692 }
 0x588   : > { %v1713_v9 = vsel %vm726_vm1, %v4530_v61, %v1693_v63 }
 0x589   : > { %v1691_v0 = vpop.permute.xlu0 %1690 }
 0x58a   : > { %v1712_v4 = vsel %vm726_vm1, %v4535_v14, %v1691_v0 }
 0x58c   : > { %v1701_v1 = vpop.permute.xlu1 %1700 }
 0x58d   : > { %v1707_v6 = vpop.permute.xlu0 %1706  ;;  %v1715_v10 = vsel %vm1203_vm2, %v1713_v9, %v1701_v1 }
 0x590   : > { %v1699_v5 = vpop.permute.xlu1 %1698 }
 0x591   : > { %v1714_v7 = vsel %vm1203_vm2, %v1712_v4, %v1699_v5 }
 0x592   : > { %v1717_v8 = vsel %vm1716_vm3, %v1714_v7, %v1707_v6 }
 0x593   : > { %3675 = vmatprep.mubr.msk.f32.mxu0 %vm591_vm0, %v1717_v8 }
 0x594   : > { %v1709_v11 = vpop.permute.xlu1 %1708 }
 0x595   : > { %v1718_v12 = vsel %vm1716_vm3, %v1715_v10, %v1709_v11 }
 0x596   : > { %3676 = vmatmul.mubr.msk.f32.vlgmr.msra.gmra.mxu0 %vm591_vm0, %v1718_v12 }
 0x656   : > { %v3677_v14 = vpop.f32.mrf.mxu0 }
 0x657   : > { %v1808_v15 = vadd.f32 %v3677_v14, %v3448_v13 }
 0x658   : > { %v1802_v16 = vpop.f32.mrf.mxu0 }
 0x659   : > { %v1814_v17 = vadd.f32 %v1808_v15, %v4357_v3  ;;  %v1803_v18 = vadd.f32 %v3448_v13, %v1802_v16 }
 0x65b   : > { %1816 = vst.msk [vmem:[#allocation2 + $0x8] sm:$0xff] %vm591_vm0, %v1814_v17  ;;  %v1813_v61 = vadd.f32 %v1803_v18, %v4355_v2 }
 0x65d   : > { %1815 = vst.msk [vmem:[#allocation2] sm:$0xff] %vm591_vm0, %v1813_v61 }
 0x662   : > { %v4574_v19 = vld [vmem:[#allocation2 + $0x8] sm:$0xff] }
 0x663   : > { %v1824_v20 = vsel %vm591_vm0, %v4574_v19, 0.0 }
 0x664   : > { %1825 = vadd.xlane.f32.xlu1 %v1824_v20  ;;  %v4578_v21 = vld [vmem:[#allocation2] sm:$0xff] }
 0x665   : > { %v1821_v23 = vsel %vm591_vm0, %v4578_v21, 0.0 }
 0x666   : > { %1822 = vadd.xlane.f32.xlu0 %v1821_v23 }
 0x6ed   : > { %v1826_v3 = vpop.xlane.xlu1 %1825 }
 0x6ee   : > { %v1828_v24 = vmul.f32 0.03125, %v1826_v3 }
 0x6ef   : > { %v1823_v25 = vpop.xlane.xlu0 %1822 }
 0x6f0   : > { %v1827_v26 = vmul.f32 0.03125, %v1823_v25  ;;  %v1830_v2 = vsub.f32 %v4574_v19, %v1828_v24 }
 0x6f2   : > { %v1829_v22 = vsub.f32 %v4578_v21, %v1827_v26  ;;  %v1832_v29 = vmul.f32 %v1830_v2, %v1830_v2 }
 0x6f4   : > { %v1831_v27 = vmul.f32 %v1829_v22, %v1829_v22  ;;  %v1836_v30 = vsel %vm591_vm0, %v1832_v29, 0.0 }
 0x6f6   : > { %v1833_v28 = vsel %vm591_vm0, %v1831_v27, 0.0 }
 0x6f7   : > { %1834 = vadd.xlane.f32.xlu0 %v1833_v28 }
 0x6fb   : > { %1837 = vadd.xlane.f32.xlu0 %v1836_v30 }
 0x780   : > { %v1835_v35 = vpop.xlane.xlu0 %1834 }
 0x781   : > { %v1839_v36 = vmul.f32 0.03125, %v1835_v35 }
 0x783   : > { %v1841_v38 = vadd.f32 1e-05, %v1839_v36 }
 0x784   : > { %v1838_v40 = vpop.xlane.xlu0 %1837 }
 0x785   : > { %3931 = vrsqrt.f32 %v1841_v38  ;;  %v1840_v41 = vmul.f32 0.03125, %v1838_v40 }
 0x787   : > { %v1842_v42 = vadd.f32 1e-05, %v1840_v41 }
 0x789   : > { %3933 = vrsqrt.f32 %v1842_v42 }
 0x792   : > { %v3932_v44 = vpop.eup %3931 }
 0x793   : > { %v1845_v43 = vmul.f32 %v3932_v44, %v1829_v22 }
 0x795   : > { %v1853_v47 = vmul.f32 %v3451_v45, %v1845_v43 }
 0x796   : > { %v3934_v37 = vpop.eup %3933 }
 0x797   : > { %v1846_v48 = vmul.f32 %v3934_v37, %v1830_v2  ;;  %v1861_v49 = vadd.f32 %v3452_v46, %v1853_v47 }
 0x799   : > { %v1854_v50 = vmul.f32 %v3451_v45, %v1846_v48  ;;  %3686 = vmatprep.mubr.msk.f32.mxu1 %vm591_vm0, %v1861_v49 }
 0x79b   : > { %v1862_v51 = vadd.f32 %v3452_v46, %v1854_v50 }
 0x79d   : > { %3687 = vmatmul.mubr.msk.f32.vlgmr.msra.gmra.mxu1 %vm591_vm0, %v1862_v51 }
 0x85d   : > { %v3688_v52 = vpop.f32.mrf.mxu1 }
 0x85e   : > { %1949 = vst.msk [vmem:[#allocation3 + $0x8] sm:$0xff] %vm726_vm1, %v3688_v52  ;;  %1978 = vrot.lane.b32.xlu1 %v3688_v52, %s4144_s29  ;;  %1954 = vrot.lane.b32.xlu0 %v3688_v52, %s4145_s18 }
 0x85f   : > { %v4597_v53 = vpop.f32.mrf.mxu1 }
 0x860   : > { %1948 = vst.msk [vmem:[#allocation3] sm:$0xff] %vm726_vm1, %v4597_v53 }
 0x862   : > { %1970 = vrot.lane.b32.xlu1 %v3688_v52, %s4146_s22  ;;  %2002 = vrot.lane.b32.xlu0 %v3688_v52, %s4147_s30 }
 0x865   : > { %v2041_v11 = vld [vmem:[#allocation3 + $0x8] sm:$0xff] }
 0x866   : > { %1994 = vrot.lane.b32.xlu1 %v3688_v52, %s4148_s19  ;;  %2026 = vrot.lane.b32.xlu0 %v3688_v52, %s4149_s0 }
 0x867   : > { %v2040_v54 = vld [vmem:[#allocation3] sm:$0xff] }
 0x868   : > { %3693 = vmatprep.mubr.msk.f32.mxu0 %vm726_vm1, %v2040_v54 }
 0x86a   : > { %2000 = vrot.lane.b32.xlu0 %v4597_v53, %s4147_s30  ;;  %1952 = vrot.lane.b32.xlu1 %v4597_v53, %s4145_s18  ;;  %s4994_s30 = smov 48   ;;  %s4995_s18 = smov 56  }
 0x86e   : > { %1992 = vrot.lane.b32.xlu0 %v4597_v53, %s4148_s19  ;;  %1976 = vrot.lane.b32.xlu1 %v4597_v53, %s4144_s29  ;;  %s4996_s19 = smov 40   ;;  %s4997_s29 = smov 24  }
 0x872   : > { %2016 = vrot.lane.b32.xlu0 %v4597_v53, %s4150_s20  ;;  %1968 = vrot.lane.b32.xlu1 %v4597_v53, %s4146_s22  ;;  %s3493_s22 = sshll.u32 %s4272_s28, 8 }
 0x873   : > { %s4890_s17 = scalar_lea.hbm %s4998_s21, %s3493_s22 }
 0x876   : > { %1962 = vrot.lane.b32.xlu0 %v3688_v52, %s4993_s23  ;;  %2024 = vrot.lane.b32.xlu1 %v4597_v53, %s4149_s0 }
 0x87a   : > { %2010 = vrot.lane.b32.xlu0 %v3688_v52, %s4994_s30  ;;  %2018 = vrot.lane.b32.xlu1 %v3688_v52, %s4150_s20 }
 0x87e   : > { %1986 = vrot.lane.b32.xlu1 %v3688_v52, %s4995_s18 }
 0x882   : > { %2034 = vrot.lane.b32.xlu1 %v3688_v52, %s4996_s19 }
 0x886   : > { %1960 = vrot.lane.b32.xlu1 %v4597_v53, %s4993_s23 }
 0x88a   : > { %1984 = vrot.lane.b32.xlu1 %v4597_v53, %s4995_s18 }
 0x8d0   : > { %v1979_v55 = vpop.permute.xlu1 %1978  ;;  %v1955_v39 = vpop.permute.xlu0 %1954 }
 0x8d1   : > { %1983 = vst.msk [vmem:[#allocation4 + $0x18] sm:$0xff] %vm726_vm1, %v1979_v55  ;;  %1959 = vst.msk [vmem:[#allocation4 + $0x8] sm:$0xff] %vm726_vm1, %v1955_v39 }
 0x8d4   : > { %v1971_v56 = vpop.permute.xlu1 %1970  ;;  %v2003_v57 = vpop.permute.xlu0 %2002 }
 0x8d5   : > { %1975 = vst.msk [vmem:[#allocation3 + $0x18] sm:$0xff] %vm726_vm1, %v1971_v56  ;;  %2007 = vst.msk [vmem:[#allocation4 + $0x28] sm:$0xff] %vm726_vm1, %v2003_v57 }
 0x8d8   : > { %v1995_v58 = vpop.permute.xlu1 %1994  ;;  %v2027_v59 = vpop.permute.xlu0 %2026  ;;  %v2049_v60 = vld [vmem:[#allocation4 + $0x8] sm:$0xff]  ;;  %v2051_v62 = vld [vmem:[#allocation4 + $0x18] sm:$0xff] }
 0x8d9   : > { %1999 = vst.msk [vmem:[#allocation3 + $0x28] sm:$0xff] %vm726_vm1, %v1995_v58  ;;  %2031 = vst.msk [vmem:[#allocation4 + $0x38] sm:$0xff] %vm726_vm1, %v2027_v59  ;;  %3689 = vmatprep.subr.msk.mxu0 %vm726_vm1, %v2049_v60  ;;  %3696 = vmatprep.subr.msk.mxu1 %vm726_vm1, %v2051_v62 }
 0x8da   : > { %3690 = vmatpush3.xpose.msk.msra.mxu0 %vm726_vm1, %v2049_v60  ;;  %3697 = vmatpush3.xpose.msk.msra.mxu1 %vm726_vm1, %v2051_v62 }
 0x8dc   : > { %v2001_v63 = vpop.permute.xlu0 %2000  ;;  %v1953_v0 = vpop.permute.xlu1 %1952  ;;  %v2053_v8 = vld [vmem:[#allocation4 + $0x28] sm:$0xff]  ;;  %v2043_v61 = vld [vmem:[#allocation3 + $0x18] sm:$0xff] }
 0x8dd   : > { %2006 = vst.msk [vmem:[#allocation4 + $0x20] sm:$0xff] %vm726_vm1, %v2001_v63  ;;  %1958 = vst.msk [vmem:[#allocation4] sm:$0xff] %vm726_vm1, %v1953_v0 }
 0x8e0   : > { %v1993_v1 = vpop.permute.xlu0 %1992  ;;  %v1977_v4 = vpop.permute.xlu1 %1976  ;;  %v2055_v15 = vld [vmem:[#allocation4 + $0x38] sm:$0xff]  ;;  %v2045_v3 = vld [vmem:[#allocation3 + $0x28] sm:$0xff] }
 0x8e1   : > { %1998 = vst.msk [vmem:[#allocation3 + $0x20] sm:$0xff] %vm726_vm1, %v1993_v1  ;;  %1982 = vst.msk [vmem:[#allocation4 + $0x10] sm:$0xff] %vm726_vm1, %v1977_v4 }
 0x8e4   : > { %v2017_v5 = vpop.permute.xlu0 %2016  ;;  %v1969_v6 = vpop.permute.xlu1 %1968  ;;  %v2048_v7 = vld [vmem:[#allocation4] sm:$0xff] }
 0x8e5   : > { %2022 = vst.msk [vmem:[#allocation3 + $0x30] sm:$0xff] %vm726_vm1, %v2017_v5  ;;  %1974 = vst.msk [vmem:[#allocation3 + $0x10] sm:$0xff] %vm726_vm1, %v1969_v6  ;;  %3691 = vmatprep.subr.msk.mxu0 %vm726_vm1, %v2048_v7  ;;  %v2052_v14 = vld [vmem:[#allocation4 + $0x20] sm:$0xff] }
 0x8e6   : > { %3692 = vmatpush3.xpose.msk.msra.mxu0 %vm726_vm1, %v2048_v7 }
 0x8e7   : > { %3703 = vmatprep.subr.msk.mxu0 %vm726_vm1, %v2053_v8 }
 0x8e8   : > { %v1963_v9 = vpop.permute.xlu0 %1962  ;;  %v2025_v10 = vpop.permute.xlu1 %2024  ;;  %v2050_v12 = vld [vmem:[#allocation4 + $0x10] sm:$0xff]  ;;  %v2044_v13 = vld [vmem:[#allocation3 + $0x20] sm:$0xff] }
 0x8e9   : > { %1967 = vst.msk [vmem:[#allocation5 + $0x8] sm:$0xff] %vm726_vm1, %v1963_v9  ;;  %2030 = vst.msk [vmem:[#allocation4 + $0x30] sm:$0xff] %vm726_vm1, %v2025_v10  ;;  %3694 = vmatmul.mubr.msk.f32.vlgmr.msra.gmra.mxu0 %vm726_vm1, %v2041_v11  ;;  %3698 = vmatprep.subr.msk.mxu1 %vm726_vm1, %v2050_v12 }
 0x8ea   : > { %3699 = vmatpush3.xpose.msk.msra.mxu1 %vm726_vm1, %v2050_v12  ;;  %3704 = vmatpush3.xpose.msk.msra.mxu0 %vm726_vm1, %v2053_v8 }
 0x8eb   : > { %3707 = vmatprep.mubr.msk.f32.mxu0 %vm726_vm1, %v2044_v13  ;;  %3705 = vmatprep.subr.msk.mxu0 %vm726_vm1, %v2052_v14 }
 0x8ec   : > { %3710 = vmatprep.subr.msk.mxu1 %vm726_vm1, %v2055_v15  ;;  %v2011_v16 = vpop.permute.xlu0 %2010  ;;  %v2019_v17 = vpop.permute.xlu1 %2018  ;;  %v2042_v18 = vld [vmem:[#allocation3 + $0x10] sm:$0xff] }
 0x8ed   : > { %2015 = vst.msk [vmem:[#allocation5 + $0x28] sm:$0xff] %vm726_vm1, %v2011_v16  ;;  %2023 = vst.msk [vmem:[#allocation3 + $0x38] sm:$0xff] %vm726_vm1, %v2019_v17  ;;  %3700 = vmatprep.mubr.msk.f32.mxu1 %vm726_vm1, %v2042_v18  ;;  %v2046_v20 = vld [vmem:[#allocation3 + $0x30] sm:$0xff] }
 0x8ee   : > { %3701 = vmatmul.mubr.msk.f32.vlgmr.msra.gmra.mxu1 %vm726_vm1, %v2043_v61  ;;  %3706 = vmatpush3.xpose.msk.msra.mxu0 %vm726_vm1, %v2052_v14 }
 0x8ef   : > { %3711 = vmatpush3.xpose.msk.msra.mxu1 %vm726_vm1, %v2055_v15  ;;  %3714 = vmatprep.mubr.msk.f32.mxu1 %vm726_vm1, %v2046_v20 }
 0x8f0   : > { %v1987_v23 = vpop.permute.xlu1 %1986  ;;  %v2054_v24 = vld [vmem:[#allocation4 + $0x30] sm:$0xff]  ;;  %v2057_v25 = vld [vmem:[#allocation5 + $0x8] sm:$0xff] }
 0x8f1   : > { %1991 = vst.msk [vmem:[#allocation5 + $0x18] sm:$0xff] %vm726_vm1, %v1987_v23  ;;  %3708 = vmatmul.mubr.msk.f32.vlgmr.msra.gmra.mxu0 %vm726_vm1, %v2045_v3  ;;  %3712 = vmatprep.subr.msk.mxu1 %vm726_vm1, %v2054_v24 }
 0x8f2   : > { %3717 = vmatprep.subr.mxu0 %v2057_v25 }
 0x8f3   : > { %3713 = vmatpush3.xpose.msk.msra.mxu1 %vm726_vm1, %v2054_v24  ;;  %3718 = vmatpush3.msra.mxu0 %v2057_v25 }
 0x8f4   : > { %v2035_v26 = vpop.permute.xlu1 %2034  ;;  %v2047_v2 = vld [vmem:[#allocation3 + $0x38] sm:$0xff]  ;;  %v4672_v30 = vld [vmem:[#allocation5 + $0x28] sm:$0xff] }
 0x8f5   : > { %2039 = vst.msk [vmem:[#allocation5 + $0x38] sm:$0xff] %vm726_vm1, %v2035_v26 }
 0x8f6   : > { %3715 = vmatmul.mubr.msk.f32.vlgmr.msra.gmra.mxu1 %vm726_vm1, %v2047_v2 }
 0x8f8   : > { %v1961_v22 = vpop.permute.xlu1 %1960  ;;  %v2059_v27 = vld [vmem:[#allocation5 + $0x18] sm:$0xff] }
 0x8f9   : > { %1966 = vst.msk [vmem:[#allocation5] sm:$0xff] %vm726_vm1, %v1961_v22  ;;  %3724 = vmatprep.subr.mxu1 %v2059_v27 }
 0x8fa   : > { %3725 = vmatpush3.msra.mxu1 %v2059_v27 }
 0x8fc   : > { %v1985_v28 = vpop.permute.xlu1 %1984  ;;  %v4675_v32 = vld [vmem:[#allocation5 + $0x38] sm:$0xff] }
 0x8fd   : > { %1990 = vst.msk [vmem:[#allocation5 + $0x10] sm:$0xff] %vm726_vm1, %v1985_v28 }
 0x900   : > { %v2056_v29 = vld [vmem:[#allocation5] sm:$0xff] }
 0x901   : > { %3719 = vmatprep.subr.mxu0 %v2056_v29 }
 0x902   : > { %3720 = vmatpush3.msra.mxu0 %v2056_v29 }
 0x903   : > { %3731 = vmatprep.subr.mxu0 %v4672_v30 }
 0x904   : > { %v2058_v31 = vld [vmem:[#allocation5 + $0x10] sm:$0xff] }
 0x905   : > { %3726 = vmatprep.subr.mxu1 %v2058_v31 }
 0x906   : > { %3727 = vmatpush3.msra.mxu1 %v2058_v31 }
 0x907   : > { %3738 = vmatprep.subr.mxu1 %v4675_v32 }
 0x9a9   : > { %v3695_v33 = vpop.f32.mrf.mxu0 }
 0x9aa   : > { %v2415_v34 = vsel %vm1203_vm2, %v3695_v33, -inf }
 0x9ab   : > { %2416 = vmax.xlane.f32.xlu1 %v2415_v34  ;;  %v2142_v36 = vpop.f32.mrf.mxu0 }
 0x9ac   : > { %v2412_v42 = vsel %vm1203_vm2, %v2142_v36, -inf }
 0x9ae   : > { %v3702_v35 = vpop.f32.mrf.mxu1 }
 0x9af   : > { %v2421_v38 = vsel %vm1203_vm2, %v3702_v35, -inf }
 0x9b0   : > { %2422 = vmax.xlane.f32.xlu0 %v2421_v38  ;;  %v2229_v44 = vpop.f32.mrf.mxu1 }
 0x9b1   : > { %v3709_v40 = vpop.f32.mrf.mxu0  ;;  %v2418_v46 = vsel %vm1203_vm2, %v2229_v44, -inf }
 0x9b2   : > { %v2427_v41 = vsel %vm1203_vm2, %v3709_v40, -inf }
 0x9b3   : > { %2428 = vmax.xlane.f32.xlu1 %v2427_v41  ;;  %v2316_v47 = vpop.f32.mrf.mxu0 }
 0x9b4   : > { %2413 = vmax.xlane.f32.xlu0 %v2412_v42  ;;  %v2424_v37 = vsel %vm1203_vm2, %v2316_v47, -inf }
 0x9b6   : > { %v3716_v45 = vpop.f32.mrf.mxu1 }
 0x9b7   : > { %v2433_v43 = vsel %vm1203_vm2, %v3716_v45, -inf }
 0x9b8   : > { %2434 = vmax.xlane.f32.xlu1 %v2433_v43  ;;  %2419 = vmax.xlane.f32.xlu0 %v2418_v46  ;;  %v2403_v48 = vpop.f32.mrf.mxu1 }
 0x9b9   : > { %v2430_v49 = vsel %vm1203_vm2, %v2403_v48, -inf }
 0x9bc   : > { %2425 = vmax.xlane.f32.xlu0 %v2424_v37 }
 0x9c0   : > { %2431 = vmax.xlane.f32.xlu0 %v2430_v49 }
 0x9c9   : > { %2032 = vrot.lane.b32.xlu1 %v4597_v53, %s4996_s19  ;;  %s581_s19 = sand.u32 1, %s4129_s25  }
 0x9ca   : > { %s4896_s23 = scalar_lea.sflag [#allocation8], %s581_s19 }
 0x9d6   : > { %2008 = vrot.lane.b32.xlu0 %v4597_v53, %s4994_s30  ;;  %s4159_s30 = smov [#allocation12]  }
 0x9d7   : > { %s4073_s18 = sshll.u32 %s4159_s30, 4  ;;  %s4074_s18 = int_to_ptr.vmem [resolvable:$false] %s4073_s18 }
 0xa34   : > { %v4690_v50 = vpop.xlane.xlu1 %2416 }
 0xa35   : > { %v2461_v39 = vsub.f32 %v3695_v33, %v4690_v50  ;;  %v2437_v31 = vsub.f32 -inf, %v4690_v50 }
 0xa37   : > { %v2470_v59 = vmul.f32 1.442695, %v2461_v39  ;;  %v2446_v34 = vmul.f32 1.442695, %v2437_v31 }
 0xa39   : > { %v4692_v51 = vpop.xlane.xlu0 %2422 }
 0xa3a   : > { %v2463_v52 = vsub.f32 %v3702_v35, %v4692_v51  ;;  %v2439_v35 = vsub.f32 -inf, %v4692_v51 }
 0xa3c   : > { %v2474_v54 = vmul.f32 1.442695, %v2463_v52  ;;  %v4695_v55 = vpop.xlane.xlu1 %2428  ;;  %v2450_v42 = vmul.f32 1.442695, %v2439_v35 }
 0xa3d   : > { %v4698_v56 = vpop.xlane.xlu0 %2413  ;;  %v2465_v62 = vsub.f32 %v3709_v40, %v4695_v55  ;;  %v2441_v41 = vsub.f32 -inf, %v4695_v55 }
 0xa3e   : > { %v2460_v57 = vsub.f32 %v2142_v36, %v4698_v56  ;;  %3935 = vpow2.f32 %v2474_v54 }
 0xa3f   : > { %v2478_v7 = vmul.f32 1.442695, %v2465_v62 }
 0xa40   : > { %v2468_v58 = vmul.f32 1.442695, %v2460_v57 }
 0xa41   : > { %v4701_v60 = vpop.xlane.xlu1 %2434  ;;  %v4703_v53 = vpop.xlane.xlu0 %2419 }
 0xa42   : > { %v2467_v63 = vsub.f32 %v3716_v45, %v4701_v60  ;;  %v2462_v0 = vsub.f32 %v2229_v44, %v4703_v53  ;;  %3937 = vpow2.f32 %v2468_v58  ;;  %v2438_v38 = vsub.f32 -inf, %v4703_v53 }
 0xa43   : > { %3939 = vpow2.f32 %v2470_v59  ;;  %v2454_v45 = vmul.f32 1.442695, %v2441_v41  ;;  %v2443_v49 = vsub.f32 -inf, %v4701_v60 }
 0xa44   : > { %v2482_v1 = vmul.f32 1.442695, %v2467_v63  ;;  %v2472_v4 = vmul.f32 1.442695, %v2462_v0  ;;  %v2448_v44 = vmul.f32 1.442695, %v2438_v38 }
 0xa45   : > { %v2033_v5 = vpop.permute.xlu1 %2032  ;;  %v4708_v6 = vpop.xlane.xlu0 %2425  ;;  %v2458_v55 = vmul.f32 1.442695, %v2443_v49 }
 0xa46   : > { %2038 = vst.msk [vmem:[#allocation5 + $0x30] sm:$0xff] %vm726_vm1, %v2033_v5  ;;  %v2464_v8 = vsub.f32 %v2316_v47, %v4708_v6  ;;  %3941 = vpow2.f32 %v2482_v1  ;;  %v2440_v43 = vsub.f32 -inf, %v4708_v6 }
 0xa47   : > { %3943 = vpow2.f32 %v2472_v4 }
 0xa48   : > { %v2476_v9 = vmul.f32 1.442695, %v2464_v8  ;;  %3945 = vpow2.f32 %v2478_v7 }
 0xa49   : > { %v4712_v10 = vpop.xlane.xlu0 %2431 }
 0xa4a   : > { %v2466_v11 = vsub.f32 %v2403_v48, %v4712_v10  ;;  %3947 = vpow2.f32 %v2476_v9  ;;  %v2442_v46 = vsub.f32 -inf, %v4712_v10  ;;  %v2452_v48 = vmul.f32 1.442695, %v2440_v43 }
 0xa4b   : > { %v3936_v12 = vpop.eup %3935 }
 0xa4c   : > { %v2480_v13 = vmul.f32 1.442695, %v2466_v11  ;;  %v2501_v14 = vsel %vm1203_vm2, %v3936_v12, 0.0  ;;  %v2456_v50 = vmul.f32 1.442695, %v2442_v46 }
 0xa4d   : > { %v2009_v15 = vpop.permute.xlu0 %2008  ;;  %2502 = vadd.xlane.f32.xlu1 %v2501_v14  ;;  %v2062_v26 = vld [vmem:[#allocation5 + $0x30] sm:$0xff] }
 0xa4e   : > { %2014 = vst.msk [vmem:[#allocation5 + $0x20] sm:$0xff] %vm726_vm1, %v2009_v15  ;;  %3949 = vpow2.f32 %v2480_v13 }
 0xa4f   : > { %v3938_v16 = vpop.eup %3937  ;;  %3951 = vpow2.f32 %v2446_v34 }
 0xa50   : > { %v3940_v17 = vpop.eup %3939  ;;  %3721 = vmatprep.mubr.msk.f32.mxu0 %vm1203_vm2, %v3938_v16 }
 0xa51   : > { %3722 = vmatmul.mubr.msk.f32.vlgmr.msra.gmra.mxu0 %vm1203_vm2, %v3940_v17  ;;  %v2495_v2 = vsel %vm1203_vm2, %v3940_v17, 0.0 }
 0xa52   : > { %3732 = vmatpush3.msra.mxu0 %v4672_v30  ;;  %v2492_v30 = vsel %vm1203_vm2, %v3938_v16, 0.0 }
 0xa53   : > { %v3942_v18 = vpop.eup %3941 }
 0xa54   : > { %v2513_v61 = vsel %vm1203_vm2, %v3942_v18, 0.0  ;;  %v3944_v23 = vpop.eup %3943 }
 0xa55   : > { %v2060_v20 = vld [vmem:[#allocation5 + $0x20] sm:$0xff]  ;;  %2514 = vadd.xlane.f32.xlu1 %v2513_v61  ;;  %v3946_v3 = vpop.eup %3945  ;;  %3728 = vmatprep.mubr.msk.f32.mxu1 %vm1203_vm2, %v3944_v23  ;;  %v2498_v24 = vsel %vm1203_vm2, %v3944_v23, 0.0 }
 0xa56   : > { %3733 = vmatprep.subr.mxu0 %v2060_v20  ;;  %3729 = vmatmul.mubr.msk.f32.vlgmr.msra.gmra.mxu1 %vm1203_vm2, %v3936_v12  ;;  %v2507_v22 = vsel %vm1203_vm2, %v3946_v3, 0.0 }
 0xa57   : > { %3734 = vmatpush3.msra.mxu0 %v2060_v20  ;;  %v3948_v25 = vpop.eup %3947  ;;  %2499 = vadd.xlane.f32.xlu0 %v2498_v24 }
 0xa58   : > { %3739 = vmatpush3.msra.mxu1 %v4675_v32  ;;  %3735 = vmatprep.mubr.msk.f32.mxu0 %vm1203_vm2, %v3948_v25  ;;  %v2504_v28 = vsel %vm1203_vm2, %v3948_v25, 0.0  ;;  %v2436_v32 = vsub.f32 -inf, %v4698_v56 }
 0xa59   : > { %3740 = vmatprep.subr.mxu1 %v2062_v26  ;;  %2496 = vadd.xlane.f32.xlu1 %v2495_v2 }
 0xa5a   : > { %3741 = vmatpush3.msra.mxu1 %v2062_v26  ;;  %3736 = vmatmul.mubr.msk.f32.vlgmr.msra.gmra.mxu0 %vm1203_vm2, %v3946_v3  ;;  %v2444_v36 = vmul.f32 1.442695, %v2436_v32  ;;  %v2929_v32 = vld [vmem:[#allocation11 + $0x18] sm:$0xff] }
 0xa5b   : > { %v3950_v27 = vpop.eup %3949  ;;  %2508 = vadd.xlane.f32.xlu0 %v2507_v22  ;;  %3745 = vmatprep.subr.mxu0 %v2929_v32 }
 0xa5c   : > { %3742 = vmatprep.mubr.msk.f32.mxu1 %vm1203_vm2, %v3950_v27  ;;  %v2510_v29 = vsel %vm1203_vm2, %v3950_v27, 0.0  ;;  %3953 = vpow2.f32 %v2444_v36  ;;  %v3952_v54 = vpop.eup %3951  ;;  %3746 = vmatpush3.msra.mxu0 %v2929_v32 }
 0xa5d   : > { %3743 = vmatmul.mubr.msk.f32.vlgmr.msra.gmra.mxu1 %vm1203_vm2, %v3942_v18  ;;  %3955 = vpow2.f32 %v2450_v42  ;;  %v2485_v57 = vmul.f32 0.0, %v3952_v54 }
 0xa5e   : > { %3957 = vpow2.f32 %v2448_v44 }
 0xa5f   : > { %2505 = vadd.xlane.f32.xlu0 %v2504_v28  ;;  %3959 = vpow2.f32 %v2454_v45 }
 0xa60   : > { %3961 = vpow2.f32 %v2452_v48 }
 0xa61   : > { %3963 = vpow2.f32 %v2456_v50 }
 0xa62   : > { %3965 = vpow2.f32 %v2458_v55 }
 0xa63   : > { %2511 = vadd.xlane.f32.xlu0 %v2510_v29 }
 0xa67   : > { %2493 = vadd.xlane.f32.xlu0 %v2492_v30 }
 0xa69   : > { %v3954_v39 = vpop.eup %3953 }
 0xa6a   : > { %v3956_v59 = vpop.eup %3955  ;;  %v2484_v62 = vmul.f32 0.0, %v3954_v39 }
 0xa6b   : > { %v3958_v63 = vpop.eup %3957  ;;  %v2487_v4 = vmul.f32 0.0, %v3956_v59 }
 0xa6c   : > { %v3960_v1 = vpop.eup %3959  ;;  %v4742_v5 = vmul.f32 0.0, %v3958_v63 }
 0xa6d   : > { %v4744_v6 = vmul.f32 0.0, %v3960_v1  ;;  %v3962_v7 = vpop.eup %3961 }
 0xa6e   : > { %v3964_v9 = vpop.eup %3963  ;;  %v4748_v11 = vmul.f32 0.0, %v3962_v7 }
 0xa6f   : > { %v4750_v12 = vmul.f32 0.0, %v3964_v9  ;;  %v3966_v13 = vpop.eup %3965 }
 0xa70   : > { %v4754_v16 = vmul.f32 0.0, %v3966_v13 }
 0xad6   : > { %v2503_v47 = vpop.xlane.xlu1 %2502 }
 0xad7   : > { %v2519_v60 = vadd.f32 %v2503_v47, %v2487_v4  ;;  %v2927_v47 = vld [vmem:[#allocation11 + $0x8] sm:$0xff] }
 0xade   : > { %v2515_v51 = vpop.xlane.xlu1 %2514 }
 0xadf   : > { %v2523_v18 = vadd.f32 %v2515_v51, %v4754_v16  ;;  %v2926_v51 = vld [vmem:[#allocation11] sm:$0xff] }
 0xae0   : > { %v2500_v33 = vpop.xlane.xlu0 %2499 }
 0xae1   : > { %v2518_v8 = vadd.f32 %v2500_v33, %v4742_v5  ;;  %v2928_v33 = vld [vmem:[#allocation11 + $0x10] sm:$0xff] }
 0xae2   : > { %v2497_v56 = vpop.xlane.xlu1 %2496  ;;  %3747 = vmatprep.subr.mxu0 %v2928_v33 }
 0xae3   : > { %v2517_v53 = vadd.f32 %v2497_v56, %v2485_v57  ;;  %3748 = vmatpush3.msra.mxu0 %v2928_v33 }
 0xae4   : > { %v2509_v40 = vpop.xlane.xlu0 %2508  ;;  %3749 = vmatprep.subr.mxu0 %v2927_v47 }
 0xae5   : > { %3967 = vrcp.f32 %v2517_v53  ;;  %v2521_v10 = vadd.f32 %v2509_v40, %v4744_v6  ;;  %3750 = vmatpush3.msra.mxu0 %v2927_v47 }
 0xae6   : > { %3751 = vmatprep.subr.mxu0 %v2926_v51 }
 0xae7   : > { %3752 = vmatpush3.msra.mxu0 %v2926_v51  ;;  %v3073_v51 = vld [vmem:[%s4950_s13 + $0x18] sm:$0xff] }
 0xae8   : > { %v2506_v37 = vpop.xlane.xlu0 %2505 }
 0xae9   : > { %v2520_v14 = vadd.f32 %v2506_v37, %v4748_v11 }
 0xaec   : > { %v2512_v52 = vpop.xlane.xlu0 %2511 }
 0xaed   : > { %v2522_v15 = vadd.f32 %v2512_v52, %v4750_v12 }
 0xaf0   : > { %v2494_v58 = vpop.xlane.xlu0 %2493 }
 0xaf1   : > { %v2516_v0 = vadd.f32 %v2494_v58, %v2484_v62 }
 0xaf2   : > { %v3968_v17 = vpop.eup %3967 }
 0xaf3   : > { %3969 = vrcp.f32 %v2516_v0  ;;  %v2865_v20 = vmul.f32 %v3968_v17, %v2517_v53 }
 0xaf4   : > { %3971 = vrcp.f32 %v2519_v60 }
 0xaf5   : > { %3973 = vrcp.f32 %v2518_v8  ;;  %v2873_v25 = vsub.f32 2.0, %v2865_v20 }
 0xaf6   : > { %3975 = vrcp.f32 %v2521_v10 }
 0xaf7   : > { %3977 = vrcp.f32 %v2520_v14  ;;  %v2881_v31 = vmul.f32 %v3968_v17, %v2873_v25 }
 0xaf8   : > { %3979 = vrcp.f32 %v2522_v15 }
 0xaf9   : > { %3981 = vrcp.f32 %v2523_v18 }
 0xb00   : > { %v3970_v61 = vpop.eup %3969 }
 0xb01   : > { %v3972_v23 = vpop.eup %3971  ;;  %v2864_v3 = vmul.f32 %v3970_v61, %v2516_v0 }
 0xb02   : > { %v3974_v24 = vpop.eup %3973  ;;  %v2867_v2 = vmul.f32 %v3972_v23, %v2519_v60 }
 0xb03   : > { %v3976_v26 = vpop.eup %3975  ;;  %v2872_v22 = vsub.f32 2.0, %v2864_v3  ;;  %v2866_v27 = vmul.f32 %v3974_v24, %v2518_v8 }
 0xb04   : > { %v2869_v29 = vmul.f32 %v3976_v26, %v2521_v10  ;;  %v3978_v34 = vpop.eup %3977  ;;  %v2875_v35 = vsub.f32 2.0, %v2867_v2 }
 0xb05   : > { %v3980_v38 = vpop.eup %3979  ;;  %v2880_v42 = vmul.f32 %v3970_v61, %v2872_v22  ;;  %v2874_v44 = vsub.f32 2.0, %v2866_v27  ;;  %v2868_v37 = vmul.f32 %v3978_v34, %v2520_v14  ;;  %v3479_v27 = vld [vmem:[%s4947_s10] ss:$0 sm:$0xff] }
 0xb06   : > { %v2877_v45 = vsub.f32 2.0, %v2869_v29  ;;  %v2870_v48 = vmul.f32 %v3980_v38, %v2522_v15  ;;  %v2883_v50 = vmul.f32 %v3972_v23, %v2875_v35  ;;  %v3982_v52 = vpop.eup %3981 }
 0xb07   : > { %v2882_v56 = vmul.f32 %v3974_v24, %v2874_v44  ;;  %v2871_v53 = vmul.f32 %v3982_v52, %v2523_v18 }
 0xb08   : > { %v2885_v59 = vmul.f32 %v3976_v26, %v2877_v45  ;;  %v2878_v63 = vsub.f32 2.0, %v2870_v48  ;;  %v3076_v48 = vld [vmem:[%s4950_s13 + $0x30] sm:$0xff] }
 0xb09   : > { %v2879_v8 = vsub.f32 2.0, %v2871_v53 }
 0xb0a   : > { %v2886_v10 = vmul.f32 %v3980_v38, %v2878_v63 }
 0xb0b   : > { %v2887_v17 = vmul.f32 %v3982_v52, %v2879_v8  ;;  %v3072_v52 = vld [vmem:[%s4950_s13 + $0x10] sm:$0xff] }
 0xb11   : > { %v3723_v28 = vpop.f32.mrf.mxu0 }
 0xb12   : > { %v2849_v30 = vadd.f32 %v3723_v28, %v2485_v57 }
 0xb13   : > { %v2596_v36 = vpop.f32.mrf.mxu0 }
 0xb14   : > { %v2889_v40 = vmul.f32 %v2881_v31, %v2849_v30  ;;  %v2848_v41 = vadd.f32 %v2596_v36, %v2484_v62  ;;  %v2876_v62 = vsub.f32 2.0, %v2868_v37  ;;  %v3077_v37 = vld [vmem:[%s4950_s13 + $0x38] sm:$0xff] }
 0xb15   : > { %3120 = vmatprep.subr.mxu1 %v3077_v37 }
 0xb16   : > { %v2888_v43 = vmul.f32 %v2880_v42, %v2848_v41  ;;  %v3730_v46 = vpop.f32.mrf.mxu1  ;;  %v2884_v9 = vmul.f32 %v3978_v34, %v2876_v62  ;;  %3121 = vmatpush1.msra.mxu1 %v3076_v48 }
 0xb17   : > { %v2851_v49 = vadd.f32 %v3730_v46, %v2487_v4 }
 0xb18   : > { %v2677_v54 = vpop.f32.mrf.mxu1 }
 0xb19   : > { %v2891_v55 = vmul.f32 %v2883_v50, %v2851_v49  ;;  %v2850_v39 = vadd.f32 %v2677_v54, %v4742_v5  ;;  %v3075_v49 = vld [vmem:[%s4950_s13 + $0x28] sm:$0xff]  ;;  %v3074_v50 = vld [vmem:[%s4950_s13 + $0x20] sm:$0xff]  ;;  %v4158_v54 = vmov 0.0  }
 0xb1a   : > { %v3737_v57 = vpop.f32.mrf.mxu0  ;;  %3122 = vmatprep.subr.mxu1 %v3075_v49  ;;  %3160 = vmatprep.mubr.f32.mxu1 %v4158_v54 }
 0xb1b   : > { %v2853_v58 = vadd.f32 %v3737_v57, %v4744_v6  ;;  %v2890_v0 = vmul.f32 %v2882_v56, %v2850_v39  ;;  %2900 = vrot.lane.b32.xlu1 %v2891_v55, %s4155_s24  ;;  %3123 = vmatpush1.msra.mxu1 %v3074_v50  ;;  %v3071_v55 = vld [vmem:[%s4950_s13 + $0x8] sm:$0xff]  ;;  %v3070_v39 = vld [vmem:[%s4950_s13] sm:$0xff]  ;;  %v3200_v56 = vld [vmem:[%s4952_s15 + $0x78] sm:$0xff] }
 0xb1c   : > { %v2758_v1 = vpop.f32.mrf.mxu0  ;;  %3124 = vmatprep.subr.mxu1 %v3073_v51  ;;  %3756 = vmatprep.subr.mxu0 %v3200_v56 }
 0xb1d   : > { %v2893_v4 = vmul.f32 %v2885_v59, %v2853_v58  ;;  %v3744_v60 = vpop.f32.mrf.mxu1  ;;  %v2852_v7 = vadd.f32 %v2758_v1, %v4748_v11  ;;  %2898 = vrot.lane.b32.xlu0 %v2890_v0, %s4155_s24  ;;  %3125 = vmatpush1.msra.mxu1 %v3072_v52  ;;  %v3482_v1 = vld [vmem:[%s4948_s11] ss:$0 sm:$0xff] }
 0xb1e   : > { %v2855_v14 = vadd.f32 %v3744_v60, %v4754_v16  ;;  %3126 = vmatprep.subr.mxu1 %v3071_v55  ;;  %v3483_v60 = vld [vmem:[%s4949_s12] ss:$0 sm:$0xff] }
 0xb1f   : > { %v2839_v5 = vpop.f32.mrf.mxu1  ;;  %2908 = vrot.lane.b32.xlu1 %v2893_v4, %s4156_s27  ;;  %v2892_v13 = vmul.f32 %v2884_v9, %v2852_v7  ;;  %3127 = vmatpush1.msra.mxu1 %v3070_v39 }
 0xb20   : > { %v2854_v6 = vadd.f32 %v2839_v5, %v4750_v12  ;;  %v2895_v11 = vmul.f32 %v2887_v17, %v2855_v14  ;;  %v3198_v14 = vld [vmem:[%s4952_s15 + $0x68] sm:$0xff]  ;;  %v3196_v17 = vld [vmem:[%s4952_s15 + $0x58] sm:$0xff] }
 0xb22   : > { %v2894_v15 = vmul.f32 %v2886_v10, %v2854_v6 }
 0xb23   : > { %2906 = vrot.lane.b32.xlu1 %v2892_v13, %s4156_s27  ;;  %v3199_v13 = vld [vmem:[%s4952_s15 + $0x70] sm:$0xff] }
 0xb24   : > { %2914 = vrot.lane.b32.xlu0 %v2894_v15, %s4997_s29  ;;  %v3197_v15 = vld [vmem:[%s4952_s15 + $0x60] sm:$0xff] }
 0xb27   : > { %2916 = vrot.lane.b32.xlu1 %v2895_v11, %s4997_s29  ;;  %v3195_v11 = vld [vmem:[%s4952_s15 + $0x50] sm:$0xff]  ;;  %s3417_s29 = sshll.u32 %s581_s19, 4 }
 0xb28   : > { %s583_s0 = scalar_lea.vmem [#allocation12], %s3417_s29  ;;  %s4075_s29 = scalar_lea.vmem %s4074_s18, 512 }
 0xb29   : > { %s3305_s20 = sshll.u32 %s583_s0, 4  ;;  %s4893_s20 = int_to_ptr.vmem [resolvable:$true] %s3305_s20 }
 0xb2a   : > { %s4069_s28 = scalar_lea.vmem %s4893_s20, 256  ;;  %p4076_p7 = scmp.lt.s32.totalorder %s4893_s20, %s4074_s18 }
 0xb2b   : > { %p4070_p10 = scmp.ne.s32.totalorder %s4893_s20, %s4069_s28  ;;  %p4077_p8 = scmp.lt.s32.totalorder %s4075_s29, %s4069_s28 }
 0xb2d   : > { %p4071_p2 = pnand %p4070_p10, %p4999_p12  ;;  %p4078_p11 = por %p4077_p8, %p4076_p7 }
 0xb2f   : > { %p4072_p4 = pneg %p4071_p2 }
 0xb31   : > { %p4079_p0 = pnand %p4078_p11, %p4072_p4 }
 0xb8d   : > { %v2901_v18 = vpop.permute.xlu1 %2900 }
 0xb8e   : > { %v2921_v25 = vsel %vm726_vm1, %v2889_v40, %v2901_v18  ;;  %v3194_v18 = vld [vmem:[%s4952_s15 + $0x48] sm:$0xff] }
 0xb8f   : > { %v2899_v61 = vpop.permute.xlu0 %2898 }
 0xb90   : > { %v2920_v23 = vsel %vm726_vm1, %v2888_v43, %v2899_v61  ;;  %v3193_v61 = vld [vmem:[%s4952_s15 + $0x40] sm:$0xff] }
 0xb91   : > { %v2909_v20 = vpop.permute.xlu1 %2908 }
 0xb92   : > { %v2923_v26 = vsel %vm1203_vm2, %v2921_v25, %v2909_v20  ;;  %v3192_v20 = vld [vmem:[%s4952_s15 + $0x38] sm:$0xff]  ;;  %v3186_v25 = vld [vmem:[%s4952_s15 + $0x8] sm:$0xff] }
 0xb95   : > { %v2907_v3 = vpop.permute.xlu1 %2906 }
 0xb96   : > { %v2915_v12 = vpop.permute.xlu0 %2914  ;;  %v2922_v24 = vsel %vm1203_vm2, %v2920_v23, %v2907_v3  ;;  %v3191_v23 = vld [vmem:[%s4952_s15 + $0x30] sm:$0xff]  ;;  %v3190_v3 = vld [vmem:[%s4952_s15 + $0x28] sm:$0xff] }
 0xb97   : > { %v2924_v16 = vsel %vm1716_vm3, %v2922_v24, %v2915_v12  ;;  %v3189_v12 = vld [vmem:[%s4952_s15 + $0x20] sm:$0xff]  ;;  %v3188_v24 = vld [vmem:[%s4952_s15 + $0x18] sm:$0xff] }
 0xb98   : > { %3753 = vmatprep.mubr.msk.f32.mxu0 %vm591_vm0, %v2924_v16  ;;  %v3187_v16 = vld [vmem:[%s4952_s15 + $0x10] sm:$0xff] }
 0xb99   : > { %v2917_v2 = vpop.permute.xlu1 %2916 }
 0xb9a   : > { %v2925_v22 = vsel %vm1716_vm3, %v2923_v26, %v2917_v2  ;;  %v3185_v26 = vld [vmem:[%s4952_s15] sm:$0xff]  ;;  %v3080_v2 = vlaneseq }
 0xb9b   : > { %3754 = vmatmul.mubr.msk.f32.vlgmr.msra.gmra.mxu0 %vm591_vm0, %v2925_v22 }
 0xb9c   : > { %3757 = vmatpush3.msra.mxu0 %v3200_v56  ;;  %v3081_v22 = vshrl.u32 %v3080_v2, 7 }
 0xb9d   : > { %3758 = vmatprep.subr.mxu0 %v3199_v13 }
 0xb9e   : > { %3759 = vmatpush3.msra.mxu0 %v3199_v13 }
 0xb9f   : > { %3760 = vmatprep.subr.mxu0 %v3198_v14 }
 0xba0   : > { %3761 = vmatpush3.msra.mxu0 %v3198_v14 }
 0xba1   : > { %3762 = vmatprep.subr.mxu0 %v3197_v15 }
 0xba2   : > { %3763 = vmatpush3.msra.mxu0 %v3197_v15 }
 0xba3   : > { %3764 = vmatprep.subr.mxu0 %v3196_v17 }
 0xba4   : > { %3765 = vmatpush3.msra.mxu0 %v3196_v17 }
 0xba5   : > { %3766 = vmatprep.subr.mxu0 %v3195_v11 }
 0xba6   : > { %3767 = vmatpush3.msra.mxu0 %v3195_v11 }
 0xba7   : > { %3768 = vmatprep.subr.mxu0 %v3194_v18 }
 0xba8   : > { %3769 = vmatpush3.msra.mxu0 %v3194_v18 }
 0xba9   : > { %3770 = vmatprep.subr.mxu0 %v3193_v61 }
 0xbaa   : > { %3771 = vmatpush3.msra.mxu0 %v3193_v61 }
 0xbab   : > { %3772 = vmatprep.subr.mxu0 %v3192_v20 }
 0xbac   : > { %3773 = vmatpush3.msra.mxu0 %v3192_v20 }
 0xbad   : > { %3774 = vmatprep.subr.mxu0 %v3191_v23 }
 0xbae   : > { %3775 = vmatpush3.msra.mxu0 %v3191_v23 }
 0xbaf   : > { %3776 = vmatprep.subr.mxu0 %v3190_v3 }
 0xbb0   : > { %3777 = vmatpush3.msra.mxu0 %v3190_v3 }
 0xbb1   : > { %3778 = vmatprep.subr.mxu0 %v3189_v12 }
 0xbb2   : > { %3779 = vmatpush3.msra.mxu0 %v3189_v12 }
 0xbb3   : > { %3780 = vmatprep.subr.mxu0 %v3188_v24 }
 0xbb4   : > { %3781 = vmatpush3.msra.mxu0 %v3188_v24 }
 0xbb5   : > { %3782 = vmatprep.subr.mxu0 %v3187_v16 }
 0xbb6   : > { %3783 = vmatpush3.msra.mxu0 %v3187_v16 }
 0xbb7   : > { %3784 = vmatprep.subr.mxu0 %v3186_v25 }
 0xbb8   : > { %3785 = vmatpush3.msra.mxu0 %v3186_v25 }
 0xbb9   : > { %3786 = vmatprep.subr.mxu0 %v3185_v26 }
 0xbba   : > { %3787 = vmatpush3.msra.mxu0 %v3185_v26 }
 0xc5b   : > { %v3755_v28 = vpop.f32.mrf.mxu0 }
 0xc5c   : > { %v3015_v29 = vadd.f32 %v3755_v28, %v3479_v27  ;;  %v3078_v28 = vld [vmem:[%s4951_s14] sm:$0x3] }
 0xc5d   : > { %v3009_v30 = vpop.f32.mrf.mxu0 }
 0xc5e   : > { %v3021_v31 = vadd.f32 %v3015_v29, %v4574_v19  ;;  %v3010_v32 = vadd.f32 %v3479_v27, %v3009_v30  ;;  %v3086_v27 = vsub.s32 1, %v3081_v22 }
 0xc60   : > { %3023 = vst.msk [vmem:[#allocation2 + $0x8] sm:$0xff] %vm591_vm0, %v3021_v31  ;;  %v3020_v33 = vadd.f32 %v3010_v32, %v4578_v21  ;;  %v3087_v29 = vrot.slane %v3078_v28, %v3086_v27 }
 0xc62   : > { %3022 = vst.msk [vmem:[#allocation2] sm:$0xff] %vm591_vm0, %v3020_v33 }
 0xc67   : > { %v4783_v34 = vld [vmem:[#allocation2 + $0x8] sm:$0xff] }
 0xc68   : > { %v3031_v35 = vsel %vm591_vm0, %v4783_v34, 0.0 }
 0xc69   : > { %3032 = vadd.xlane.f32.xlu1 %v3031_v35  ;;  %v4787_v36 = vld [vmem:[#allocation2] sm:$0xff] }
 0xc6a   : > { %v3028_v38 = vsel %vm591_vm0, %v4787_v36, 0.0 }
 0xc6b   : > { %3029 = vadd.xlane.f32.xlu0 %v3028_v38 }
 0xcf2   : > { %v3033_v19 = vpop.xlane.xlu1 %3032 }
 0xcf3   : > { %v3035_v40 = vmul.f32 0.03125, %v3033_v19 }
 0xcf4   : > { %v3030_v41 = vpop.xlane.xlu0 %3029 }
 0xcf5   : > { %v3034_v42 = vmul.f32 0.03125, %v3030_v41  ;;  %v3037_v21 = vsub.f32 %v4783_v34, %v3035_v40  ;;  %v3082_v41 = vsub.s32 0, %v3081_v22 }
 0xcf7   : > { %v3036_v44 = vsub.f32 %v4787_v36, %v3034_v42  ;;  %v3039_v46 = vmul.f32 %v3037_v21, %v3037_v21  ;;  %v3083_v42 = vrot.slane %v3078_v28, %v3082_v41 }
 0xcf9   : > { %v3038_v45 = vmul.f32 %v3036_v44, %v3036_v44  ;;  %v3043_v47 = vsel %vm591_vm0, %v3039_v46, 0.0 }
 0xcfb   : > { %v3040_v43 = vsel %vm591_vm0, %v3038_v45, 0.0 }
 0xcfc   : > { %3041 = vadd.xlane.f32.xlu0 %v3040_v43 }
 0xd00   : > { %3044 = vadd.xlane.f32.xlu0 %v3043_v47 }
 0xd85   : > { %v3042_v57 = vpop.xlane.xlu0 %3041 }
 0xd86   : > { %v3046_v58 = vmul.f32 0.03125, %v3042_v57 }
 0xd88   : > { %v3048_v59 = vadd.f32 1e-05, %v3046_v58 }
 0xd89   : > { %v3045_v53 = vpop.xlane.xlu0 %3044 }
 0xd8a   : > { %3983 = vrsqrt.f32 %v3048_v59  ;;  %v3047_v62 = vmul.f32 0.03125, %v3045_v53 }
 0xd8c   : > { %v3049_v63 = vadd.f32 1e-05, %v3047_v62 }
 0xd8e   : > { %3985 = vrsqrt.f32 %v3049_v63 }
 0xd97   : > { %v3984_v0 = vpop.eup %3983 }
 0xd98   : > { %v3052_v4 = vmul.f32 %v3984_v0, %v3036_v44 }
 0xd9a   : > { %v3060_v7 = vmul.f32 %v3482_v1, %v3052_v4 }
 0xd9b   : > { %v3986_v5 = vpop.eup %3985 }
 0xd9c   : > { %v3068_v8 = vadd.f32 %v3483_v60, %v3060_v7  ;;  %v3053_v9 = vmul.f32 %v3986_v5, %v3037_v21 }
 0xd9e   : > { %3484 = vmatmul.mubr.msk.f32.vlgmr.msra.gmra.mxu1 %vm591_vm0, %v3068_v8  ;;  %v3061_v6 = vmul.f32 %v3482_v1, %v3053_v9 }
 0xd9f   : > { %3166 = vmatprep.mubr.f32.mxu1 %v4158_v54  ;;  %v3486_v54 = vld [vmem:[%s4953_s16] ss:$0 sm:$0xff] }
 0xda0   : > { %v3069_v10 = vadd.f32 %v3483_v60, %v3061_v6 }
 0xda2   : > { %3485 = vmatmul.mubr.msk.f32.gmra.mxu1 %vm591_vm0, %v3069_v10 }
 0xe5e   : > { %v3162_v30 = vpop.f32.mrf.mxu1 }
 0xe5f   : > { %v3163_v43 = vadd.f32 %v3162_v30, %v3083_v42 }
 0xe60   : > { %v3164_v31 = vpop.f32.mrf.mxu1 }
 0xe61   : > { %v3165_v32 = vadd.f32 %v3164_v31, %v3087_v29 }
 0xe62   : > { %v3168_v33 = vpop.f32.mrf.mxu1 }
 0xe63   : > { %v3175_v35 = vmul.f32 0.70710677, %v3165_v32  ;;  %v3173_v44 = vmul.f32 0.5, %v3165_v32  ;;  %v3169_v50 = vadd.f32 %v3168_v33, %v3083_v42 }
 0xe64   : > { %v3170_v38 = vpop.f32.mrf.mxu1 }
 0xe65   : > { %3987 = verf.f32 %v3175_v35  ;;  %v3171_v19 = vadd.f32 %v3170_v38, %v3087_v29 }
 0xe67   : > { %v3176_v40 = vmul.f32 0.70710677, %v3171_v19  ;;  %v3174_v37 = vmul.f32 0.5, %v3171_v19 }
 0xe69   : > { %3989 = verf.f32 %v3176_v40 }
 0xe72   : > { %v3988_v21 = vpop.eup %3987 }
 0xe73   : > { %v3179_v45 = vadd.f32 1.0, %v3988_v21 }
 0xe75   : > { %v3181_v46 = vmul.f32 %v3179_v45, %v3173_v44 }
 0xe76   : > { %v3990_v47 = vpop.eup %3989 }
 0xe77   : > { %v3180_v48 = vadd.f32 1.0, %v3990_v47  ;;  %v3183_v49 = vmul.f32 %v3181_v46, %v3163_v43 }
 0xe79   : > { %v3182_v51 = vmul.f32 %v3180_v48, %v3174_v37  ;;  %3788 = vmatprep.mubr.f32.mxu0 %v3183_v49 }
 0xe7b   : > { %v3184_v52 = vmul.f32 %v3182_v51, %v3169_v50 }
 0xe7d   : > { %3789 = vmatmul.mubr.f32.vlgmr.msra.gmra.mxu0 %v3184_v52 }
 0xf3d   : > { %v3790_v55 = vpop.f32.mrf.mxu0 }
 0xf3e   : > { %v3280_v39 = vadd.f32 %v3790_v55, %v3486_v54 }
 0xf3f   : > { %v3274_v56 = vpop.f32.mrf.mxu0 }
 0xf40   : > { %v3284_v57 = vadd.f32 %v3280_v39, %v4783_v34  ;;  %v3275_v58 = vadd.f32 %v3486_v54, %v3274_v56 }
 0xf42   : > { %3286 = vst.msk [vmem:[#allocation2 + $0x8] sm:$0xff] %vm591_vm0, %v3284_v57  ;;  %v3283_v59 = vadd.f32 %v3275_v58, %v4787_v36 }
 0xf44   : > { %3285 = vst.msk [vmem:[#allocation2] sm:$0xff] %vm591_vm0, %v3283_v59 }
 0xf49   : > { %v3288_v53 = vld [vmem:[#allocation2 + $0x8] sm:$0xff] }
 0xf4a   : > { %3290 = vst.msk [vmem:[%s583_s0 + $0x8] sm:$0xff] %vm591_vm0, %v3288_v53 }
 0xf4b   : > { %v3287_v34 = vld [vmem:[#allocation2] sm:$0xff] }
 0xf4c   : > { %3289 = vst.msk [vmem:[%s583_s0] sm:$0xff] %vm591_vm0, %v3287_v34 }
 0xf4d   : > { %4082 = shalt.err (!%p4079_p0)
}
 0xf4e   : > { %s4083_s19 = scalar_lea.hbm %s4890_s17, 256  ;;  %s4087_s27 = scalar_lea.hbm %s4998_s21, 512 }
 0xf4f   : > { %p4084_p9 = scmp.ne.s32.totalorder %s4890_s17, %s4083_s19  ;;  %p4088_p3 = scmp.lt.s32.totalorder %s4890_s17, %s4998_s21 }
 0xf50   : > { %p4089_p5 = scmp.lt.s32.totalorder %s4087_s27, %s4083_s19 }
 0xf51   : > { %p4085_p1 = pnand %p4084_p9, %p4999_p12 }
 0xf52   : > { %p4090_p6 = por %p4089_p5, %p4088_p3 }
 0xf53   : > { %p4086_p13 = pneg %p4085_p1 }
 0xf55   : > { %p4091_p10 = pnand %p4090_p6, %p4086_p13 }
 0xf57   : > { %4094 = shalt.err (!%p4091_p10)
}
 0xf58   : > { %s4160_s28 = smov 128  }
 0xf59   : > { %3803 = dma.vmem_to_hbm [thread:$0]  (%p4999_p12), %s4893_s20, 256, %s4890_s17, %s4896_s23, %s4160_s28, %s4160_s28, %s4155_s24  }
 0xf5a PF: > { %s5000_s18 = sld [smem:[#allocation18_spill]] }
 0xf5b   : > { %s5001_s29 = sld [smem:[#allocation16_spill]] }
 0xf5c   : > { %s5002_s22 = sld [smem:[#allocation21_spill]] }
 0xf60   : > { %p3825_p2 = scmp.ge.s32.totalorder %s5000_s18, 2 }
 0xf61   : > { %s3320_s0 = sand.u32 1, %s5001_s29  }
 0xf62   : > { %p5003_p4 = scmp.ne.s32.totalorder %s5002_s22, 0  ;;  %s3321_s19 = scalar_lea.sflag [#allocation8], %s3320_s0 }
 0xf64   : > { %p3816_p7 = pnand %p3825_p2, %p5003_p4 }
 0xf66   : > { %p3817_p8 = pneg %p3816_p7 }
 0xf68   : > { %4120 = dma.done.wait (%p3817_p8), %s3321_s19, 256  }
 0xf69   : > { %4122 = vsyncadd (%p3817_p8), %s3321_s19, 4294967040  ;;  %s5004_s27 = sld [smem:[#allocation19_spill]]  ;;  %s5007_s24 = smov %s4129_s25 }
 0xf6a   : > { %s5005_s1 = sld [smem:[#allocation17_spill]] }
 0xf6b   : > { %s5006_s26 = sld [smem:[#allocation20_spill]] }
 0xf6f   : > { %p29_p11 = scmp.ge.s32.totalorder %s5004_s27, 4  }
 0xf70   : > { %s5008_s25 = smov %s5005_s1 }
 0xf71   :  { %31 = sbr.rel (!%p29_p11) target bundleno = 9 (0x9), region = 145 }
 0xf76   :  { %3326 = vsyncpa [#allocation7], 1 }
 0xf77   :  { %3328 = vsyncpa [#allocation7 + $0x1], 1 }
 0xf78   :  { %3329 = vsyncpa [#allocation10], 1 }
 0xf79   :  { %3330 = vsyncpa [#allocation8], 1 }
 0xf7a   :  { %3332 = vsyncpa [#allocation8 + $0x1], 1 }

</bundles_post_ra>
